<compile_context>
chip_gen: v7x
topology: tpu7x:2x2x1
jax: 0.10.0
libtpu: 0.0.40
codegen_flags: <defaults>
</compile_context>

<pallas_src>
import numpy as np

import jax
import jax.numpy as jnp
from jax.experimental import pallas as pl
from jax.experimental.pallas import tpu as pltpu


# ---------------------------------------------------------------------------
# Fused whole-network kernel (one grid step == B samples)
# ---------------------------------------------------------------------------
def _network_kernel(x_ref, wb1_ref, b1_ref, wb2_ref, b2_ref, gf_ref, fb1_ref,
                    q1w_ref, q1b_ref, q2w_ref, q2b_ref, q3w_ref, q3b_ref,
                    o_ref):
    f32 = jnp.float32
    cdt = wb1_ref.dtype            # matmul-operand dtype (bf16 fast / f32 ref)
    B = o_ref.shape[0]             # samples per grid step

    # conv1 (3x3 valid, 1/255 folded into wb1).
    # x rows are (i*B + b_local), lanes are (j*3 + c) zero-padded to 128.
    # Each band slice is a contiguous sublane range; M = 12*B.
    acc = jnp.dot(x_ref[0:12 * B, :], wb1_ref[0], preferred_element_type=f32)
    for kh in range(1, 3):
        acc = acc + jnp.dot(x_ref[kh * B:(kh + 12) * B, :], wb1_ref[kh],
                            preferred_element_type=f32)
    y1 = jnp.maximum(acc + b1_ref[...], 0.0).astype(cdt)       # (12B, 384)

    # conv2 (5x5 valid): rows (oi*B + b), cols (oj*16 + co); M = 8*B.
    acc = jnp.dot(y1[0:8 * B, :], wb2_ref[0], preferred_element_type=f32)
    for kh in range(1, 5):
        acc = acc + jnp.dot(y1[kh * B:(kh + 8) * B, :], wb2_ref[kh],
                            preferred_element_type=f32)
    y2 = jnp.maximum(acc + b2_ref[...], 0.0).astype(cdt)       # (8B, 128)

    # fc1: NCHW-flatten permutation folded into gf; 8 contiguous-plane dots
    # of (B,128) x (128,32)  (equivalent to one (B,1024) x (1024,32) matmul).
    acc = jnp.dot(y2[0:B, :], gf_ref[0], preferred_element_type=f32)
    for oi in range(1, 8):
        acc = acc + jnp.dot(y2[oi * B:(oi + 1) * B, :], gf_ref[oi],
                            preferred_element_type=f32)
    h = jnp.maximum(acc + fb1_ref[...], 0.0).astype(cdt)       # (B, 32)

    # q-network head, M = B.
    h = jnp.maximum(jnp.dot(h, q1w_ref[...], preferred_element_type=f32)
                    + q1b_ref[...], 0.0).astype(cdt)           # (B, 64)
    h = jnp.maximum(jnp.dot(h, q2w_ref[...], preferred_element_type=f32)
                    + q2b_ref[...], 0.0).astype(cdt)           # (B, 64)
    q = jnp.dot(h, q3w_ref[...], preferred_element_type=f32) + q3b_ref[...]

    o_ref[...] = q                                             # (B, 128) slab store


_WEIGHT_KEYS = ("wb1", "b1", "wb2", "b2", "gf", "fb1",
                "q1w", "q1b", "q2w", "q2b", "q3w", "q3b")


def _round_up(x, m):
    return (x + m - 1) // m * m


def _batch_tile(n):
    """Samples per grid step: large enough to fill the MXU M dimension and
    amortize per-step overhead, small enough to keep intermediates a few MB,
    and keeping >= 2 grid steps when possible so v7x megacore can split the
    batch across its two TensorCores."""
    b = min(128, _round_up(n, 8))
    if n > 8 and (n + b - 1) // b < 2:
        b = max(8, _round_up((n + 1) // 2, 8))
    return b


@jax.jit
def forward(prep, x):
    """x: (N, 3, 14, 14) NCHW pixels in [0, 255] -> q values (N, 4)."""
    n = x.shape[0]
    b = _batch_tile(n)
    t = (n + b - 1) // b
    n_pad = t * b
    cdt = prep["wb1"].dtype

    # Tiny wrapper-side layout glue:
    #   NCHW -> per-tile rows (i*B + b_local), lanes (j*3 + c) padded to 128.
    # TODO(synk): if upstream pixels arrive as uint8, keep them uint8 here and
    # cast in-kernel to cut input HBM->VMEM traffic a further 2-4x.
    xs = x.astype(cdt)
    xs = jnp.pad(xs, ((0, n_pad - n), (0, 0), (0, 0), (0, 0)))
    xs = xs.transpose(2, 0, 3, 1).reshape(14, n_pad, 42)        # [i, n, j*3+c]
    xs = jnp.pad(xs, ((0, 0), (0, 0), (0, 128 - 42)))           # lane-align K
    xs = xs.reshape(14, t, b, 128).transpose(1, 0, 2, 3).reshape(t * 14 * b, 128)

    def const_spec(a):
        nd = a.ndim
        return pl.BlockSpec(a.shape, lambda i, _nd=nd: (0,) * _nd)

    weights = [prep[k] for k in _WEIGHT_KEYS]

    out = pl.pallas_call(
        _network_kernel,
        out_shape=jax.ShapeDtypeStruct((t * b, 128), jnp.float32),
        grid=(t,),
        in_specs=[pl.BlockSpec((14 * b, 128), lambda i: (i, 0))]
                 + [const_spec(w) for w in weights],
        out_specs=pl.BlockSpec((b, 128), lambda i: (i, 0)),
        compiler_params=pltpu.CompilerParams(
            dimension_semantics=("parallel",),
            vmem_limit_bytes=32 * 1024 * 1024),   # safe on v5e/v6e/v7x
    )(xs, *weights)

    return out[:n, :4]


# ---------------------------------------------------------------------------
# One-time weight preparation (all transposes / reorderings done here, once)
# ---------------------------------------------------------------------------
def prep_params(params, dtype=jnp.bfloat16):
    """`dtype` is the matmul-operand dtype (bf16 fast path, f32 validation
    path); biases and all accumulation stay f32."""
    w1 = np.asarray(params["conv1_w"], np.float32) / 255.0   # fold x/255 prescale
    b1 = np.asarray(params["conv1_b"], np.float32)
    w2 = np.asarray(params["conv2_w"], np.float32)
    b2 = np.asarray(params["conv2_b"], np.float32)
    f1 = np.asarray(params["fc1_w"], np.float32)             # (32, 1024)

    # conv1 banded weights, K lane-padded to 128 (rows 42..127 stay zero):
    # out[i*B+b, j*32+co] += sum_{jx,c} x[(i+kh)*B+b, jx*3+c] * wb1[kh, jx*3+c, j*32+co]
    wb1 = np.zeros((3, 128, 12 * 32), np.float32)
    for kh in range(3):
        for kw in range(3):
            blk = w1[:, :, kh, kw].T                          # (cin=3, cout=32)
            for j in range(12):
                wb1[kh, (j + kw) * 3:(j + kw) * 3 + 3, j * 32:(j + 1) * 32] = blk
    b1t = np.tile(b1, 12)[None, :]                            # (1, 384)

    # conv2 banded weights (K = 12*32 = 384):
    # TODO(synk): wb2 is only ~8% dense; an im2col-along-width formulation
    # (K = cin*kw = 160) would cut conv2 MXU passes ~2.4x now that batching
    # makes conv2 the FLOP hotspot.
    wb2 = np.zeros((5, 12 * 32, 8 * 16), np.float32)
    for kh in range(5):
        for kw in range(5):
            blk = w2[:, :, kh, kw].T                          # (cin=32, cout=16)
            for oj in range(8):
                wb2[kh, (oj + kw) * 32:(oj + kw + 1) * 32,
                    oj * 16:(oj + 1) * 16] = blk
    b2t = np.tile(b2, 8)[None, :]                             # (1, 128)

    # fc1: PyTorch flatten order is cout*64 + oi*8 + oj; our y2 columns are
    # (oj*16 + cout)  ->  gf[oi, oj*16+cout, m]
    gf = f1.reshape(32, 16, 8, 8).transpose(2, 3, 1, 0).reshape(8, 128, 32)

    # final head padded to a lane-dense 128-wide output (wrapper slices [:, :4])
    q3w = np.zeros((64, 128), np.float32)
    q3w[:, :4] = np.asarray(params["q3_w"], np.float32).T
    q3b = np.zeros((1, 128), np.float32)
    q3b[0, :4] = np.asarray(params["q3_b"], np.float32)

    return {
        "wb1": jnp.asarray(wb1, dtype), "b1": jnp.asarray(b1t),
        "wb2": jnp.asarray(wb2, dtype), "b2": jnp.asarray(b2t),
        "gf": jnp.asarray(gf, dtype),
        "fb1": jnp.asarray(np.asarray(params["fc1_b"], np.float32).reshape(1, 32)),
        "q1w": jnp.asarray(np.asarray(params["q1_w"], np.float32).T, dtype),
        "q1b": jnp.asarray(np.asarray(params["q1_b"], np.float32).reshape(1, 64)),
        "q2w": jnp.asarray(np.asarray(params["q2_w"], np.float32).T, dtype),
        "q2b": jnp.asarray(np.asarray(params["q2_b"], np.float32).reshape(1, 64)),
        "q3w": jnp.asarray(q3w, dtype), "q3b": jnp.asarray(q3b),
    }


# ---------------------------------------------------------------------------
# Parameters (deterministic, PyTorch-like uniform(-1/sqrt(fan_in), +1/sqrt(fan_in)))
# ---------------------------------------------------------------------------
def init_params(key):
    ks = jax.random.split(key, 12)

    def u(k, shape, fan_in):
        bound = 1.0 / float(fan_in) ** 0.5
        return jax.random.uniform(k, shape, jnp.float32, -bound, bound)

    return {
        "conv1_w": u(ks[0], (32, 3, 3, 3), 3 * 3 * 3),
        "conv1_b": u(ks[1], (32,), 3 * 3 * 3),
        "conv2_w": u(ks[2], (16, 32, 5, 5), 32 * 5 * 5),
        "conv2_b": u(ks[3], (16,), 32 * 5 * 5),
        "fc1_w":   u(ks[4], (32, 1024), 1024),
        "fc1_b":   u(ks[5], (32,), 1024),
        "q1_w":    u(ks[6], (64, 32), 32),
        "q1_b":    u(ks[7], (64,), 32),
        "q2_w":    u(ks[8], (64, 64), 64),
        "q2_b":    u(ks[9], (64,), 64),
        "q3_w":    u(ks[10], (4, 64), 64),
        "q3_b":    u(ks[11], (4,), 64),
    }


# ---------------------------------------------------------------------------
# Pure-JAX reference for correctness checking (mirrors Network.forward)
# ---------------------------------------------------------------------------
def reference(params, x):
    xs = x / 255.0

    def conv(z, w, b):
        y = jax.lax.conv_general_dilated(
            z, w, (1, 1), "VALID", dimension_numbers=("NCHW", "OIHW", "NCHW"))
        return y + b.reshape(1, -1, 1, 1)

    y = jax.nn.relu(conv(xs, params["conv1_w"], params["conv1_b"]))
    y = jax.nn.relu(conv(y, params["conv2_w"], params["conv2_b"]))
    f = y.reshape(-1, 1024)
    h = jax.nn.relu(f @ params["fc1_w"].T + params["fc1_b"])
    # TODO(synk): self.fta is constructed in __init__ but never applied in
    # forward() of the reference module, so it is intentionally not used here.
    h = jax.nn.relu(h @ params["q1_w"].T + params["q1_b"])
    h = jax.nn.relu(h @ params["q2_w"].T + params["q2_b"])
    return h @ params["q3_w"].T + params["q3_b"]


if __name__ == "__main__":
    key = jax.random.PRNGKey(0)
    pkey, xkey1, xkey2 = jax.random.split(key, 3)
    params = init_params(pkey)

    prep_bf16 = prep_params(params)                      # fast (bf16-operand) path
    prep_f32 = prep_params(params, dtype=jnp.float32)    # f32 validation path

    # Small deterministic inputs, pixel-like values in [0, 255].
    # x_big exercises the multi-tile grid (>= 2 grid steps) + batch padding.
    x_small = jax.random.uniform(xkey1, (2, 3, 14, 14), jnp.float32, 0.0, 255.0)
    x_big = jax.random.uniform(xkey2, (20, 3, 14, 14), jnp.float32, 0.0, 255.0)

    for xi in (x_small, x_big):
        ref = jax.block_until_ready(reference(params, xi))
        out32 = jax.block_until_ready(forward(prep_f32, xi))
        out16 = jax.block_until_ready(forward(prep_bf16, xi))
        assert out32.shape == (xi.shape[0], 4), out32.shape
        assert jnp.allclose(out32, ref, atol=2e-4, rtol=2e-4), (
            float(jnp.max(jnp.abs(out32 - ref))))
        # bf16 operands with f32 accumulation -> looser tolerance, per review.
        assert jnp.allclose(out16, ref, atol=1e-2, rtol=5e-2), (
            float(jnp.max(jnp.abs(out16 - ref))))

    print("KERNEL_OK")
</pallas_src>

<mosaic_0001>
module attributes {stable_mosaic.version = 11 : i64} {
  func.func @_network_kernel(%arg0: i32, %arg1: memref<112x128xf32, #tpu.memory_space<vmem>>, %arg2: memref<3x128x384xf32, #tpu.memory_space<vmem>>, %arg3: memref<1x384xf32, #tpu.memory_space<vmem>>, %arg4: memref<5x384x128xf32, #tpu.memory_space<vmem>>, %arg5: memref<1x128xf32, #tpu.memory_space<vmem>>, %arg6: memref<8x128x32xf32, #tpu.memory_space<vmem>>, %arg7: memref<1x32xf32, #tpu.memory_space<vmem>>, %arg8: memref<32x64xf32, #tpu.memory_space<vmem>>, %arg9: memref<1x64xf32, #tpu.memory_space<vmem>>, %arg10: memref<64x64xf32, #tpu.memory_space<vmem>>, %arg11: memref<1x64xf32, #tpu.memory_space<vmem>>, %arg12: memref<64x128xf32, #tpu.memory_space<vmem>>, %arg13: memref<1x128xf32, #tpu.memory_space<vmem>>, %arg14: memref<8x128xf32, #tpu.memory_space<vmem>>) attributes {dimension_semantics = [#tpu.dimension_semantics<parallel>], iteration_bounds = array<i64: 1>, scalar_prefetch = 0 : i64, scratch_operands = 0 : i64, tpu.core_type = #tpu.core_type<tc>, window_params = [{transform_indices = @transform_0, window_bounds = array<i64: 112, 128>}, {pipeline_mode = #tpu.pipeline_mode<synchronous>, transform_indices = @transform_1, window_bounds = array<i64: 3, 128, 384>}, {pipeline_mode = #tpu.pipeline_mode<synchronous>, transform_indices = @transform_2, window_bounds = array<i64: 1, 384>}, {pipeline_mode = #tpu.pipeline_mode<synchronous>, transform_indices = @transform_3, window_bounds = array<i64: 5, 384, 128>}, {pipeline_mode = #tpu.pipeline_mode<synchronous>, transform_indices = @transform_4, window_bounds = array<i64: 1, 128>}, {pipeline_mode = #tpu.pipeline_mode<synchronous>, transform_indices = @transform_5, window_bounds = array<i64: 8, 128, 32>}, {pipeline_mode = #tpu.pipeline_mode<synchronous>, transform_indices = @transform_6, window_bounds = array<i64: 1, 32>}, {pipeline_mode = #tpu.pipeline_mode<synchronous>, transform_indices = @transform_7, window_bounds = array<i64: 32, 64>}, {pipeline_mode = #tpu.pipeline_mode<synchronous>, transform_indices = @transform_8, window_bounds = array<i64: 1, 64>}, {pipeline_mode = #tpu.pipeline_mode<synchronous>, transform_indices = @transform_9, window_bounds = array<i64: 64, 64>}, {pipeline_mode = #tpu.pipeline_mode<synchronous>, transform_indices = @transform_10, window_bounds = array<i64: 1, 64>}, {pipeline_mode = #tpu.pipeline_mode<synchronous>, transform_indices = @transform_11, window_bounds = array<i64: 64, 128>}, {pipeline_mode = #tpu.pipeline_mode<synchronous>, transform_indices = @transform_12, window_bounds = array<i64: 1, 128>}, {transform_indices = @transform_13, window_bounds = array<i64: 8, 128>}]} {
    %c0 = arith.constant 0 : index
    %c0_0 = arith.constant 0 : index
    %0 = vector.load %arg1[%c0, %c0_0] : memref<112x128xf32, #tpu.memory_space<vmem>>, vector<96x128xf32>
    %c0_1 = arith.constant 0 : index
    %c0_2 = arith.constant 0 : index
    %c0_3 = arith.constant 0 : index
    %1 = vector.load %arg2[%c0_1, %c0_2, %c0_3] : memref<3x128x384xf32, #tpu.memory_space<vmem>>, vector<1x128x384xf32>
    %2 = vector.shape_cast %1 : vector<1x128x384xf32> to vector<128x384xf32>
    %cst = arith.constant dense<0.000000e+00> : vector<96x384xf32>
    %3 = tpu.matmul %0, %2, %cst {dimension_numbers = #tpu.dot_dimension_numbers<[1], [0], [0], [1], [0, 0, 1, 1], [], []>} : vector<96x128xf32>, vector<128x384xf32>, vector<96x384xf32> -> vector<96x384xf32>
    %c8 = arith.constant 8 : index
    %c0_4 = arith.constant 0 : index
    %4 = vector.load %arg1[%c8, %c0_4] : memref<112x128xf32, #tpu.memory_space<vmem>>, vector<96x128xf32>
    %c1 = arith.constant 1 : index
    %c0_5 = arith.constant 0 : index
    %c0_6 = arith.constant 0 : index
    %5 = vector.load %arg2[%c1, %c0_5, %c0_6] : memref<3x128x384xf32, #tpu.memory_space<vmem>>, vector<1x128x384xf32>
    %6 = vector.shape_cast %5 : vector<1x128x384xf32> to vector<128x384xf32>
    %cst_7 = arith.constant dense<0.000000e+00> : vector<96x384xf32>
    %7 = tpu.matmul %4, %6, %cst_7 {dimension_numbers = #tpu.dot_dimension_numbers<[1], [0], [0], [1], [0, 0, 1, 1], [], []>} : vector<96x128xf32>, vector<128x384xf32>, vector<96x384xf32> -> vector<96x384xf32>
    %8 = arith.addf %3, %7 : vector<96x384xf32>
    %c16 = arith.constant 16 : index
    %c0_8 = arith.constant 0 : index
    %9 = vector.load %arg1[%c16, %c0_8] : memref<112x128xf32, #tpu.memory_space<vmem>>, vector<96x128xf32>
    %c2 = arith.constant 2 : index
    %c0_9 = arith.constant 0 : index
    %c0_10 = arith.constant 0 : index
    %10 = vector.load %arg2[%c2, %c0_9, %c0_10] : memref<3x128x384xf32, #tpu.memory_space<vmem>>, vector<1x128x384xf32>
    %11 = vector.shape_cast %10 : vector<1x128x384xf32> to vector<128x384xf32>
    %cst_11 = arith.constant dense<0.000000e+00> : vector<96x384xf32>
    %12 = tpu.matmul %9, %11, %cst_11 {dimension_numbers = #tpu.dot_dimension_numbers<[1], [0], [0], [1], [0, 0, 1, 1], [], []>} : vector<96x128xf32>, vector<128x384xf32>, vector<96x384xf32> -> vector<96x384xf32>
    %13 = arith.addf %8, %12 : vector<96x384xf32>
    %c0_12 = arith.constant 0 : index
    %c0_13 = arith.constant 0 : index
    %14 = vector.load %arg3[%c0_12, %c0_13] : memref<1x384xf32, #tpu.memory_space<vmem>>, vector<1x384xf32>
    %15 = vector.broadcast %14 : vector<1x384xf32> to vector<96x384xf32>
    %16 = arith.addf %13, %15 : vector<96x384xf32>
    %cst_14 = arith.constant 0.000000e+00 : f32
    %17 = vector.broadcast %cst_14 : f32 to vector<96x384xf32>
    %18 = arith.maximumf %16, %17 : vector<96x384xf32>
    %19 = vector.extract_strided_slice %18 {offsets = [0, 0], sizes = [64, 384], strides = [1, 1]} : vector<96x384xf32> to vector<64x384xf32>
    %c0_15 = arith.constant 0 : index
    %c0_16 = arith.constant 0 : index
    %c0_17 = arith.constant 0 : index
    %20 = vector.load %arg4[%c0_15, %c0_16, %c0_17] : memref<5x384x128xf32, #tpu.memory_space<vmem>>, vector<1x384x128xf32>
    %21 = vector.shape_cast %20 : vector<1x384x128xf32> to vector<384x128xf32>
    %cst_18 = arith.constant dense<0.000000e+00> : vector<64x128xf32>
    %22 = tpu.matmul %19, %21, %cst_18 {dimension_numbers = #tpu.dot_dimension_numbers<[1], [0], [0], [1], [0, 0, 1, 1], [], []>} : vector<64x384xf32>, vector<384x128xf32>, vector<64x128xf32> -> vector<64x128xf32>
    %23 = vector.extract_strided_slice %18 {offsets = [8, 0], sizes = [64, 384], strides = [1, 1]} : vector<96x384xf32> to vector<64x384xf32>
    %c1_19 = arith.constant 1 : index
    %c0_20 = arith.constant 0 : index
    %c0_21 = arith.constant 0 : index
    %24 = vector.load %arg4[%c1_19, %c0_20, %c0_21] : memref<5x384x128xf32, #tpu.memory_space<vmem>>, vector<1x384x128xf32>
    %25 = vector.shape_cast %24 : vector<1x384x128xf32> to vector<384x128xf32>
    %cst_22 = arith.constant dense<0.000000e+00> : vector<64x128xf32>
    %26 = tpu.matmul %23, %25, %cst_22 {dimension_numbers = #tpu.dot_dimension_numbers<[1], [0], [0], [1], [0, 0, 1, 1], [], []>} : vector<64x384xf32>, vector<384x128xf32>, vector<64x128xf32> -> vector<64x128xf32>
    %27 = arith.addf %22, %26 : vector<64x128xf32>
    %28 = vector.extract_strided_slice %18 {offsets = [16, 0], sizes = [64, 384], strides = [1, 1]} : vector<96x384xf32> to vector<64x384xf32>
    %c2_23 = arith.constant 2 : index
    %c0_24 = arith.constant 0 : index
    %c0_25 = arith.constant 0 : index
    %29 = vector.load %arg4[%c2_23, %c0_24, %c0_25] : memref<5x384x128xf32, #tpu.memory_space<vmem>>, vector<1x384x128xf32>
    %30 = vector.shape_cast %29 : vector<1x384x128xf32> to vector<384x128xf32>
    %cst_26 = arith.constant dense<0.000000e+00> : vector<64x128xf32>
    %31 = tpu.matmul %28, %30, %cst_26 {dimension_numbers = #tpu.dot_dimension_numbers<[1], [0], [0], [1], [0, 0, 1, 1], [], []>} : vector<64x384xf32>, vector<384x128xf32>, vector<64x128xf32> -> vector<64x128xf32>
    %32 = arith.addf %27, %31 : vector<64x128xf32>
    %33 = vector.extract_strided_slice %18 {offsets = [24, 0], sizes = [64, 384], strides = [1, 1]} : vector<96x384xf32> to vector<64x384xf32>
    %c3 = arith.constant 3 : index
    %c0_27 = arith.constant 0 : index
    %c0_28 = arith.constant 0 : index
    %34 = vector.load %arg4[%c3, %c0_27, %c0_28] : memref<5x384x128xf32, #tpu.memory_space<vmem>>, vector<1x384x128xf32>
    %35 = vector.shape_cast %34 : vector<1x384x128xf32> to vector<384x128xf32>
    %cst_29 = arith.constant dense<0.000000e+00> : vector<64x128xf32>
    %36 = tpu.matmul %33, %35, %cst_29 {dimension_numbers = #tpu.dot_dimension_numbers<[1], [0], [0], [1], [0, 0, 1, 1], [], []>} : vector<64x384xf32>, vector<384x128xf32>, vector<64x128xf32> -> vector<64x128xf32>
    %37 = arith.addf %32, %36 : vector<64x128xf32>
    %38 = vector.extract_strided_slice %18 {offsets = [32, 0], sizes = [64, 384], strides = [1, 1]} : vector<96x384xf32> to vector<64x384xf32>
    %c4 = arith.constant 4 : index
    %c0_30 = arith.constant 0 : index
    %c0_31 = arith.constant 0 : index
    %39 = vector.load %arg4[%c4, %c0_30, %c0_31] : memref<5x384x128xf32, #tpu.memory_space<vmem>>, vector<1x384x128xf32>
    %40 = vector.shape_cast %39 : vector<1x384x128xf32> to vector<384x128xf32>
    %cst_32 = arith.constant dense<0.000000e+00> : vector<64x128xf32>
    %41 = tpu.matmul %38, %40, %cst_32 {dimension_numbers = #tpu.dot_dimension_numbers<[1], [0], [0], [1], [0, 0, 1, 1], [], []>} : vector<64x384xf32>, vector<384x128xf32>, vector<64x128xf32> -> vector<64x128xf32>
    %42 = arith.addf %37, %41 : vector<64x128xf32>
    %c0_33 = arith.constant 0 : index
    %c0_34 = arith.constant 0 : index
    %43 = vector.load %arg5[%c0_33, %c0_34] : memref<1x128xf32, #tpu.memory_space<vmem>>, vector<1x128xf32>
    %44 = vector.broadcast %43 : vector<1x128xf32> to vector<64x128xf32>
    %45 = arith.addf %42, %44 : vector<64x128xf32>
    %cst_35 = arith.constant 0.000000e+00 : f32
    %46 = vector.broadcast %cst_35 : f32 to vector<64x128xf32>
    %47 = arith.maximumf %45, %46 : vector<64x128xf32>
    %48 = vector.extract_strided_slice %47 {offsets = [0, 0], sizes = [8, 128], strides = [1, 1]} : vector<64x128xf32> to vector<8x128xf32>
    %c0_36 = arith.constant 0 : index
    %c0_37 = arith.constant 0 : index
    %c0_38 = arith.constant 0 : index
    %49 = vector.load %arg6[%c0_36, %c0_37, %c0_38] : memref<8x128x32xf32, #tpu.memory_space<vmem>>, vector<1x128x32xf32>
    %50 = vector.shape_cast %49 : vector<1x128x32xf32> to vector<128x32xf32>
    %cst_39 = arith.constant dense<0.000000e+00> : vector<8x32xf32>
    %51 = tpu.matmul %48, %50, %cst_39 {dimension_numbers = #tpu.dot_dimension_numbers<[1], [0], [0], [1], [0, 0, 1, 1], [], []>} : vector<8x128xf32>, vector<128x32xf32>, vector<8x32xf32> -> vector<8x32xf32>
    %52 = vector.extract_strided_slice %47 {offsets = [8, 0], sizes = [8, 128], strides = [1, 1]} : vector<64x128xf32> to vector<8x128xf32>
    %c1_40 = arith.constant 1 : index
    %c0_41 = arith.constant 0 : index
    %c0_42 = arith.constant 0 : index
    %53 = vector.load %arg6[%c1_40, %c0_41, %c0_42] : memref<8x128x32xf32, #tpu.memory_space<vmem>>, vector<1x128x32xf32>
    %54 = vector.shape_cast %53 : vector<1x128x32xf32> to vector<128x32xf32>
    %cst_43 = arith.constant dense<0.000000e+00> : vector<8x32xf32>
    %55 = tpu.matmul %52, %54, %cst_43 {dimension_numbers = #tpu.dot_dimension_numbers<[1], [0], [0], [1], [0, 0, 1, 1], [], []>} : vector<8x128xf32>, vector<128x32xf32>, vector<8x32xf32> -> vector<8x32xf32>
    %56 = arith.addf %51, %55 : vector<8x32xf32>
    %57 = vector.extract_strided_slice %47 {offsets = [16, 0], sizes = [8, 128], strides = [1, 1]} : vector<64x128xf32> to vector<8x128xf32>
    %c2_44 = arith.constant 2 : index
    %c0_45 = arith.constant 0 : index
    %c0_46 = arith.constant 0 : index
    %58 = vector.load %arg6[%c2_44, %c0_45, %c0_46] : memref<8x128x32xf32, #tpu.memory_space<vmem>>, vector<1x128x32xf32>
    %59 = vector.shape_cast %58 : vector<1x128x32xf32> to vector<128x32xf32>
    %cst_47 = arith.constant dense<0.000000e+00> : vector<8x32xf32>
    %60 = tpu.matmul %57, %59, %cst_47 {dimension_numbers = #tpu.dot_dimension_numbers<[1], [0], [0], [1], [0, 0, 1, 1], [], []>} : vector<8x128xf32>, vector<128x32xf32>, vector<8x32xf32> -> vector<8x32xf32>
    %61 = arith.addf %56, %60 : vector<8x32xf32>
    %62 = vector.extract_strided_slice %47 {offsets = [24, 0], sizes = [8, 128], strides = [1, 1]} : vector<64x128xf32> to vector<8x128xf32>
    %c3_48 = arith.constant 3 : index
    %c0_49 = arith.constant 0 : index
    %c0_50 = arith.constant 0 : index
    %63 = vector.load %arg6[%c3_48, %c0_49, %c0_50] : memref<8x128x32xf32, #tpu.memory_space<vmem>>, vector<1x128x32xf32>
    %64 = vector.shape_cast %63 : vector<1x128x32xf32> to vector<128x32xf32>
    %cst_51 = arith.constant dense<0.000000e+00> : vector<8x32xf32>
    %65 = tpu.matmul %62, %64, %cst_51 {dimension_numbers = #tpu.dot_dimension_numbers<[1], [0], [0], [1], [0, 0, 1, 1], [], []>} : vector<8x128xf32>, vector<128x32xf32>, vector<8x32xf32> -> vector<8x32xf32>
    %66 = arith.addf %61, %65 : vector<8x32xf32>
    %67 = vector.extract_strided_slice %47 {offsets = [32, 0], sizes = [8, 128], strides = [1, 1]} : vector<64x128xf32> to vector<8x128xf32>
    %c4_52 = arith.constant 4 : index
    %c0_53 = arith.constant 0 : index
    %c0_54 = arith.constant 0 : index
    %68 = vector.load %arg6[%c4_52, %c0_53, %c0_54] : memref<8x128x32xf32, #tpu.memory_space<vmem>>, vector<1x128x32xf32>
    %69 = vector.shape_cast %68 : vector<1x128x32xf32> to vector<128x32xf32>
    %cst_55 = arith.constant dense<0.000000e+00> : vector<8x32xf32>
    %70 = tpu.matmul %67, %69, %cst_55 {dimension_numbers = #tpu.dot_dimension_numbers<[1], [0], [0], [1], [0, 0, 1, 1], [], []>} : vector<8x128xf32>, vector<128x32xf32>, vector<8x32xf32> -> vector<8x32xf32>
    %71 = arith.addf %66, %70 : vector<8x32xf32>
    %72 = vector.extract_strided_slice %47 {offsets = [40, 0], sizes = [8, 128], strides = [1, 1]} : vector<64x128xf32> to vector<8x128xf32>
    %c5 = arith.constant 5 : index
    %c0_56 = arith.constant 0 : index
    %c0_57 = arith.constant 0 : index
    %73 = vector.load %arg6[%c5, %c0_56, %c0_57] : memref<8x128x32xf32, #tpu.memory_space<vmem>>, vector<1x128x32xf32>
    %74 = vector.shape_cast %73 : vector<1x128x32xf32> to vector<128x32xf32>
    %cst_58 = arith.constant dense<0.000000e+00> : vector<8x32xf32>
    %75 = tpu.matmul %72, %74, %cst_58 {dimension_numbers = #tpu.dot_dimension_numbers<[1], [0], [0], [1], [0, 0, 1, 1], [], []>} : vector<8x128xf32>, vector<128x32xf32>, vector<8x32xf32> -> vector<8x32xf32>
    %76 = arith.addf %71, %75 : vector<8x32xf32>
    %77 = vector.extract_strided_slice %47 {offsets = [48, 0], sizes = [8, 128], strides = [1, 1]} : vector<64x128xf32> to vector<8x128xf32>
    %c6 = arith.constant 6 : index
    %c0_59 = arith.constant 0 : index
    %c0_60 = arith.constant 0 : index
    %78 = vector.load %arg6[%c6, %c0_59, %c0_60] : memref<8x128x32xf32, #tpu.memory_space<vmem>>, vector<1x128x32xf32>
    %79 = vector.shape_cast %78 : vector<1x128x32xf32> to vector<128x32xf32>
    %cst_61 = arith.constant dense<0.000000e+00> : vector<8x32xf32>
    %80 = tpu.matmul %77, %79, %cst_61 {dimension_numbers = #tpu.dot_dimension_numbers<[1], [0], [0], [1], [0, 0, 1, 1], [], []>} : vector<8x128xf32>, vector<128x32xf32>, vector<8x32xf32> -> vector<8x32xf32>
    %81 = arith.addf %76, %80 : vector<8x32xf32>
    %82 = vector.extract_strided_slice %47 {offsets = [56, 0], sizes = [8, 128], strides = [1, 1]} : vector<64x128xf32> to vector<8x128xf32>
    %c7 = arith.constant 7 : index
    %c0_62 = arith.constant 0 : index
    %c0_63 = arith.constant 0 : index
    %83 = vector.load %arg6[%c7, %c0_62, %c0_63] : memref<8x128x32xf32, #tpu.memory_space<vmem>>, vector<1x128x32xf32>
    %84 = vector.shape_cast %83 : vector<1x128x32xf32> to vector<128x32xf32>
    %cst_64 = arith.constant dense<0.000000e+00> : vector<8x32xf32>
    %85 = tpu.matmul %82, %84, %cst_64 {dimension_numbers = #tpu.dot_dimension_numbers<[1], [0], [0], [1], [0, 0, 1, 1], [], []>} : vector<8x128xf32>, vector<128x32xf32>, vector<8x32xf32> -> vector<8x32xf32>
    %86 = arith.addf %81, %85 : vector<8x32xf32>
    %c0_65 = arith.constant 0 : index
    %c0_66 = arith.constant 0 : index
    %87 = vector.load %arg7[%c0_65, %c0_66] : memref<1x32xf32, #tpu.memory_space<vmem>>, vector<1x32xf32>
    %88 = vector.broadcast %87 : vector<1x32xf32> to vector<8x32xf32>
    %89 = arith.addf %86, %88 : vector<8x32xf32>
    %cst_67 = arith.constant 0.000000e+00 : f32
    %90 = vector.broadcast %cst_67 : f32 to vector<8x32xf32>
    %91 = arith.maximumf %89, %90 : vector<8x32xf32>
    %c0_68 = arith.constant 0 : index
    %c0_69 = arith.constant 0 : index
    %92 = vector.load %arg8[%c0_68, %c0_69] : memref<32x64xf32, #tpu.memory_space<vmem>>, vector<32x64xf32>
    %cst_70 = arith.constant dense<0.000000e+00> : vector<8x64xf32>
    %93 = tpu.matmul %91, %92, %cst_70 {dimension_numbers = #tpu.dot_dimension_numbers<[1], [0], [0], [1], [0, 0, 1, 1], [], []>} : vector<8x32xf32>, vector<32x64xf32>, vector<8x64xf32> -> vector<8x64xf32>
    %c0_71 = arith.constant 0 : index
    %c0_72 = arith.constant 0 : index
    %94 = vector.load %arg9[%c0_71, %c0_72] : memref<1x64xf32, #tpu.memory_space<vmem>>, vector<1x64xf32>
    %95 = vector.broadcast %94 : vector<1x64xf32> to vector<8x64xf32>
    %96 = arith.addf %93, %95 : vector<8x64xf32>
    %cst_73 = arith.constant 0.000000e+00 : f32
    %97 = vector.broadcast %cst_73 : f32 to vector<8x64xf32>
    %98 = arith.maximumf %96, %97 : vector<8x64xf32>
    %c0_74 = arith.constant 0 : index
    %c0_75 = arith.constant 0 : index
    %99 = vector.load %arg10[%c0_74, %c0_75] : memref<64x64xf32, #tpu.memory_space<vmem>>, vector<64x64xf32>
    %cst_76 = arith.constant dense<0.000000e+00> : vector<8x64xf32>
    %100 = tpu.matmul %98, %99, %cst_76 {dimension_numbers = #tpu.dot_dimension_numbers<[1], [0], [0], [1], [0, 0, 1, 1], [], []>} : vector<8x64xf32>, vector<64x64xf32>, vector<8x64xf32> -> vector<8x64xf32>
    %c0_77 = arith.constant 0 : index
    %c0_78 = arith.constant 0 : index
    %101 = vector.load %arg11[%c0_77, %c0_78] : memref<1x64xf32, #tpu.memory_space<vmem>>, vector<1x64xf32>
    %102 = vector.broadcast %101 : vector<1x64xf32> to vector<8x64xf32>
    %103 = arith.addf %100, %102 : vector<8x64xf32>
    %cst_79 = arith.constant 0.000000e+00 : f32
    %104 = vector.broadcast %cst_79 : f32 to vector<8x64xf32>
    %105 = arith.maximumf %103, %104 : vector<8x64xf32>
    %c0_80 = arith.constant 0 : index
    %c0_81 = arith.constant 0 : index
    %106 = vector.load %arg12[%c0_80, %c0_81] : memref<64x128xf32, #tpu.memory_space<vmem>>, vector<64x128xf32>
    %cst_82 = arith.constant dense<0.000000e+00> : vector<8x128xf32>
    %107 = tpu.matmul %105, %106, %cst_82 {dimension_numbers = #tpu.dot_dimension_numbers<[1], [0], [0], [1], [0, 0, 1, 1], [], []>} : vector<8x64xf32>, vector<64x128xf32>, vector<8x128xf32> -> vector<8x128xf32>
    %c0_83 = arith.constant 0 : index
    %c0_84 = arith.constant 0 : index
    %108 = vector.load %arg13[%c0_83, %c0_84] : memref<1x128xf32, #tpu.memory_space<vmem>>, vector<1x128xf32>
    %109 = vector.broadcast %108 : vector<1x128xf32> to vector<8x128xf32>
    %110 = arith.addf %107, %109 : vector<8x128xf32>
    %c0_85 = arith.constant 0 : index
    %c0_86 = arith.constant 0 : index
    %111 = vector.load %arg14[%c0_85, %c0_86] : memref<8x128xf32, #tpu.memory_space<vmem>>, vector<8x128xf32>
    tpu.vector_store %arg14[%c0_85, %c0_86], %110 {strides = array<i32>} : memref<8x128xf32, #tpu.memory_space<vmem>>, vector<8x128xf32>,
    return
  }
  func.func @transform_0(%arg0: i32) -> (i32, i32) {
    %c0_i32 = arith.constant 0 : i32
    %c0_i32_0 = arith.constant 0 : i32
    return %arg0, %c0_i32 : i32, i32
  }
  func.func @transform_1(%arg0: i32) -> (i32, i32, i32) {
    %c0_i32 = arith.constant 0 : i32
    %c0_i32_0 = arith.constant 0 : i32
    %c0_i32_1 = arith.constant 0 : i32
    %c0_i32_2 = arith.constant 0 : i32
    return %c0_i32, %c0_i32_0, %c0_i32_1 : i32, i32, i32
  }
  func.func @transform_2(%arg0: i32) -> (i32, i32) {
    %c0_i32 = arith.constant 0 : i32
    %c0_i32_0 = arith.constant 0 : i32
    %c0_i32_1 = arith.constant 0 : i32
    return %c0_i32, %c0_i32_0 : i32, i32
  }
  func.func @transform_3(%arg0: i32) -> (i32, i32, i32) {
    %c0_i32 = arith.constant 0 : i32
    %c0_i32_0 = arith.constant 0 : i32
    %c0_i32_1 = arith.constant 0 : i32
    %c0_i32_2 = arith.constant 0 : i32
    return %c0_i32, %c0_i32_0, %c0_i32_1 : i32, i32, i32
  }
  func.func @transform_4(%arg0: i32) -> (i32, i32) {
    %c0_i32 = arith.constant 0 : i32
    %c0_i32_0 = arith.constant 0 : i32
    %c0_i32_1 = arith.constant 0 : i32
    return %c0_i32, %c0_i32_0 : i32, i32
  }
  func.func @transform_5(%arg0: i32) -> (i32, i32, i32) {
    %c0_i32 = arith.constant 0 : i32
    %c0_i32_0 = arith.constant 0 : i32
    %c0_i32_1 = arith.constant 0 : i32
    %c0_i32_2 = arith.constant 0 : i32
    return %c0_i32, %c0_i32_0, %c0_i32_1 : i32, i32, i32
  }
  func.func @transform_6(%arg0: i32) -> (i32, i32) {
    %c0_i32 = arith.constant 0 : i32
    %c0_i32_0 = arith.constant 0 : i32
    %c0_i32_1 = arith.constant 0 : i32
    return %c0_i32, %c0_i32_0 : i32, i32
  }
  func.func @transform_7(%arg0: i32) -> (i32, i32) {
    %c0_i32 = arith.constant 0 : i32
    %c0_i32_0 = arith.constant 0 : i32
    %c0_i32_1 = arith.constant 0 : i32
    return %c0_i32, %c0_i32_0 : i32, i32
  }
  func.func @transform_8(%arg0: i32) -> (i32, i32) {
    %c0_i32 = arith.constant 0 : i32
    %c0_i32_0 = arith.constant 0 : i32
    %c0_i32_1 = arith.constant 0 : i32
    return %c0_i32, %c0_i32_0 : i32, i32
  }
  func.func @transform_9(%arg0: i32) -> (i32, i32) {
    %c0_i32 = arith.constant 0 : i32
    %c0_i32_0 = arith.constant 0 : i32
    %c0_i32_1 = arith.constant 0 : i32
    return %c0_i32, %c0_i32_0 : i32, i32
  }
  func.func @transform_10(%arg0: i32) -> (i32, i32) {
    %c0_i32 = arith.constant 0 : i32
    %c0_i32_0 = arith.constant 0 : i32
    %c0_i32_1 = arith.constant 0 : i32
    return %c0_i32, %c0_i32_0 : i32, i32
  }
  func.func @transform_11(%arg0: i32) -> (i32, i32) {
    %c0_i32 = arith.constant 0 : i32
    %c0_i32_0 = arith.constant 0 : i32
    %c0_i32_1 = arith.constant 0 : i32
    return %c0_i32, %c0_i32_0 : i32, i32
  }
  func.func @transform_12(%arg0: i32) -> (i32, i32) {
    %c0_i32 = arith.constant 0 : i32
    %c0_i32_0 = arith.constant 0 : i32
    %c0_i32_1 = arith.constant 0 : i32
    return %c0_i32, %c0_i32_0 : i32, i32
  }
  func.func @transform_13(%arg0: i32) -> (i32, i32) {
    %c0_i32 = arith.constant 0 : i32
    %c0_i32_0 = arith.constant 0 : i32
    return %arg0, %c0_i32 : i32, i32
  }
}

</mosaic_0001>

<bundles_post_ra>
// kernel: forward.1
= control target key start
LH: loop header
LB: loop body
LE: loop exit
PB: predicated region body
PF: predicated region fallthrough
CT: control target
= control target key end

     0   :  { %18 = vsyncpa [#allocation3], 0  ;;  %s8453_s0 = inlined_call_operand.vmem [shape: f32[112,128], index: 0, kind: input, shape index: {}]   ;;  %s8454_s1 = inlined_call_operand.vmem [shape: f32[3,128,384], index: 1, kind: input, shape index: {}]   ;;  %s8455_s2 = inlined_call_operand.vmem [shape: f32[1,384], index: 2, kind: input, shape index: {}]   ;;  %s8456_s3 = inlined_call_operand.vmem [shape: f32[5,384,128], index: 3, kind: input, shape index: {}]   ;;  %s8457_s4 = inlined_call_operand.vmem [shape: f32[1,128], index: 4, kind: input, shape index: {}]   ;;  %s8458_s5 = inlined_call_operand.vmem [shape: f32[8,128,32], index: 5, kind: input, shape index: {}]   ;;  %s8459_s6 = inlined_call_operand.vmem [shape: f32[1,32], index: 6, kind: input, shape index: {}]   ;;  %s8460_s7 = inlined_call_operand.hbm [shape: f32[32,64], index: 7, kind: input, shape index: {}]   ;;  %s8461_s8 = inlined_call_operand.vmem [shape: f32[1,64], index: 8, kind: input, shape index: {}]   ;;  %s8462_s9 = inlined_call_operand.hbm [shape: f32[64,64], index: 9, kind: input, shape index: {}]   ;;  %s8463_s10 = inlined_call_operand.vmem [shape: f32[1,64], index: 10, kind: input, shape index: {}]   ;;  %s8464_s11 = inlined_call_operand.hbm [shape: f32[64,128], index: 11, kind: input, shape index: {}]   ;;  %s8465_s12 = inlined_call_operand.vmem [shape: f32[1,128], index: 12, kind: input, shape index: {}]   ;;  %s8466_s13 = inlined_call_operand.vmem [shape: f32[8,128], index: 13, kind: output, shape index: {}]  }
   0x1   :  { %19 = vsyncpa [#allocation5], 0  ;;  %s6195_s25 = smov [#allocation4]   ;;  %s6196_s27 = smov [#allocation2]  }
   0x2   :  { %s53_s26 = sshll.u32 %s6195_s25, 4  ;;  %s39_s28 = sshll.u32 %s6196_s27, 4  ;;  %s54_s26 = int_to_ptr.vmem [resolvable:$true] %s53_s26  ;;  %s6273_s28 = int_to_ptr.vmem [resolvable:$true] %s39_s28 }
   0x3   :  { %s6125_s14 = scalar_lea.hbm %s8462_s9, 1024 }
   0x4   :  { %p6126_p0 = scmp.ne.s32.totalorder %s8462_s9, %s6125_s14  ;;  %p6129_p1 = scmp.lt.u32.totalorder %s6125_s14, %s8462_s9 }
   0x6   :  { %p6131_p2 = pnand %p6129_p1, %p6126_p0 }
   0x8   :  { %6134 = shalt.err (!%p6131_p2)
}
   0x9   :  { %s6135_s19 = scalar_lea.vmem %s54_s26, 1024  ;;  %p6140_p4 = scmp.lt.s32.totalorder %s54_s26, %s54_s26 }
   0xa   :  { %p6136_p3 = scmp.ne.s32.totalorder %s54_s26, %s6135_s19  ;;  %p6141_p5 = scmp.lt.s32.totalorder %s6135_s19, %s6135_s19 }
   0xc   :  { %p6142_p6 = por %p6141_p5, %p6140_p4 }
   0xe   :  { %p6143_p7 = pnand %p6142_p6, %p6136_p3 }
  0x10   :  { %6146 = shalt.err (!%p6143_p7)
}
  0x11   :  { %s6197_s20 = smov 128   ;;  %s6198_s21 = smov 8  }
  0x12   :  { %59 = dma.hbm_to_vmem [thread:$0]  %s8462_s9, 1024, %s54_s26, [#allocation5], %s6197_s20, %s6197_s20, %s6198_s21  }
  0x13   :  { %s6147_s27 = scalar_lea.hbm %s8460_s7, 512 }
  0x14   :  { %p6148_p8 = scmp.ne.s32.totalorder %s8460_s7, %s6147_s27  ;;  %p6151_p9 = scmp.lt.u32.totalorder %s6147_s27, %s8460_s7 }
  0x16   :  { %p6153_p10 = pnand %p6151_p9, %p6148_p8 }
  0x18   :  { %6156 = shalt.err (!%p6153_p10)
}
  0x19   :  { %s6157_s16 = scalar_lea.vmem %s6273_s28, 512  ;;  %p6162_p12 = scmp.lt.s32.totalorder %s6273_s28, %s6273_s28 }
  0x1a   :  { %p6158_p11 = scmp.ne.s32.totalorder %s6273_s28, %s6157_s16  ;;  %p6163_p13 = scmp.lt.s32.totalorder %s6157_s16, %s6157_s16 }
  0x1c   :  { %p6164_p0 = por %p6163_p13, %p6162_p12 }
  0x1e   :  { %p6165_p1 = pnand %p6164_p0, %p6158_p11 }
  0x20   :  { %6168 = shalt.err (!%p6165_p1)
}
  0x21   :  { %45 = dma.hbm_to_vmem [thread:$0]  %s8460_s7, 512, %s6273_s28, [#allocation3], %s6197_s20, %s6197_s20, %s6198_s21  }
  0x22   :  { %s6199_s17 = smov [#allocation6]   ;;  %s6169_s23 = scalar_lea.hbm %s8464_s11, 1024 }
  0x23   :  { %s67_s18 = sshll.u32 %s6199_s17, 4  ;;  %p6170_p2 = scmp.ne.s32.totalorder %s8464_s11, %s6169_s23  ;;  %s68_s18 = int_to_ptr.vmem [resolvable:$true] %s67_s18 }
  0x24   :  { %p6173_p3 = scmp.lt.u32.totalorder %s6169_s23, %s8464_s11 }
  0x26   :  { %p6175_p4 = pnand %p6173_p3, %p6170_p2 }
  0x28   :  { %6178 = shalt.err (!%p6175_p4)
}
  0x29   :  { %s6179_s30 = scalar_lea.vmem %s68_s18, 1024  ;;  %p6184_p6 = scmp.lt.s32.totalorder %s68_s18, %s68_s18 }
  0x2a   :  { %p6180_p5 = scmp.ne.s32.totalorder %s68_s18, %s6179_s30  ;;  %p6185_p7 = scmp.lt.s32.totalorder %s6179_s30, %s6179_s30 }
  0x2c   :  { %p6186_p8 = por %p6185_p7, %p6184_p6 }
  0x2e   :  { %p6187_p9 = pnand %p6186_p8, %p6180_p5 }
  0x30   :  { %6190 = shalt.err (!%p6187_p9)
}
  0x31   :  { %73 = dma.hbm_to_vmem [thread:$0]  %s8464_s11, 1024, %s68_s18, [#allocation5], %s6197_s20, %s6197_s20, %s6198_s21  }
  0x32   :  { %6191 = dma.done.wait [#allocation3], 512  }
  0x33   :  { %6192 = vsyncadd [#allocation3], 4294966784 }
  0x34   :  { %6193 = dma.done.wait [#allocation5], 2048  }
  0x35   :  { %6194 = vsyncadd [#allocation5], 4294965248  ;;  %v6200_v0 = vmov 0.0   ;;  %v3490_v1 = vld [vmem:[%s8454_s1 + $0x188] sm:$0xff]  ;;  %v3493_v2 = vld [vmem:[%s8454_s1 + $0x1a0] sm:$0xff]  ;;  %vm6202_vm0 = vmmov 0  }
  0x36   :  { %259 = vmatprep.mubr.f32.mxu0 %v6200_v0  ;;  %v3489_v3 = vld [vmem:[%s8454_s1 + $0x180] sm:$0xff]  ;;  %v5239_v4 = vpack.c.bf16 %v3493_v2, %v3490_v1  ;;  %v3492_v5 = vld [vmem:[%s8454_s1 + $0x198] sm:$0xff]  ;;  %v3491_v6 = vld [vmem:[%s8454_s1 + $0x190] sm:$0xff]  ;;  %vm3229_vm1 = vcmask 261120   ;;  %vm3319_vm2 = vcmask 523264  }
  0x37   :  { %v3494_v7 = vld [vmem:[%s8454_s1 + $0x1a8] sm:$0xff]  ;;  %v5241_v8 = vpack.c.bf16 %v3492_v5, %v3489_v3  ;;  %v3496_v10 = vld [vmem:[%s8454_s1 + $0x1b8] sm:$0xff]  ;;  %v3499_v11 = vld [vmem:[%s8454_s1 + $0x1d0] sm:$0xff] }
  0x38   :  { %v5271_v9 = vpack.c.bf16 %v3494_v7, %v3491_v6  ;;  %v3495_v12 = vld [vmem:[%s8454_s1 + $0x1b0] sm:$0xff]  ;;  %5240 = vmatprep.subr.bf16.mxu0 %v5239_v4  ;;  %v5243_v13 = vpack.c.bf16 %v3499_v11, %v3496_v10  ;;  %v3498_v14 = vld [vmem:[%s8454_s1 + $0x1c8] sm:$0xff]  ;;  %v3497_v15 = vld [vmem:[%s8454_s1 + $0x1c0] sm:$0xff] }
  0x39   :  { %v3500_v16 = vld [vmem:[%s8454_s1 + $0x1d8] sm:$0xff]  ;;  %5242 = vmatpush1.bf16.msra.mxu0 %v5241_v8  ;;  %v5245_v17 = vpack.c.bf16 %v3498_v14, %v3495_v12  ;;  %v3502_v19 = vld [vmem:[%s8454_s1 + $0x1e8] sm:$0xff]  ;;  %v3505_v20 = vld [vmem:[%s8454_s1 + $0x200] sm:$0xff] }
  0x3a   :  { %5272 = vmatprep.subr.bf16.mxu1 %v5271_v9  ;;  %v5275_v18 = vpack.c.bf16 %v3500_v16, %v3497_v15  ;;  %v3501_v21 = vld [vmem:[%s8454_s1 + $0x1e0] sm:$0xff]  ;;  %5244 = vmatprep.subr.bf16.mxu0 %v5243_v13  ;;  %v5247_v22 = vpack.c.bf16 %v3505_v20, %v3502_v19  ;;  %v3504_v23 = vld [vmem:[%s8454_s1 + $0x1f8] sm:$0xff]  ;;  %v3503_v24 = vld [vmem:[%s8454_s1 + $0x1f0] sm:$0xff] }
  0x3b   :  { %5274 = vmatpush3.bf16.msra.mxu1 %v5271_v9  ;;  %v3506_v25 = vld [vmem:[%s8454_s1 + $0x208] sm:$0xff]  ;;  %v3508_v27 = vld [vmem:[%s8454_s1 + $0x218] sm:$0xff]  ;;  %v3511_v28 = vld [vmem:[%s8454_s1 + $0x230] sm:$0xff]  ;;  %v5249_v31 = vpack.c.bf16 %v3504_v23, %v3501_v21 }
  0x3c   :  { %5276 = vmatprep.subr.bf16.mxu1 %v5275_v18  ;;  %v5279_v26 = vpack.c.bf16 %v3506_v25, %v3503_v24  ;;  %v3509_v29 = vld [vmem:[%s8454_s1 + $0x220] sm:$0xff]  ;;  %v3512_v30 = vld [vmem:[%s8454_s1 + $0x238] sm:$0xff]  ;;  %v5251_v32 = vpack.c.bf16 %v3511_v28, %v3508_v27  ;;  %v3507_v33 = vld [vmem:[%s8454_s1 + $0x210] sm:$0xff] }
  0x3d   :  { %5246 = vmatpush1.bf16.msra.mxu0 %v5245_v17  ;;  %v3510_v34 = vld [vmem:[%s8454_s1 + $0x228] sm:$0xff]  ;;  %v5283_v35 = vpack.c.bf16 %v3512_v30, %v3509_v29  ;;  %v3517_v37 = vld [vmem:[%s8454_s1 + $0x260] sm:$0xff]  ;;  %v3515_v38 = vld [vmem:[%s8454_s1 + $0x250] sm:$0xff] }
  0x3e   :  { %5248 = vmatprep.subr.bf16.mxu0 %v5247_v22  ;;  %v3514_v36 = vld [vmem:[%s8454_s1 + $0x248] sm:$0xff]  ;;  %v5253_v40 = vpack.c.bf16 %v3510_v34, %v3507_v33  ;;  %v3513_v42 = vld [vmem:[%s8454_s1 + $0x240] sm:$0xff]  ;;  %v3516_v43 = vld [vmem:[%s8454_s1 + $0x258] sm:$0xff] }
  0x3f   :  { %5278 = vmatpush3.bf16.msra.mxu1 %v5275_v18  ;;  %v3518_v39 = vld [vmem:[%s8454_s1 + $0x268] sm:$0xff]  ;;  %v5255_v41 = vpack.c.bf16 %v3517_v37, %v3514_v36  ;;  %v3520_v45 = vld [vmem:[%s8454_s1 + $0x278] sm:$0xff]  ;;  %v3523_v46 = vld [vmem:[%s8454_s1 + $0x290] sm:$0xff]  ;;  %v5257_v49 = vpack.c.bf16 %v3516_v43, %v3513_v42 }
  0x40   :  { %5280 = vmatprep.subr.bf16.mxu1 %v5279_v26  ;;  %v5287_v44 = vpack.c.bf16 %v3518_v39, %v3515_v38  ;;  %v3521_v47 = vld [vmem:[%s8454_s1 + $0x280] sm:$0xff]  ;;  %v3524_v48 = vld [vmem:[%s8454_s1 + $0x298] sm:$0xff]  ;;  %v6431_v50 = vld [vmem:[%s8453_s0 + $0x8] sm:$0xff]  ;;  %v5259_v51 = vpack.c.bf16 %v3523_v46, %v3520_v45 }
  0x41   :  { %5250 = vmatpush1.bf16.msra.mxu0 %v5249_v31  ;;  %v3519_v52 = vld [vmem:[%s8454_s1 + $0x270] sm:$0xff]  ;;  %v3522_v53 = vld [vmem:[%s8454_s1 + $0x288] sm:$0xff]  ;;  %v5291_v54 = vpack.c.bf16 %v3524_v48, %v3521_v47  ;;  %v3529_v56 = vld [vmem:[%s8454_s1 + $0x2c0] sm:$0xff]  ;;  %4572 = vmatprep.mubr.f32.mxu1 %v6431_v50 }
  0x42   :  { %5252 = vmatprep.subr.bf16.mxu0 %v5251_v32  ;;  %v3526_v55 = vld [vmem:[%s8454_s1 + $0x2a8] sm:$0xff]  ;;  %v3527_v57 = vld [vmem:[%s8454_s1 + $0x2b0] sm:$0xff]  ;;  %v5261_v59 = vpack.c.bf16 %v3522_v53, %v3519_v52  ;;  %v3525_v61 = vld [vmem:[%s8454_s1 + $0x2a0] sm:$0xff] }
  0x43   :  { %5282 = vmatpush3.bf16.msra.mxu1 %v5279_v26  ;;  %v3530_v58 = vld [vmem:[%s8454_s1 + $0x2c8] sm:$0xff]  ;;  %v5263_v60 = vpack.c.bf16 %v3529_v56, %v3526_v55  ;;  %v3528_v62 = vld [vmem:[%s8454_s1 + $0x2b8] sm:$0xff]  ;;  %v3535_v2 = vld [vmem:[%s8454_s1 + $0x2f0] sm:$0xff] }
  0x44   :  { %5284 = vmatprep.subr.bf16.mxu1 %v5283_v35  ;;  %v5295_v63 = vpack.c.bf16 %v3530_v58, %v3527_v57  ;;  %v3532_v1 = vld [vmem:[%s8454_s1 + $0x2d8] sm:$0xff]  ;;  %v3533_v3 = vld [vmem:[%s8454_s1 + $0x2e0] sm:$0xff]  ;;  %v5265_v5 = vpack.c.bf16 %v3528_v62, %v3525_v61  ;;  %v3531_v7 = vld [vmem:[%s8454_s1 + $0x2d0] sm:$0xff] }
  0x45   :  { %5254 = vmatpush1.bf16.msra.mxu0 %v5253_v40  ;;  %v3536_v4 = vld [vmem:[%s8454_s1 + $0x2f8] sm:$0xff]  ;;  %v5267_v6 = vpack.c.bf16 %v3535_v2, %v3532_v1  ;;  %v3534_v8 = vld [vmem:[%s8454_s1 + $0x2e8] sm:$0xff]  ;;  %v101_v11 = vld [vmem:[%s8454_s1 + $0x20] sm:$0xff] }
  0x46   :  { %5256 = vmatprep.subr.bf16.mxu0 %v5255_v41  ;;  %v5299_v9 = vpack.c.bf16 %v3536_v4, %v3533_v3  ;;  %v98_v10 = vld [vmem:[%s8454_s1 + $0x8] sm:$0xff]  ;;  %v99_v12 = vld [vmem:[%s8454_s1 + $0x10] sm:$0xff]  ;;  %v5269_v14 = vpack.c.bf16 %v3534_v8, %v3531_v7  ;;  %v97_v16 = vld [vmem:[%s8454_s1] sm:$0xff] }
  0x47   :  { %5286 = vmatpush3.bf16.msra.mxu1 %v5283_v35  ;;  %v102_v13 = vld [vmem:[%s8454_s1 + $0x28] sm:$0xff]  ;;  %v5303_v15 = vpack.c.bf16 %v101_v11, %v98_v10  ;;  %v100_v17 = vld [vmem:[%s8454_s1 + $0x18] sm:$0xff]  ;;  %v107_v20 = vld [vmem:[%s8454_s1 + $0x50] sm:$0xff] }
  0x48   :  { %5288 = vmatprep.subr.bf16.mxu1 %v5287_v44  ;;  %v5335_v18 = vpack.c.bf16 %v102_v13, %v99_v12  ;;  %v104_v19 = vld [vmem:[%s8454_s1 + $0x38] sm:$0xff]  ;;  %v5305_v21 = vpack.c.bf16 %v100_v17, %v97_v16  ;;  %v105_v22 = vld [vmem:[%s8454_s1 + $0x40] sm:$0xff]  ;;  %v103_v25 = vld [vmem:[%s8454_s1 + $0x30] sm:$0xff] }
  0x49   :  { %5258 = vmatpush1.bf16.msra.mxu0 %v5257_v49  ;;  %v108_v23 = vld [vmem:[%s8454_s1 + $0x58] sm:$0xff]  ;;  %v5307_v24 = vpack.c.bf16 %v107_v20, %v104_v19  ;;  %v106_v26 = vld [vmem:[%s8454_s1 + $0x48] sm:$0xff]  ;;  %v6515_v27 = vld [vmem:[%s8453_s0 + $0x10] sm:$0xff] }
  0x4a   :  { %5260 = vmatprep.subr.bf16.mxu0 %v5259_v51  ;;  %v110_v28 = vld [vmem:[%s8454_s1 + $0x68] sm:$0xff]  ;;  %v113_v29 = vld [vmem:[%s8454_s1 + $0x80] sm:$0xff]  ;;  %v5339_v30 = vpack.c.bf16 %v108_v23, %v105_v22  ;;  %v5309_v31 = vpack.c.bf16 %v106_v26, %v103_v25  ;;  %v111_v32 = vld [vmem:[%s8454_s1 + $0x70] sm:$0xff] }
  0x4b   :  { %5290 = vmatpush3.bf16.msra.mxu1 %v5287_v44  ;;  %v114_v33 = vld [vmem:[%s8454_s1 + $0x88] sm:$0xff]  ;;  %v6535_v34 = vld [vmem:[%s8453_s0 + $0x18] sm:$0xff]  ;;  %v5311_v35 = vpack.c.bf16 %v113_v29, %v110_v28  ;;  %v109_v36 = vld [vmem:[%s8454_s1 + $0x60] sm:$0xff] }
  0x4c   :  { %5292 = vmatprep.subr.bf16.mxu1 %v5291_v54  ;;  %v112_v37 = vld [vmem:[%s8454_s1 + $0x78] sm:$0xff]  ;;  %v119_v39 = vld [vmem:[%s8454_s1 + $0xb0] sm:$0xff]  ;;  %v5343_v40 = vpack.c.bf16 %v114_v33, %v111_v32  ;;  %v6554_v41 = vld [vmem:[%s8453_s0 + $0x28] sm:$0xff] }
  0x4d   :  { %5262 = vmatpush1.bf16.msra.mxu0 %v5261_v59  ;;  %v116_v38 = vld [vmem:[%s8454_s1 + $0x98] sm:$0xff]  ;;  %v6560_v42 = vld [vmem:[%s8453_s0 + $0x20] sm:$0xff]  ;;  %v5313_v43 = vpack.c.bf16 %v112_v37, %v109_v36  ;;  %v115_v47 = vld [vmem:[%s8454_s1 + $0x90] sm:$0xff] }
  0x4e   :  { %5264 = vmatprep.subr.bf16.mxu0 %v5263_v60  ;;  %v117_v44 = vld [vmem:[%s8454_s1 + $0xa0] sm:$0xff]  ;;  %v120_v45 = vld [vmem:[%s8454_s1 + $0xb8] sm:$0xff]  ;;  %v5315_v46 = vpack.c.bf16 %v119_v39, %v116_v38  ;;  %v118_v48 = vld [vmem:[%s8454_s1 + $0xa8] sm:$0xff] }
  0x4f   :  { %5294 = vmatpush3.bf16.msra.mxu1 %v5291_v54  ;;  %v6579_v49 = vld [vmem:[%s8453_s0 + $0x30] sm:$0xff]  ;;  %v122_v51 = vld [vmem:[%s8454_s1 + $0xc8] sm:$0xff]  ;;  %v125_v52 = vld [vmem:[%s8454_s1 + $0xe0] sm:$0xff]  ;;  %v5347_v53 = vpack.c.bf16 %v120_v45, %v117_v44  ;;  %v5317_v57 = vpack.c.bf16 %v118_v48, %v115_v47 }
  0x50   :  { %5296 = vmatprep.subr.bf16.mxu1 %v5295_v63  ;;  %v6591_v54 = vld [vmem:[%s8453_s0 + $0x38] sm:$0xff]  ;;  %v123_v55 = vld [vmem:[%s8454_s1 + $0xd0] sm:$0xff]  ;;  %v126_v56 = vld [vmem:[%s8454_s1 + $0xe8] sm:$0xff]  ;;  %v5319_v58 = vpack.c.bf16 %v125_v52, %v122_v51 }
  0x51   :  { %5266 = vmatpush1.bf16.msra.mxu0 %v5265_v5  ;;  %v121_v59 = vld [vmem:[%s8454_s1 + $0xc0] sm:$0xff]  ;;  %v124_v60 = vld [vmem:[%s8454_s1 + $0xd8] sm:$0xff]  ;;  %v5351_v1 = vpack.c.bf16 %v126_v56, %v123_v55  ;;  %v6623_v2 = vld [vmem:[%s8453_s0 + $0x48] sm:$0xff] }
  0x52   :  { %5268 = vmatprep.subr.bf16.mxu0 %v5267_v6  ;;  %v6611_v61 = vld [vmem:[%s8453_s0 + $0x40] sm:$0xff]  ;;  %v128_v62 = vld [vmem:[%s8454_s1 + $0xf8] sm:$0xff]  ;;  %v5321_v5 = vpack.c.bf16 %v124_v60, %v121_v59  ;;  %v127_v7 = vld [vmem:[%s8454_s1 + $0xf0] sm:$0xff] }
  0x53   :  { %5298 = vmatpush3.bf16.msra.mxu1 %v5295_v63  ;;  %v131_v63 = vld [vmem:[%s8454_s1 + $0x110] sm:$0xff]  ;;  %v129_v3 = vld [vmem:[%s8454_s1 + $0x100] sm:$0xff]  ;;  %v132_v4 = vld [vmem:[%s8454_s1 + $0x118] sm:$0xff] }
  0x54   :  { %5300 = vmatprep.subr.bf16.mxu1 %v5299_v9  ;;  %v5323_v6 = vpack.c.bf16 %v131_v63, %v128_v62  ;;  %v130_v8 = vld [vmem:[%s8454_s1 + $0x108] sm:$0xff]  ;;  %v137_v11 = vld [vmem:[%s8454_s1 + $0x140] sm:$0xff]  ;;  %v5355_v12 = vpack.c.bf16 %v132_v4, %v129_v3  ;;  %v6655_v13 = vld [vmem:[%s8453_s0 + $0x58] sm:$0xff] }
  0x55   :  { %5270 = vmatpush1.bf16.msra.mxu0 %v5269_v14  ;;  %v134_v10 = vld [vmem:[%s8454_s1 + $0x128] sm:$0xff]  ;;  %v135_v14 = vld [vmem:[%s8454_s1 + $0x130] sm:$0xff]  ;;  %v5325_v16 = vpack.c.bf16 %v130_v8, %v127_v7  ;;  %v136_v19 = vld [vmem:[%s8454_s1 + $0x138] sm:$0xff] }
  0x56   :  { %5304 = vmatprep.subr.bf16.mxu0 %v5303_v15  ;;  %v138_v15 = vld [vmem:[%s8454_s1 + $0x148] sm:$0xff]  ;;  %v5327_v17 = vpack.c.bf16 %v137_v11, %v134_v10  ;;  %v6675_v20 = vld [vmem:[%s8453_s0 + $0x60] sm:$0xff]  ;;  %v143_v22 = vld [vmem:[%s8454_s1 + $0x170] sm:$0xff] }
  0x57   :  { %5302 = vmatpush3.bf16.msra.mxu1 %v5299_v9  ;;  %v6643_v9 = vld [vmem:[%s8453_s0 + $0x50] sm:$0xff]  ;;  %v5359_v23 = vpack.c.bf16 %v138_v15, %v135_v14  ;;  %v141_v25 = vld [vmem:[%s8454_s1 + $0x160] sm:$0xff]  ;;  %v144_v26 = vld [vmem:[%s8454_s1 + $0x178] sm:$0xff] }
  0x58   :  { %5336 = vmatprep.subr.bf16.mxu1 %v5335_v18  ;;  %260 = vmatmul.mubr.f32.vlgmr.msra.gmra.mrb[0].mxu0 %v6431_v50  ;;  %v3538_v32 = vld [vmem:[%s8454_s1 + $0x308] sm:$0xff]  ;;  %v3541_v33 = vld [vmem:[%s8454_s1 + $0x320] sm:$0xff]  ;;  %v3539_v36 = vld [vmem:[%s8454_s1 + $0x310] sm:$0xff] }
  0x59   :  { %5306 = vmatpush1.bf16.msra.mxu0 %v5305_v21  ;;  %265 = vmatprep.mubr.f32.mxu0 %v6200_v0  ;;  %v140_v21 = vld [vmem:[%s8454_s1 + $0x158] sm:$0xff]  ;;  %v3542_v37 = vld [vmem:[%s8454_s1 + $0x328] sm:$0xff]  ;;  %v5367_v39 = vpack.c.bf16 %v3541_v33, %v3538_v32  ;;  %v3557_v51 = vld [vmem:[%s8454_s1 + $0x3a0] sm:$0xff] }
  0x5a   :  { %4573 = vmatmul.mubr.f32.vlgmr.msra.gmra.mrb[0].mxu1 %v6515_v27  ;;  %5308 = vmatprep.subr.bf16.mxu0 %v5307_v24  ;;  %v6687_v24 = vld [vmem:[%s8453_s0] sm:$0xff]  ;;  %v5331_v29 = vpack.c.bf16 %v143_v22, %v140_v21  ;;  %v3548_v44 = vld [vmem:[%s8454_s1 + $0x358] sm:$0xff]  ;;  %v3554_v47 = vld [vmem:[%s8454_s1 + $0x388] sm:$0xff] }
  0x5b   :  { %5338 = vmatpush3.bf16.msra.mxu1 %v5335_v18  ;;  %4575 = vmatprep.mubr.f32.mxu1 %v6535_v34  ;;  %v133_v18 = vld [vmem:[%s8454_s1 + $0x120] sm:$0xff]  ;;  %v3560_v52 = vld [vmem:[%s8454_s1 + $0x3b8] sm:$0xff]  ;;  %v3563_v55 = vld [vmem:[%s8454_s1 + $0x3d0] sm:$0xff] }
  0x5c   :  { %266 = vmatmul.mubr.f32.gmra.mrb[2].mxu0 %v6515_v27  ;;  %5340 = vmatprep.subr.bf16.mxu1 %v5339_v30  ;;  %v5329_v28 = vpack.c.bf16 %v136_v19, %v133_v18  ;;  %v3566_v56 = vld [vmem:[%s8454_s1 + $0x3e8] sm:$0xff]  ;;  %v3544_v59 = vld [vmem:[%s8454_s1 + $0x338] sm:$0xff]  ;;  %v3547_v60 = vld [vmem:[%s8454_s1 + $0x350] sm:$0xff] }
  0x5d   :  { %271 = vmatprep.mubr.f32.mxu0 %v6200_v0  ;;  %5310 = vmatpush1.bf16.msra.mxu0 %v5309_v31  ;;  %v142_v31 = vld [vmem:[%s8454_s1 + $0x168] sm:$0xff]  ;;  %v5415_v62 = vpack.c.bf16 %v3566_v56, %v3563_v55  ;;  %v3572_v3 = vld [vmem:[%s8454_s1 + $0x418] sm:$0xff]  ;;  %v5371_v4 = vpack.c.bf16 %v3547_v60, %v3544_v59  ;;  %v3553_v8 = vld [vmem:[%s8454_s1 + $0x380] sm:$0xff] }
  0x5e   :  { %5312 = vmatprep.subr.bf16.mxu0 %v5311_v35  ;;  %4576 = vmatmul.mubr.f32.gmra.mrb[2].mxu1 %v6560_v42  ;;  %v5363_v35 = vpack.c.bf16 %v144_v26, %v141_v25  ;;  %v3550_v7 = vld [vmem:[%s8454_s1 + $0x368] sm:$0xff]  ;;  %v3556_v18 = vld [vmem:[%s8454_s1 + $0x398] sm:$0xff]  ;;  %v3559_v19 = vld [vmem:[%s8454_s1 + $0x3b0] sm:$0xff] }
  0x5f   :  { %5342 = vmatpush3.bf16.msra.mxu1 %v5339_v30  ;;  %4578 = vmatprep.mubr.f32.mxu1 %v6554_v41  ;;  %v139_v30 = vld [vmem:[%s8454_s1 + $0x150] sm:$0xff]  ;;  %v3578_v14 = vld [vmem:[%s8454_s1 + $0x448] sm:$0xff]  ;;  %v5375_v15 = vpack.c.bf16 %v3553_v8, %v3550_v7  ;;  %v5379_v25 = vpack.c.bf16 %v3559_v19, %v3556_v18  ;;  %v3561_v33 = vld [vmem:[%s8454_s1 + $0x3c0] sm:$0xff] }
  0x60   :  { %272 = vmatmul.mubr.f32.gmra.mrb[4].mxu0 %v6535_v34  ;;  %5344 = vmatprep.subr.bf16.mxu1 %v5343_v40  ;;  %v5333_v38 = vpack.c.bf16 %v142_v31, %v139_v30  ;;  %v3558_v26 = vld [vmem:[%s8454_s1 + $0x3a8] sm:$0xff]  ;;  %v3604_v7 = vld [vmem:[%s8456_s3 + $0x218] sm:$0xff] }
  0x61   :  { %277 = vmatprep.mubr.f32.mxu0 %v6200_v0  ;;  %5314 = vmatpush1.bf16.msra.mxu0 %v5313_v43  ;;  %v3545_v43 = vld [vmem:[%s8454_s1 + $0x340] sm:$0xff]  ;;  %v730_v60 = vld [vmem:[%s8453_s0 + $0x68] sm:$0xff] }
  0x62   :  { %5316 = vmatprep.subr.bf16.mxu0 %v5315_v46  ;;  %4579 = vmatmul.mubr.f32.gmra.mrb[4].mxu1 %v6579_v49  ;;  %v5403_v45 = vpack.c.bf16 %v3548_v44, %v3545_v43  ;;  %v3551_v46 = vld [vmem:[%s8454_s1 + $0x370] sm:$0xff]  ;;  %v3570_v43 = vld [vmem:[%s8454_s1 + $0x408] sm:$0xff] }
  0x63   :  { %5346 = vmatpush3.bf16.msra.mxu1 %v5343_v40  ;;  %4581 = vmatprep.mubr.f32.mxu1 %v6591_v54  ;;  %v5399_v40 = vpack.c.bf16 %v3542_v37, %v3539_v36  ;;  %v5407_v48 = vpack.c.bf16 %v3554_v47, %v3551_v46  ;;  %v3568_v36 = vld [vmem:[%s8454_s1 + $0x3f8] sm:$0xff]  ;;  %v3571_v37 = vld [vmem:[%s8454_s1 + $0x410] sm:$0xff]  ;;  %v3574_v44 = vld [vmem:[%s8454_s1 + $0x428] sm:$0xff] }
  0x64   :  { %278 = vmatmul.mubr.f32.gmra.mrb[6].mxu0 %v6560_v42  ;;  %5348 = vmatprep.subr.bf16.mxu1 %v5347_v53  ;;  %v1172_v18 = vld [vmem:[%s8456_s3 + $0x28] sm:$0xff] }
  0x65   :  { %283 = vmatprep.mubr.f32.mxu0 %v6200_v0  ;;  %5318 = vmatpush1.bf16.msra.mxu0 %v5317_v57  ;;  %v3537_v57 = vld [vmem:[%s8454_s1 + $0x300] sm:$0xff] }
  0x66   :  { %4582 = vmatmul.mubr.f32.gmra.mrb[6].mxu1 %v6611_v61  ;;  %5320 = vmatprep.subr.bf16.mxu0 %v5319_v58  ;;  %v3540_v58 = vld [vmem:[%s8454_s1 + $0x318] sm:$0xff] }
  0x67   :  { %5350 = vmatpush3.bf16.msra.mxu1 %v5347_v53  ;;  %4584 = vmatprep.mubr.f32.mxu1 %v6623_v2  ;;  %v5411_v53 = vpack.c.bf16 %v3560_v52, %v3557_v51  ;;  %v5369_v63 = vpack.c.bf16 %v3540_v58, %v3537_v57  ;;  %v3576_v51 = vld [vmem:[%s8454_s1 + $0x438] sm:$0xff]  ;;  %v3579_v57 = vld [vmem:[%s8454_s1 + $0x450] sm:$0xff]  ;;  %v3582_v58 = vld [vmem:[%s8454_s1 + $0x468] sm:$0xff] }
  0x68   :  { %284 = vmatmul.mubr.f32.gmra.mrb[8].mxu0 %v6554_v41  ;;  %5352 = vmatprep.subr.bf16.mxu1 %v5351_v1  ;;  %v3580_v52 = vld [vmem:[%s8454_s1 + $0x458] sm:$0xff]  ;;  %v5397_v59 = vpack.c.bf16 %v3582_v58, %v3579_v57  ;;  %v1193_v57 = vld [vmem:[%s8456_s3 + $0xd0] sm:$0xff] }
  0x69   :  { %289 = vmatprep.mubr.f32.mxu0 %v6200_v0  ;;  %5322 = vmatpush1.bf16.msra.mxu0 %v5321_v5  ;;  %v3543_v5 = vld [vmem:[%s8454_s1 + $0x330] sm:$0xff] }
  0x6a   :  { %4585 = vmatmul.mubr.f32.gmra.mrb[8].mxu1 %v6643_v9  ;;  %5324 = vmatprep.subr.bf16.mxu0 %v5323_v6  ;;  %v3546_v6 = vld [vmem:[%s8454_s1 + $0x348] sm:$0xff] }
  0x6b   :  { %5354 = vmatpush3.bf16.msra.mxu1 %v5351_v1  ;;  %4587 = vmatprep.mubr.f32.mxu1 %v6655_v13  ;;  %v3569_v1 = vld [vmem:[%s8454_s1 + $0x400] sm:$0xff]  ;;  %v5373_v11 = vpack.c.bf16 %v3546_v6, %v3543_v5  ;;  %v1170_v5 = vld [vmem:[%s8456_s3 + $0x18] sm:$0xff]  ;;  %v3603_v6 = vld [vmem:[%s8456_s3 + $0x210] sm:$0xff] }
  0x6c   :  { %290 = vmatmul.mubr.f32.gmra.mrb[10].mxu0 %v6579_v49  ;;  %5356 = vmatprep.subr.bf16.mxu1 %v5355_v12  ;;  %v5419_v10 = vpack.c.bf16 %v3572_v3, %v3569_v1  ;;  %v1186_v1 = vld [vmem:[%s8456_s3 + $0x98] sm:$0xff]  ;;  %v1169_v3 = vld [vmem:[%s8456_s3 + $0x10] sm:$0xff] }
  0x6d   :  { %295 = vmatprep.mubr.f32.mxu0 %v6200_v0  ;;  %5326 = vmatpush1.bf16.msra.mxu0 %v5325_v16  ;;  %v3549_v16 = vld [vmem:[%s8454_s1 + $0x360] sm:$0xff]  ;;  %v5501_v8 = vpack.c.bf16 %v1170_v5, %v1169_v3  ;;  %v3614_v5 = vld [vmem:[%s8456_s3 + $0x268] sm:$0xff] }
  0x6e   :  { %4588 = vmatmul.mubr.f32.gmra.mrb[10].mxu1 %v6675_v20  ;;  %5328 = vmatprep.subr.bf16.mxu0 %v5327_v17  ;;  %v3552_v17 = vld [vmem:[%s8454_s1 + $0x378] sm:$0xff] }
  0x6f   :  { %5358 = vmatpush3.bf16.msra.mxu1 %v5355_v12  ;;  %4622 = vmatprep.mubr.f32.mxu1 %v6687_v24  ;;  %v3575_v12 = vld [vmem:[%s8454_s1 + $0x430] sm:$0xff]  ;;  %v5377_v22 = vpack.c.bf16 %v3552_v17, %v3549_v16  ;;  %v1188_v16 = vld [vmem:[%s8456_s3 + $0xa8] sm:$0xff]  ;;  %v1171_v17 = vld [vmem:[%s8456_s3 + $0x20] sm:$0xff] }
  0x70   :  { %296 = vmatmul.mubr.f32.gmra.mrb[12].mxu0 %v6591_v54  ;;  %5360 = vmatprep.subr.bf16.mxu1 %v5359_v23  ;;  %v5423_v21 = vpack.c.bf16 %v3578_v14, %v3575_v12  ;;  %v3588_v12 = vld [vmem:[%s8456_s3 + $0x198] sm:$0xff]  ;;  %v1187_v14 = vld [vmem:[%s8456_s3 + $0xa0] sm:$0xff] }
  0x71   :  { %301 = vmatprep.mubr.f32.mxu0 %v6200_v0  ;;  %5330 = vmatpush1.bf16.msra.mxu0 %v5329_v28  ;;  %v3562_v28 = vld [vmem:[%s8454_s1 + $0x3c8] sm:$0xff]  ;;  %v5503_v19 = vpack.c.bf16 %v1188_v16, %v1187_v14  ;;  %v1181_v14 = vld [vmem:[%s8456_s3 + $0x70] sm:$0xff] }
  0x72   :  { %5332 = vmatprep.subr.bf16.mxu0 %v5331_v29  ;;  %v3565_v29 = vld [vmem:[%s8454_s1 + $0x3e0] sm:$0xff] }
  0x73   :  { %5362 = vmatpush3.bf16.msra.mxu1 %v5359_v23  ;;  %v3581_v23 = vld [vmem:[%s8454_s1 + $0x460] sm:$0xff]  ;;  %v5383_v32 = vpack.c.bf16 %v3565_v29, %v3562_v28  ;;  %v1190_v29 = vld [vmem:[%s8456_s3 + $0xb8] sm:$0xff] }
  0x74   :  { %302 = vmatmul.mubr.f32.gmra.mrb[14].mxu0 %v6611_v61  ;;  %5364 = vmatprep.subr.bf16.mxu1 %v5363_v35 }
  0x75   :  { %307 = vmatprep.mubr.f32.mxu0 %v6200_v0  ;;  %5334 = vmatpush1.bf16.msra.mxu0 %v5333_v38 }
  0x76   :  { %5368 = vmatprep.subr.bf16.mxu0 %v5367_v39  ;;  %v5387_v39 = vpack.c.bf16 %v3571_v37, %v3568_v36  ;;  %v3608_v36 = vld [vmem:[%s8456_s3 + $0x238] sm:$0xff] }
  0x77   :  { %5366 = vmatpush3.bf16.msra.mxu1 %v5363_v35  ;;  %v3564_v35 = vld [vmem:[%s8454_s1 + $0x3d8] sm:$0xff] }
  0x78   :  { %308 = vmatmul.mubr.f32.gmra.mrb[16].mxu0 %v6623_v2  ;;  %5400 = vmatprep.subr.bf16.mxu1 %v5399_v40  ;;  %v5385_v38 = vpack.c.bf16 %v3564_v35, %v3561_v33  ;;  %v3607_v35 = vld [vmem:[%s8456_s3 + $0x230] sm:$0xff] }
  0x79   :  { %313 = vmatprep.mubr.f32.mxu0 %v6200_v0  ;;  %v5443_v37 = vpack.c.bf16 %v3608_v36, %v3607_v35 }
  0x7a   :  { %4623 = vmatmul.mubr.f32.vlgmr.msra.gmra.mrb[0].mxu1 %v6431_v50 }
  0x7b   :  { %5402 = vmatpush3.bf16.msra.mxu1 %v5399_v40  ;;  %4625 = vmatprep.mubr.f32.mxu1 %v6515_v27  ;;  %v3567_v40 = vld [vmem:[%s8454_s1 + $0x3f0] sm:$0xff] }
  0x7c   :  { %314 = vmatmul.mubr.f32.gmra.mrb[18].mxu0 %v6643_v9  ;;  %5404 = vmatprep.subr.bf16.mxu1 %v5403_v45  ;;  %v5389_v46 = vpack.c.bf16 %v3570_v43, %v3567_v40  ;;  %v1191_v40 = vld [vmem:[%s8456_s3 + $0xc0] sm:$0xff] }
  0x7d   :  { %319 = vmatprep.mubr.f32.mxu0 %v6200_v0 }
  0x7e   :  { %4626 = vmatmul.mubr.f32.gmra.mrb[2].mxu1 %v6535_v34 }
  0x7f   :  { %5406 = vmatpush3.bf16.msra.mxu1 %v5403_v45  ;;  %4628 = vmatprep.mubr.f32.mxu1 %v6560_v42  ;;  %v3577_v45 = vld [vmem:[%s8454_s1 + $0x440] sm:$0xff] }
  0x80   :  { %320 = vmatmul.mubr.f32.gmra.mrb[20].mxu0 %v6655_v13  ;;  %5408 = vmatprep.subr.bf16.mxu1 %v5407_v48  ;;  %v5391_v47 = vpack.c.bf16 %v3577_v45, %v3574_v44  ;;  %v1192_v44 = vld [vmem:[%s8456_s3 + $0xc8] sm:$0xff]  ;;  %v1175_v45 = vld [vmem:[%s8456_s3 + $0x40] sm:$0xff] }
  0x81   :  { %325 = vmatprep.mubr.f32.mxu0 %v6200_v0 }
  0x82   :  { %4629 = vmatmul.mubr.f32.gmra.mrb[4].mxu1 %v6554_v41 }
  0x83   :  { %5410 = vmatpush3.bf16.msra.mxu1 %v5407_v48  ;;  %4631 = vmatprep.mubr.f32.mxu1 %v6579_v49  ;;  %v3573_v48 = vld [vmem:[%s8454_s1 + $0x420] sm:$0xff] }
  0x84   :  { %326 = vmatmul.mubr.f32.gmra.mrb[22].mxu0 %v6675_v20  ;;  %5412 = vmatprep.subr.bf16.mxu1 %v5411_v53  ;;  %v5393_v55 = vpack.c.bf16 %v3576_v51, %v3573_v48  ;;  %v3609_v51 = vld [vmem:[%s8456_s3 + $0x240] sm:$0xff] }
  0x85   :  { %521 = vmatprep.mubr.f32.mxu0 %v6200_v0 }
  0x86   :  { %4632 = vmatmul.mubr.f32.gmra.mrb[6].mxu1 %v6591_v54 }
  0x87   :  { %5414 = vmatpush3.bf16.msra.mxu1 %v5411_v53  ;;  %4634 = vmatprep.mubr.f32.mxu1 %v6611_v61  ;;  %v3583_v53 = vld [vmem:[%s8454_s1 + $0x470] sm:$0xff] }
  0x88   :  { %522 = vmatmul.mubr.f32.vlgmr.msra.gmra.mrb[0].mxu0 %v6687_v24  ;;  %5416 = vmatprep.subr.bf16.mxu1 %v5415_v62  ;;  %v3584_v24 = vld [vmem:[%s8454_s1 + $0x478] sm:$0xff]  ;;  %v5395_v56 = vpack.c.bf16 %v3583_v53, %v3580_v52  ;;  %v3610_v52 = vld [vmem:[%s8456_s3 + $0x248] sm:$0xff] }
  0x89   :  { %5370 = vmatpush1.bf16.msra.mxu0 %v5369_v63  ;;  %527 = vmatprep.mubr.f32.mxu0 %v6200_v0  ;;  %v5427_v30 = vpack.c.bf16 %v3584_v24, %v3581_v23  ;;  %v1185_v63 = vld [vmem:[%s8456_s3 + $0x90] sm:$0xff]  ;;  %v3606_v23 = vld [vmem:[%s8456_s3 + $0x228] sm:$0xff]  ;;  %v5447_v53 = vpack.c.bf16 %v3610_v52, %v3609_v51 }
  0x8a   :  { %5372 = vmatprep.subr.bf16.mxu0 %v5371_v4  ;;  %4635 = vmatmul.mubr.f32.gmra.mrb[8].mxu1 %v6623_v2  ;;  %v5499_v4 = vpack.c.bf16 %v1186_v1, %v1185_v63  ;;  %v1179_v63 = vld [vmem:[%s8456_s3 + $0x60] sm:$0xff]  ;;  %v1180_v1 = vld [vmem:[%s8456_s3 + $0x68] sm:$0xff] }
  0x8b   :  { %5418 = vmatpush3.bf16.msra.mxu1 %v5415_v62  ;;  %4637 = vmatprep.mubr.f32.mxu1 %v6643_v9  ;;  %v5521_v3 = vpack.c.bf16 %v1180_v1, %v1179_v63 }
  0x8c   :  { %528 = vmatmul.mubr.f32.gmra.mrb[2].mxu0 %v6431_v50  ;;  %5420 = vmatprep.subr.bf16.mxu1 %v5419_v10  ;;  %v3555_v50 = vld [vmem:[%s8454_s1 + $0x390] sm:$0xff] }
  0x8d   :  { %533 = vmatprep.mubr.f32.mxu0 %v6200_v0  ;;  %5374 = vmatpush1.bf16.msra.mxu0 %v5373_v11  ;;  %v5381_v31 = vpack.c.bf16 %v3558_v26, %v3555_v50  ;;  %v3587_v11 = vld [vmem:[%s8456_s3 + $0x190] sm:$0xff]  ;;  %v3590_v50 = vld [vmem:[%s8456_s3 + $0x1a8] sm:$0xff] }
  0x8e   :  { %5376 = vmatprep.subr.bf16.mxu0 %v5375_v15  ;;  %4638 = vmatmul.mubr.f32.gmra.mrb[10].mxu1 %v6655_v13  ;;  %v5437_v15 = vpack.c.bf16 %v3588_v12, %v3587_v11  ;;  %v1189_v26 = vld [vmem:[%s8456_s3 + $0xb0] sm:$0xff]  ;;  %v1198_v12 = vld [vmem:[%s8456_s3 + $0xf8] sm:$0xff] }
  0x8f   :  { %5422 = vmatpush3.bf16.msra.mxu1 %v5419_v10  ;;  %4672 = vmatprep.mubr.f32.mxu1 %v6515_v27  ;;  %v5435_v10 = vpack.c.bf16 %v3604_v7, %v3603_v6  ;;  %v3597_v7 = vld [vmem:[%s8456_s3 + $0x1e0] sm:$0xff] }
  0x90   :  { %534 = vmatmul.mubr.f32.gmra.mrb[4].mxu0 %v6515_v27  ;;  %5424 = vmatprep.subr.bf16.mxu1 %v5423_v21 }
  0x91   :  { %539 = vmatprep.mubr.f32.mxu0 %v6200_v0  ;;  %5378 = vmatpush1.bf16.msra.mxu0 %v5377_v22  ;;  %v3605_v22 = vld [vmem:[%s8456_s3 + $0x220] sm:$0xff] }
  0x92   :  { %5380 = vmatprep.subr.bf16.mxu0 %v5379_v25  ;;  %v5439_v24 = vpack.c.bf16 %v3606_v23, %v3605_v22  ;;  %v3589_v25 = vld [vmem:[%s8456_s3 + $0x1a0] sm:$0xff]  ;;  %v3599_v22 = vld [vmem:[%s8456_s3 + $0x1f0] sm:$0xff]  ;;  %v3600_v23 = vld [vmem:[%s8456_s3 + $0x1f8] sm:$0xff] }
  0x93   :  { %5426 = vmatpush3.bf16.msra.mxu1 %v5423_v21  ;;  %v5505_v21 = vpack.c.bf16 %v1172_v18, %v1171_v17  ;;  %v5441_v28 = vpack.c.bf16 %v3590_v50, %v3589_v25  ;;  %v3615_v18 = vld [vmem:[%s8456_s3 + $0x270] sm:$0xff]  ;;  %v5461_v25 = vpack.c.bf16 %v3600_v23, %v3599_v22  ;;  %v3650_v50 = vld [vmem:[%s8456_s3 + $0x388] sm:$0xff]  ;;  %v3637_v22 = vld [vmem:[%s8456_s3 + $0x320] sm:$0xff] }
  0x94   :  { %540 = vmatmul.mubr.f32.gmra.mrb[6].mxu0 %v6535_v34  ;;  %5428 = vmatprep.subr.bf16.mxu1 %v5427_v30  ;;  %v3638_v23 = vld [vmem:[%s8456_s3 + $0x328] sm:$0xff] }
  0x95   :  { %545 = vmatprep.mubr.f32.mxu0 %v6200_v0  ;;  %5382 = vmatpush1.bf16.msra.mxu0 %v5381_v31  ;;  %v1174_v31 = vld [vmem:[%s8456_s3 + $0x38] sm:$0xff] }
  0x96   :  { %5384 = vmatprep.subr.bf16.mxu0 %v5383_v32  ;;  %v5507_v32 = vpack.c.bf16 %v1190_v29, %v1189_v26  ;;  %v3618_v29 = vld [vmem:[%s8456_s3 + $0x288] sm:$0xff] }
  0x97   :  { %5430 = vmatpush3.bf16.msra.mxu1 %v5427_v30  ;;  %v1173_v30 = vld [vmem:[%s8456_s3 + $0x30] sm:$0xff] }
  0x98   :  { %546 = vmatmul.mubr.f32.gmra.mrb[8].mxu0 %v6560_v42  ;;  %v5509_v33 = vpack.c.bf16 %v1174_v31, %v1173_v30 }
  0x99   :  { %551 = vmatprep.mubr.f32.mxu0 %v6200_v0  ;;  %5386 = vmatpush1.bf16.msra.mxu0 %v5385_v38  ;;  %v3591_v38 = vld [vmem:[%s8456_s3 + $0x1b0] sm:$0xff] }
  0x9a   :  { %4673 = vmatmul.mubr.f32.vlgmr.msra.gmra.mrb[0].mxu1 %v6535_v34  ;;  %5388 = vmatprep.subr.bf16.mxu0 %v5387_v39  ;;  %v3592_v39 = vld [vmem:[%s8456_s3 + $0x1b8] sm:$0xff] }
  0x9b   :  { %4675 = vmatprep.mubr.f32.mxu1 %v6560_v42  ;;  %v5445_v43 = vpack.c.bf16 %v3592_v39, %v3591_v38 }
  0x9c   :  { %552 = vmatmul.mubr.f32.gmra.mrb[10].mxu0 %v6554_v41 }
  0x9d   :  { %557 = vmatprep.mubr.f32.mxu0 %v6200_v0  ;;  %5390 = vmatpush1.bf16.msra.mxu0 %v5389_v46  ;;  %v1176_v46 = vld [vmem:[%s8456_s3 + $0x48] sm:$0xff] }
  0x9e   :  { %4676 = vmatmul.mubr.f32.gmra.mrb[2].mxu1 %v6554_v41  ;;  %5392 = vmatprep.subr.bf16.mxu0 %v5391_v47  ;;  %v5511_v47 = vpack.c.bf16 %v1192_v44, %v1191_v40  ;;  %v5513_v48 = vpack.c.bf16 %v1176_v46, %v1175_v45 }
  0x9f   :  { %4678 = vmatprep.mubr.f32.mxu1 %v6579_v49 }
  0xa0   :  { %558 = vmatmul.mubr.f32.gmra.mrb[12].mxu0 %v6579_v49 }
  0xa1   :  { %563 = vmatprep.mubr.f32.mxu0 %v6200_v0  ;;  %5394 = vmatpush1.bf16.msra.mxu0 %v5393_v55  ;;  %v3593_v55 = vld [vmem:[%s8456_s3 + $0x1c0] sm:$0xff] }
  0xa2   :  { %4679 = vmatmul.mubr.f32.gmra.mrb[4].mxu1 %v6591_v54  ;;  %5396 = vmatprep.subr.bf16.mxu0 %v5395_v56  ;;  %v3594_v56 = vld [vmem:[%s8456_s3 + $0x1c8] sm:$0xff] }
  0xa3   :  { %4681 = vmatprep.mubr.f32.mxu1 %v6611_v61  ;;  %v5449_v58 = vpack.c.bf16 %v3594_v56, %v3593_v55 }
  0xa4   :  { %564 = vmatmul.mubr.f32.gmra.mrb[14].mxu0 %v6591_v54 }
  0xa5   :  { %569 = vmatprep.mubr.f32.mxu0 %v6200_v0  ;;  %5398 = vmatpush1.bf16.msra.mxu0 %v5397_v59  ;;  %v1194_v59 = vld [vmem:[%s8456_s3 + $0xd8] sm:$0xff] }
  0xa6   :  { %4682 = vmatmul.mubr.f32.gmra.mrb[6].mxu1 %v6623_v2 }
  0xa7   :  { %4684 = vmatprep.mubr.f32.mxu1 %v6643_v9 }
  0xa8   :  { %570 = vmatmul.mubr.f32.gmra.mrb[16].mxu0 %v6611_v61 }
  0xa9   :  { %575 = vmatprep.mubr.f32.mxu0 %v6200_v0 }
  0xaa   :  { %4685 = vmatmul.mubr.f32.gmra.mrb[8].mxu1 %v6655_v13 }
  0xab   :  { %4687 = vmatprep.mubr.f32.mxu1 %v6675_v20 }
  0xac   :  { %576 = vmatmul.mubr.f32.gmra.mrb[18].mxu0 %v6623_v2 }
  0xad   :  { %581 = vmatprep.mubr.f32.mxu0 %v6200_v0 }
  0xae   :  { %4688 = vmatmul.mubr.f32.gmra.mrb[10].mxu1 %v730_v60 }
  0xb0   :  { %582 = vmatmul.mubr.f32.gmra.mrb[20].mxu0 %v6643_v9 }
  0xb1   :  { %587 = vmatprep.mubr.f32.mxu0 %v6200_v0 }
  0xb4   :  { %588 = vmatmul.mubr.f32.gmra.mrb[22].mxu0 %v6655_v13 }
  0xb5   :  { %844 = vmatprep.mubr.f32.mxu0 %v6200_v0 }
  0xb8   :  { %845 = vmatmul.mubr.f32.vlgmr.msra.gmra.mrb[0].mxu0 %v6515_v27  ;;  %v1183_v27 = vld [vmem:[%s8456_s3 + $0x80] sm:$0xff] }
  0xb9   :  { %850 = vmatprep.mubr.f32.mxu0 %v6200_v0 }
  0xbc   :  { %851 = vmatmul.mubr.f32.gmra.mrb[2].mxu0 %v6535_v34  ;;  %v1184_v34 = vld [vmem:[%s8456_s3 + $0x88] sm:$0xff] }
  0xbd   :  { %856 = vmatprep.mubr.f32.mxu0 %v6200_v0 }
  0xc0   :  { %857 = vmatmul.mubr.f32.gmra.mrb[4].mxu0 %v6560_v42  ;;  %v1167_v42 = vld [vmem:[%s8456_s3] sm:$0xff] }
  0xc1   :  { %862 = vmatprep.mubr.f32.mxu0 %v6200_v0 }
  0xc4   :  { %863 = vmatmul.mubr.f32.gmra.mrb[6].mxu0 %v6554_v41  ;;  %v5495_v41 = vpack.c.bf16 %v1184_v34, %v1183_v27  ;;  %v1178_v27 = vld [vmem:[%s8456_s3 + $0x58] sm:$0xff]  ;;  %v5515_v34 = vpack.c.bf16 %v1194_v59, %v1193_v57 }
  0xc5   :  { %868 = vmatprep.mubr.f32.mxu0 %v6200_v0 }
  0xc6   :  { %5496 = vmatprep.subr.bf16.mxu0 %v5495_v41 }
  0xc8   :  { %869 = vmatmul.mubr.f32.gmra.mrb[8].mxu0 %v6579_v49  ;;  %v1168_v49 = vld [vmem:[%s8456_s3 + $0x8] sm:$0xff] }
  0xc9   :  { %874 = vmatprep.mubr.f32.mxu0 %v6200_v0 }
  0xcc   :  { %875 = vmatmul.mubr.f32.gmra.mrb[10].mxu0 %v6591_v54  ;;  %v3601_v54 = vld [vmem:[%s8456_s3 + $0x200] sm:$0xff] }
  0xcd   :  { %880 = vmatprep.mubr.f32.mxu0 %v6200_v0 }
  0xd0   :  { %881 = vmatmul.mubr.f32.gmra.mrb[12].mxu0 %v6611_v61  ;;  %v5497_v61 = vpack.c.bf16 %v1168_v49, %v1167_v42  ;;  %v3611_v42 = vld [vmem:[%s8456_s3 + $0x250] sm:$0xff]  ;;  %v3612_v49 = vld [vmem:[%s8456_s3 + $0x258] sm:$0xff] }
  0xd1   :  { %886 = vmatprep.mubr.f32.mxu0 %v6200_v0 }
  0xd2   :  { %5498 = vmatpush3.bf16.msra.mxu0 %v5497_v61  ;;  %v3595_v61 = vld [vmem:[%s8456_s3 + $0x1d0] sm:$0xff] }
  0xd3   :  { %5500 = vmatprep.subr.bf16.mxu0 %v5499_v4  ;;  %v3613_v4 = vld [vmem:[%s8456_s3 + $0x260] sm:$0xff] }
  0xd4   :  { %887 = vmatmul.mubr.f32.gmra.mrb[14].mxu0 %v6623_v2  ;;  %v3602_v2 = vld [vmem:[%s8456_s3 + $0x208] sm:$0xff]  ;;  %v5455_v6 = vpack.c.bf16 %v3614_v5, %v3613_v4  ;;  %v3635_v4 = vld [vmem:[%s8456_s3 + $0x310] sm:$0xff]  ;;  %v3636_v5 = vld [vmem:[%s8456_s3 + $0x318] sm:$0xff] }
  0xd5   :  { %892 = vmatprep.mubr.f32.mxu0 %v6200_v0 }
  0xd6   :  { %5502 = vmatpush3.bf16.msra.mxu0 %v5501_v8  ;;  %v3598_v8 = vld [vmem:[%s8456_s3 + $0x1e8] sm:$0xff] }
  0xd7   :  { %5504 = vmatprep.subr.bf16.mxu0 %v5503_v19  ;;  %v5457_v11 = vpack.c.bf16 %v3598_v8, %v3597_v7  ;;  %v3616_v19 = vld [vmem:[%s8456_s3 + $0x278] sm:$0xff] }
  0xd8   :  { %893 = vmatmul.mubr.f32.gmra.mrb[16].mxu0 %v6643_v9  ;;  %v3585_v9 = vld [vmem:[%s8456_s3 + $0x180] sm:$0xff]  ;;  %v3620_v8 = vld [vmem:[%s8456_s3 + $0x298] sm:$0xff] }
  0xd9   :  { %898 = vmatprep.mubr.f32.mxu0 %v6200_v0 }
  0xda   :  { %5506 = vmatpush3.bf16.msra.mxu0 %v5505_v21  ;;  %v5459_v21 = vpack.c.bf16 %v3616_v19, %v3615_v18 }
  0xdb   :  { %5508 = vmatprep.subr.bf16.mxu0 %v5507_v32 }
  0xdc   :  { %899 = vmatmul.mubr.f32.gmra.mrb[18].mxu0 %v6655_v13  ;;  %v3586_v13 = vld [vmem:[%s8456_s3 + $0x188] sm:$0xff] }
  0xdd   :  { %904 = vmatprep.mubr.f32.mxu0 %v6200_v0  ;;  %v5433_v62 = vpack.c.bf16 %v3586_v13, %v3585_v9  ;;  %v1195_v9 = vld [vmem:[%s8456_s3 + $0xe0] sm:$0xff] }
  0xde   :  { %5510 = vmatpush3.bf16.msra.mxu0 %v5509_v33  ;;  %v1080_v33 = vlaneseq }
  0xdf   :  { %5512 = vmatprep.subr.bf16.mxu0 %v5511_v47 }
  0xe0   :  { %905 = vmatmul.mubr.f32.gmra.mrb[20].mxu0 %v6675_v20  ;;  %v5431_v20 = vpack.c.bf16 %v3602_v2, %v3601_v54  ;;  %v5451_v54 = vpack.c.bf16 %v3612_v49, %v3611_v42  ;;  %v3596_v2 = vld [vmem:[%s8456_s3 + $0x1d8] sm:$0xff]  ;;  %v3633_v42 = vld [vmem:[%s8456_s3 + $0x300] sm:$0xff]  ;;  %v3634_v49 = vld [vmem:[%s8456_s3 + $0x308] sm:$0xff] }
  0xe1   :  { %910 = vmatprep.mubr.f32.mxu0 %v6200_v0  ;;  %v5453_v13 = vpack.c.bf16 %v3596_v2, %v3595_v61  ;;  %v3651_v61 = vld [vmem:[%s8456_s3 + $0x390] sm:$0xff]  ;;  %v3652_v2 = vld [vmem:[%s8456_s3 + $0x398] sm:$0xff] }
  0xe2   :  { %5432 = vmatprep.subr.bf16.mxu1 %v5431_v20  ;;  %5514 = vmatpush3.bf16.msra.mxu0 %v5513_v48  ;;  %v1196_v20 = vld [vmem:[%s8456_s3 + $0xe8] sm:$0xff] }
  0xe3   :  { %5434 = vmatpush3.bf16.msra.mxu1 %v5433_v62  ;;  %5516 = vmatprep.subr.bf16.mxu0 %v5515_v34  ;;  %v5519_v62 = vpack.c.bf16 %v1196_v20, %v1195_v9  ;;  %v5561_v20 = vpack.c.bf16 %v3634_v49, %v3633_v42  ;;  %v3658_v42 = vld [vmem:[%s8456_s3 + $0x3c8] sm:$0xff] }
  0xe4   :  { %911 = vmatmul.mubr.f32.gmra.mrb[22].mxu0 %v730_v60  ;;  %5436 = vmatprep.subr.bf16.mxu1 %v5435_v10  ;;  %v1177_v60 = vld [vmem:[%s8456_s3 + $0x50] sm:$0xff] }
  0xe5   :  { %v5517_v41 = vpack.c.bf16 %v1178_v27, %v1177_v60  ;;  %v1197_v10 = vld [vmem:[%s8456_s3 + $0xf0] sm:$0xff] }
  0xe6   :  { %v5523_v16 = vpack.c.bf16 %v1198_v12, %v1197_v10  ;;  %v3653_v10 = vld [vmem:[%s8456_s3 + $0x3a0] sm:$0xff] }
  0xe7   :  { %5438 = vmatpush3.bf16.msra.mxu1 %v5437_v15  ;;  %5518 = vmatpush3.bf16.msra.mxu0 %v5517_v41  ;;  %v1182_v15 = vld [vmem:[%s8456_s3 + $0x78] sm:$0xff] }
  0xe8   :  { %5440 = vmatprep.subr.bf16.mxu1 %v5439_v24  ;;  %5520 = vmatprep.subr.bf16.mxu0 %v5519_v62  ;;  %v5525_v17 = vpack.c.bf16 %v1182_v15, %v1181_v14  ;;  %v3649_v24 = vld [vmem:[%s8456_s3 + $0x380] sm:$0xff]  ;;  %v5565_v15 = vpack.c.bf16 %v3636_v5, %v3635_v4  ;;  %v3626_v5 = vld [vmem:[%s8456_s3 + $0x2c8] sm:$0xff] }
  0xe9   :  { %v5559_v26 = vpack.c.bf16 %v3650_v50, %v3649_v24  ;;  %v3621_v24 = vld [vmem:[%s8456_s3 + $0x2a0] sm:$0xff]  ;;  %v3622_v50 = vld [vmem:[%s8456_s3 + $0x2a8] sm:$0xff] }
  0xeb   :  { %5442 = vmatpush3.bf16.msra.mxu1 %v5441_v28  ;;  %5522 = vmatpush3.bf16.msra.mxu0 %v5521_v3  ;;  %v3617_v28 = vld [vmem:[%s8456_s3 + $0x280] sm:$0xff]  ;;  %v5563_v3 = vpack.c.bf16 %v3652_v2, %v3651_v61 }
  0xec   :  { %5444 = vmatprep.subr.bf16.mxu1 %v5443_v37  ;;  %5524 = vmatprep.subr.bf16.mxu0 %v5523_v16  ;;  %v7135_v30 = vpack.c.bf16 %v3618_v29, %v3617_v28  ;;  %v1081_v37 = vshrl.u32 %v1080_v33, 7  ;;  %v3656_v28 = vld [vmem:[%s8456_s3 + $0x3b8] sm:$0xff] }
  0xee   :  { %v1090_v40 = vsub.s32 2, %v1081_v37  ;;  %v1082_v57 = vsub.s32 0, %v1081_v37 }
  0xef   :  { %5446 = vmatpush3.bf16.msra.mxu1 %v5445_v43  ;;  %5526 = vmatpush3.bf16.msra.mxu0 %v5525_v17  ;;  %v1078_v43 = vld [vmem:[%s8455_s2] sm:$0x7] }
  0xf0   :  { %5448 = vmatprep.subr.bf16.mxu1 %v5447_v53  ;;  %5560 = vmatprep.subr.bf16.mxu0 %v5559_v26  ;;  %v7157_v46 = vrot.slane %v1078_v43, %v1090_v40  ;;  %v7170_v59 = vrot.slane %v1078_v43, %v1082_v57  ;;  %v3655_v26 = vld [vmem:[%s8456_s3 + $0x3b0] sm:$0xff] }
  0xf1   :  { %v3639_v57 = vld [vmem:[%s8456_s3 + $0x330] sm:$0xff] }
  0xf3   :  { %5450 = vmatpush3.bf16.msra.mxu1 %v5449_v58  ;;  %v1086_v58 = vsub.s32 1, %v1081_v37  ;;  %v5569_v37 = vpack.c.bf16 %v3638_v23, %v3637_v22  ;;  %v3628_v23 = vld [vmem:[%s8456_s3 + $0x2d8] sm:$0xff] }
  0xf4   :  { %5452 = vmatprep.subr.bf16.mxu1 %v5451_v54 }
  0xf5   :  { %v7172_v60 = vrot.slane %v1078_v43, %v1086_v58  ;;  %v3623_v58 = vld [vmem:[%s8456_s3 + $0x2b0] sm:$0xff] }
  0xf7   :  { %5454 = vmatpush3.bf16.msra.mxu1 %v5453_v13 }
  0xf8   :  { %5456 = vmatprep.subr.bf16.mxu1 %v5455_v6  ;;  %v3619_v6 = vld [vmem:[%s8456_s3 + $0x290] sm:$0xff] }
  0xf9   :  { %v5467_v19 = vpack.c.bf16 %v3620_v8, %v3619_v6  ;;  %v3659_v6 = vld [vmem:[%s8456_s3 + $0x3d0] sm:$0xff] }
  0xfb   :  { %5458 = vmatpush3.bf16.msra.mxu1 %v5457_v11  ;;  %v3654_v11 = vld [vmem:[%s8456_s3 + $0x3a8] sm:$0xff] }
  0xfc   :  { %5460 = vmatprep.subr.bf16.mxu1 %v5459_v21  ;;  %v5567_v21 = vpack.c.bf16 %v3654_v11, %v3653_v10 }
  0xff   :  { %5462 = vmatpush3.bf16.msra.mxu1 %v5461_v25 }
 0x100   :  { %5464 = vmatprep.subr.bf16.mxu1 %v7135_v30 }
 0x16d   :  { %v7138_v31 = vpop.f32.mrb[0].mxu1 }
 0x16e   :  { %v7140_v32 = vpop.f32.mrb[1].mxu1 }
 0x171   :  { %v7142_v35 = vpop.f32.mrb[2].mxu1 }
 0x172   :  { %v7144_v36 = vpop.f32.mrb[3].mxu1 }
 0x175   :  { %v7146_v38 = vpop.f32.mrb[4].mxu1 }
 0x176   :  { %v7148_v39 = vpop.f32.mrb[5].mxu1 }
 0x179   :  { %v7153_v44 = vpop.f32.mrb[6].mxu1 }
 0x17a   :  { %v7155_v45 = vpop.f32.mrb[7].mxu1 }
 0x17d   :  { %v4686_v47 = vpop.f32.mrb[8].mxu1 }
 0x17e   :  { %v7160_v48 = vadd.f32 %v4686_v47, %v7157_v46  ;;  %v7162_v51 = vpop.f32.mrb[9].mxu1 }
 0x181   :  { %v4689_v52 = vpop.f32.mrb[10].mxu1 }
 0x182   :  { %v7165_v53 = vadd.f32 %v4689_v52, %v7157_v46  ;;  %v1033_v55 = vpop.f32.mrb[11].mxu1  ;;  %v5471_v52 = vpack.c.bf16 %v3622_v50, %v3621_v24  ;;  %v3661_v24 = vld [vmem:[%s8456_s3 + $0x3e0] sm:$0xff] }
 0x183   :  { %v7168_v56 = vadd.f32 %v7157_v46, %v1033_v55  ;;  %v5571_v55 = vpack.c.bf16 %v3656_v28, %v3655_v26 }
 0x18b   :  { %v846_v27 = vpop.f32.mrb[0].mxu0 }
 0x18c   :  { %v1095_v34 = vadd.f32 %v7170_v59, %v846_v27  ;;  %v848_v41 = vpop.f32.mrb[1].mxu0 }
 0x18d   :  { %v1096_v54 = vadd.f32 %v7172_v60, %v848_v41  ;;  %v3657_v41 = vld [vmem:[%s8456_s3 + $0x3c0] sm:$0xff] }
 0x18e   :  { %v1131_v62 = vmax.f32 %v1095_v34, 0.0  ;;  %v3624_v34 = vld [vmem:[%s8456_s3 + $0x2b8] sm:$0xff] }
 0x18f   :  { %v1132_v9 = vmax.f32 %v1096_v54, 0.0  ;;  %v852_v13 = vpop.f32.mrb[2].mxu0 }
 0x190   :  { %v1098_v63 = vadd.f32 %v7170_v59, %v852_v13  ;;  %v854_v1 = vpop.f32.mrb[3].mxu0 }
 0x191   :  { %v1099_v7 = vadd.f32 %v7172_v60, %v854_v1  ;;  %1538 = vmatprep.mubr.f32.mxu0 %v1132_v9  ;;  %v3642_v1 = vld [vmem:[%s8456_s3 + $0x348] sm:$0xff] }
 0x192   :  { %1539 = vmatmul.mubr.f32.vlgmr.msra.gmra.mrb[24].mxu0 %v1131_v62  ;;  %v1134_v16 = vmax.f32 %v1098_v63, 0.0  ;;  %v5575_v62 = vpack.c.bf16 %v3658_v42, %v3657_v41  ;;  %v3641_v63 = vld [vmem:[%s8456_s3 + $0x340] sm:$0xff]  ;;  %v3664_v41 = vld [vmem:[%s8456_s3 + $0x3f8] sm:$0xff] }
 0x193   :  { %v1135_v12 = vmax.f32 %v1099_v7, 0.0  ;;  %v858_v14 = vpop.f32.mrb[4].mxu0  ;;  %5562 = vmatpush3.bf16.msra.mxu0 %v5561_v20  ;;  %v5475_v20 = vpack.c.bf16 %v3624_v34, %v3623_v58  ;;  %v3660_v7 = vld [vmem:[%s8456_s3 + $0x3d8] sm:$0xff]  ;;  %v5577_v11 = vpack.c.bf16 %v3642_v1, %v3641_v63  ;;  %v3663_v34 = vld [vmem:[%s8456_s3 + $0x3f0] sm:$0xff] }
 0x194   :  { %v1101_v17 = vadd.f32 %v7170_v59, %v858_v14  ;;  %v860_v18 = vpop.f32.mrb[5].mxu0  ;;  %5564 = vmatprep.subr.bf16.mxu0 %v5563_v3  ;;  %v3625_v3 = vld [vmem:[%s8456_s3 + $0x2c0] sm:$0xff]  ;;  %v5587_v63 = vpack.c.bf16 %v3664_v41, %v3663_v34  ;;  %v3647_v1 = vld [vmem:[%s8456_s3 + $0x370] sm:$0xff] }
 0x195   :  { %v1102_v25 = vadd.f32 %v7172_v60, %v860_v18  ;;  %1328 = vmatprep.mubr.f32.mxu1 %v1135_v12  ;;  %1543 = vmatprep.mubr.f32.mxu0 %v1135_v12  ;;  %v3643_v18 = vld [vmem:[%s8456_s3 + $0x350] sm:$0xff] }
 0x196   :  { %1329 = vmatmul.mubr.f32.vlgmr.msra.gmra.mrb[12].mxu1 %v1134_v16  ;;  %1544 = vmatmul.mubr.f32.gmra.mrb[26].mxu0 %v1134_v16  ;;  %v7231_v40 = vmax.f32 %v1101_v17, 0.0  ;;  %v5479_v16 = vpack.c.bf16 %v3626_v5, %v3625_v3  ;;  %v5579_v17 = vpack.c.bf16 %v3660_v7, %v3659_v6  ;;  %v3648_v3 = vld [vmem:[%s8456_s3 + $0x378] sm:$0xff]  ;;  %v3631_v5 = vld [vmem:[%s8456_s3 + $0x2f0] sm:$0xff]  ;;  %v3697_v7 = vld [vmem:[%s8456_s3 + $0x500] sm:$0xff] }
 0x197   :  { %v7228_v29 = vmax.f32 %v1102_v25, 0.0  ;;  %5466 = vmatpush3.bf16.msra.mxu1 %v7135_v30  ;;  %v864_v33 = vpop.f32.mrb[6].mxu0  ;;  %5566 = vmatpush3.bf16.msra.mxu0 %v5565_v15  ;;  %v3640_v30 = vld [vmem:[%s8456_s3 + $0x338] sm:$0xff]  ;;  %v3662_v25 = vld [vmem:[%s8456_s3 + $0x3e8] sm:$0xff] }
 0x198   :  { %v1104_v43 = vadd.f32 %v7170_v59, %v864_v33  ;;  %v866_v47 = vpop.f32.mrb[7].mxu0  ;;  %5468 = vmatprep.subr.bf16.mxu1 %v5467_v19  ;;  %5568 = vmatprep.subr.bf16.mxu0 %v5567_v21  ;;  %v5573_v61 = vpack.c.bf16 %v3640_v30, %v3639_v57  ;;  %v3627_v21 = vld [vmem:[%s8456_s3 + $0x2d0] sm:$0xff]  ;;  %v3646_v57 = vld [vmem:[%s8456_s3 + $0x368] sm:$0xff]  ;;  %v3629_v30 = vld [vmem:[%s8456_s3 + $0x2e0] sm:$0xff] }
 0x199   :  { %v1105_v27 = vadd.f32 %v7172_v60, %v866_v47  ;;  %1333 = vmatprep.mubr.f32.mxu1 %v7228_v29  ;;  %1548 = vmatprep.mubr.f32.mxu0 %v7228_v29  ;;  %v5483_v47 = vpack.c.bf16 %v3628_v23, %v3627_v21  ;;  %v3632_v6 = vld [vmem:[%s8456_s3 + $0x2f8] sm:$0xff]  ;;  %v7376_v21 = vadd.f32 %v7138_v31, %v7157_v46  ;;  %v1199_v31 = vld [vmem:[%s8456_s3 + $0x100] sm:$0xff] }
 0x19a   :  { %1334 = vmatmul.mubr.f32.gmra.mrb[14].mxu1 %v7231_v40  ;;  %1549 = vmatmul.mubr.f32.gmra.mrb[28].mxu0 %v7231_v40  ;;  %v7259_v2 = vmax.f32 %v1104_v43, 0.0 }
 0x19b   :  { %v7257_v49 = vmax.f32 %v1105_v27, 0.0  ;;  %5470 = vmatpush3.bf16.msra.mxu1 %v5467_v19  ;;  %v870_v54 = vpop.f32.mrb[8].mxu0  ;;  %5570 = vmatpush3.bf16.msra.mxu0 %v5569_v37  ;;  %v3644_v19 = vld [vmem:[%s8456_s3 + $0x358] sm:$0xff]  ;;  %v3630_v27 = vld [vmem:[%s8456_s3 + $0x2e8] sm:$0xff]  ;;  %v1136_v34 = vmax.f32 %v7376_v21, 0.0 }
 0x19c   :  { %v1107_v9 = vadd.f32 %v7170_v59, %v870_v54  ;;  %v872_v13 = vpop.f32.mrb[9].mxu0  ;;  %5472 = vmatprep.subr.bf16.mxu1 %v5471_v52  ;;  %5572 = vmatprep.subr.bf16.mxu0 %v5571_v55  ;;  %v5581_v28 = vpack.c.bf16 %v3644_v19, %v3643_v18  ;;  %v3645_v55 = vld [vmem:[%s8456_s3 + $0x360] sm:$0xff]  ;;  %v5491_v19 = vpack.c.bf16 %v3632_v6, %v3631_v5  ;;  %v3686_v6 = vld [vmem:[%s8456_s3 + $0x4a8] sm:$0xff]  ;;  %v3752_v21 = vld [vmem:[%s8456_s3 + $0x6b8] sm:$0xff] }
 0x19d   :  { %v1108_v4 = vadd.f32 %v7172_v60, %v872_v13  ;;  %1338 = vmatprep.mubr.f32.mxu1 %v7257_v49  ;;  %1553 = vmatprep.mubr.f32.mxu0 %v7257_v49  ;;  %v3685_v5 = vld [vmem:[%s8456_s3 + $0x4a0] sm:$0xff] }
 0x19e   :  { %1339 = vmatmul.mubr.f32.gmra.mrb[16].mxu1 %v7259_v2  ;;  %1554 = vmatmul.mubr.f32.gmra.mrb[30].mxu0 %v7259_v2  ;;  %v7287_v12 = vmax.f32 %v1107_v9, 0.0 }
 0x19f   :  { %v7285_v8 = vmax.f32 %v1108_v4, 0.0  ;;  %5474 = vmatpush3.bf16.msra.mxu1 %v5471_v52  ;;  %v876_v10 = vpop.f32.mrb[10].mxu0  ;;  %5574 = vmatpush3.bf16.msra.mxu0 %v5573_v61  ;;  %v5583_v52 = vpack.c.bf16 %v3662_v25, %v3661_v24  ;;  %v5585_v61 = vpack.c.bf16 %v3646_v57, %v3645_v55  ;;  %v3681_v24 = vld [vmem:[%s8456_s3 + $0x480] sm:$0xff]  ;;  %v3682_v25 = vld [vmem:[%s8456_s3 + $0x488] sm:$0xff] }
 0x1a0   :  { %v1110_v14 = vadd.f32 %v7170_v59, %v876_v10  ;;  %v878_v15 = vpop.f32.mrb[11].mxu0  ;;  %5476 = vmatprep.subr.bf16.mxu1 %v5475_v20  ;;  %5576 = vmatprep.subr.bf16.mxu0 %v5575_v62  ;;  %v5487_v62 = vpack.c.bf16 %v3630_v27, %v3629_v30  ;;  %v3698_v10 = vld [vmem:[%s8456_s3 + $0x508] sm:$0xff]  ;;  %v5625_v30 = vpack.c.bf16 %v3682_v25, %v3681_v24  ;;  %v3684_v27 = vld [vmem:[%s8456_s3 + $0x498] sm:$0xff] }
 0x1a1   :  { %v1111_v22 = vadd.f32 %v7172_v60, %v878_v15  ;;  %1343 = vmatprep.mubr.f32.mxu1 %v7285_v8  ;;  %1558 = vmatprep.mubr.f32.mxu0 %v7285_v8  ;;  %v5589_v15 = vpack.c.bf16 %v3648_v3, %v3647_v1  ;;  %v5623_v23 = vpack.c.bf16 %v3698_v10, %v3697_v7 }
 0x1a2   :  { %1344 = vmatmul.mubr.f32.gmra.mrb[18].mxu1 %v7287_v12  ;;  %1559 = vmatmul.mubr.f32.gmra.mrb[32].mxu0 %v7287_v12  ;;  %v7315_v33 = vmax.f32 %v1110_v14, 0.0  ;;  %v1109_v1 = vadd.f32 %v7157_v46, %v7148_v39  ;;  %v1112_v39 = vadd.f32 %v7146_v38, %v7157_v46  ;;  %v3703_v38 = vld [vmem:[%s8456_s3 + $0x530] sm:$0xff]  ;;  %v1115_v24 = vadd.f32 %v7157_v46, %v7155_v45 }
 0x1a3   :  { %v7313_v50 = vmax.f32 %v1111_v22, 0.0  ;;  %5478 = vmatpush3.bf16.msra.mxu1 %v5475_v20  ;;  %v882_v26 = vpop.f32.mrb[12].mxu0  ;;  %5578 = vmatpush3.bf16.msra.mxu0 %v5577_v11  ;;  %v3687_v45 = vld [vmem:[%s8456_s3 + $0x4b0] sm:$0xff] }
 0x1a4   :  { %v1113_v37 = vadd.f32 %v7170_v59, %v882_v26  ;;  %v884_v43 = vpop.f32.mrb[13].mxu0  ;;  %5480 = vmatprep.subr.bf16.mxu1 %v5479_v16  ;;  %5580 = vmatprep.subr.bf16.mxu0 %v5579_v17  ;;  %v1200_v26 = vld [vmem:[%s8456_s3 + $0x108] sm:$0xff] }
 0x1a5   :  { %v1114_v58 = vadd.f32 %v7172_v60, %v884_v43  ;;  %1348 = vmatprep.mubr.f32.mxu1 %v7313_v50  ;;  %1563 = vmatprep.mubr.f32.mxu0 %v7313_v50 }
 0x1a6   :  { %1349 = vmatmul.mubr.f32.gmra.mrb[20].mxu1 %v7315_v33  ;;  %1564 = vmatmul.mubr.f32.gmra.mrb[34].mxu0 %v7315_v33  ;;  %v7343_v9 = vmax.f32 %v1113_v37, 0.0  ;;  %v3700_v37 = vld [vmem:[%s8456_s3 + $0x518] sm:$0xff] }
 0x1a7   :  { %v7341_v42 = vmax.f32 %v1114_v58, 0.0  ;;  %5482 = vmatpush3.bf16.msra.mxu1 %v5479_v16  ;;  %v888_v54 = vpop.f32.mrb[14].mxu0  ;;  %5582 = vmatpush3.bf16.msra.mxu0 %v5581_v28  ;;  %v3699_v28 = vld [vmem:[%s8456_s3 + $0x510] sm:$0xff] }
 0x1a8   :  { %v1116_v13 = vadd.f32 %v7170_v59, %v888_v54  ;;  %v890_v20 = vpop.f32.mrb[15].mxu0  ;;  %5484 = vmatprep.subr.bf16.mxu1 %v5483_v47  ;;  %5584 = vmatprep.subr.bf16.mxu0 %v5583_v52  ;;  %v1103_v52 = vadd.f32 %v7157_v46, %v7144_v36  ;;  %v3683_v58 = vld [vmem:[%s8456_s3 + $0x490] sm:$0xff]  ;;  %v1106_v36 = vadd.f32 %v7142_v35, %v7157_v46  ;;  %v3701_v35 = vld [vmem:[%s8456_s3 + $0x520] sm:$0xff] }
 0x1a9   :  { %v1117_v4 = vadd.f32 %v7172_v60, %v890_v20  ;;  %1353 = vmatprep.mubr.f32.mxu1 %v7341_v42  ;;  %1568 = vmatprep.mubr.f32.mxu0 %v7341_v42  ;;  %v5627_v41 = vpack.c.bf16 %v3700_v37, %v3699_v28  ;;  %v1201_v54 = vld [vmem:[%s8456_s3 + $0x110] sm:$0xff]  ;;  %v7482_v28 = vmax.f32 %v1112_v39, 0.0  ;;  %v1118_v37 = vadd.f32 %v7153_v44, %v7157_v46  ;;  %v1206_v44 = vld [vmem:[%s8456_s3 + $0x138] sm:$0xff] }
 0x1aa   :  { %1354 = vmatmul.mubr.f32.gmra.mrb[22].mxu1 %v7343_v9  ;;  %1569 = vmatmul.mubr.f32.gmra.mrb[36].mxu0 %v7343_v9  ;;  %v7371_v16 = vmax.f32 %v1116_v13, 0.0  ;;  %v3702_v13 = vld [vmem:[%s8456_s3 + $0x528] sm:$0xff]  ;;  %v7452_v7 = vmax.f32 %v1106_v36, 0.0  ;;  %v3705_v36 = vld [vmem:[%s8456_s3 + $0x540] sm:$0xff]  ;;  %v3691_v39 = vld [vmem:[%s8456_s3 + $0x4d0] sm:$0xff] }
 0x1ab   :  { %v7369_v11 = vmax.f32 %v1117_v4, 0.0  ;;  %5486 = vmatpush3.bf16.msra.mxu1 %v5483_v47  ;;  %v894_v14 = vpop.f32.mrb[16].mxu0  ;;  %5586 = vmatpush3.bf16.msra.mxu0 %v5585_v61  ;;  %v1202_v61 = vld [vmem:[%s8456_s3 + $0x118] sm:$0xff] }
 0x1ac   :  { %v1119_v17 = vadd.f32 %v7170_v59, %v894_v14  ;;  %v896_v18 = vpop.f32.mrb[17].mxu0  ;;  %5488 = vmatprep.subr.bf16.mxu1 %v5487_v62  ;;  %5588 = vmatprep.subr.bf16.mxu0 %v5587_v63  ;;  %v7438_v63 = vmax.f32 %v1103_v52, 0.0  ;;  %v5531_v4 = vpack.c.bf16 %v1202_v61, %v1201_v54  ;;  %v5631_v14 = vpack.c.bf16 %v3702_v13, %v3701_v35 }
 0x1ad   :  { %v1120_v22 = vadd.f32 %v7172_v60, %v896_v18  ;;  %1358 = vmatprep.mubr.f32.mxu1 %v7369_v11  ;;  %1573 = vmatprep.mubr.f32.mxu0 %v7369_v11  ;;  %v3704_v18 = vld [vmem:[%s8456_s3 + $0x538] sm:$0xff]  ;;  %v1121_v54 = vadd.f32 %v7157_v46, %v7162_v51  ;;  %v1097_v35 = vadd.f32 %v7157_v46, %v7140_v32  ;;  %v7517_v13 = vmax.f32 %v1118_v37, 0.0  ;;  %v3690_v51 = vld [vmem:[%s8456_s3 + $0x4c8] sm:$0xff]  ;;  %v3707_v46 = vld [vmem:[%s8456_s3 + $0x550] sm:$0xff] }
 0x1ae   :  { %1359 = vmatmul.mubr.f32.gmra.mrb[24].mxu1 %v7371_v16  ;;  %1574 = vmatmul.mubr.f32.gmra.mrb[38].mxu0 %v7371_v16  ;;  %v7407_v55 = vmax.f32 %v1119_v17, 0.0  ;;  %v1204_v17 = vld [vmem:[%s8456_s3 + $0x128] sm:$0xff]  ;;  %v3693_v37 = vld [vmem:[%s8456_s3 + $0x4e0] sm:$0xff] }
 0x1af   :  { %v7401_v43 = vmax.f32 %v1120_v22, 0.0  ;;  %5490 = vmatpush3.bf16.msra.mxu1 %v5487_v62  ;;  %v7403_v47 = vpop.f32.mrb[18].mxu0  ;;  %5590 = vmatpush3.bf16.msra.mxu0 %v5589_v15  ;;  %v5629_v62 = vpack.c.bf16 %v3684_v27, %v3683_v58  ;;  %v1203_v15 = vld [vmem:[%s8456_s3 + $0x120] sm:$0xff]  ;;  %v5633_v22 = vpack.c.bf16 %v3686_v6, %v3685_v5  ;;  %v3688_v58 = vld [vmem:[%s8456_s3 + $0x4b8] sm:$0xff]  ;;  %v1205_v27 = vld [vmem:[%s8456_s3 + $0x130] sm:$0xff]  ;;  %v7540_v5 = vmax.f32 %v1121_v54, 0.0 }
 0x1b0   :  { %1797 = vmatprep.mubr.f32.mxu0 %v7228_v29  ;;  %v7410_v57 = vpop.f32.mrb[19].mxu0  ;;  %5492 = vmatprep.subr.bf16.mxu1 %v5491_v19  ;;  %v5527_v29 = vpack.c.bf16 %v1200_v26, %v1199_v31  ;;  %v5535_v26 = vpack.c.bf16 %v1204_v17, %v1203_v15  ;;  %v5637_v61 = vpack.c.bf16 %v3688_v58, %v3687_v45  ;;  %v1208_v32 = vld [vmem:[%s8456_s3 + $0x148] sm:$0xff] }
 0x1b1   :  { %1363 = vmatprep.mubr.f32.mxu1 %v7401_v43  ;;  %5624 = vmatprep.subr.bf16.mxu0 %v5623_v23  ;;  %v7474_v23 = vmax.f32 %v1109_v1, 0.0  ;;  %v3689_v1 = vld [vmem:[%s8456_s3 + $0x4c0] sm:$0xff]  ;;  %v3694_v58 = vld [vmem:[%s8456_s3 + $0x4e8] sm:$0xff] }
 0x1b2   :  { %1364 = vmatmul.mubr.f32.gmra.mrb[26].mxu1 %v7407_v55  ;;  %1798 = vmatmul.mubr.f32.vlgmr.msra.gmra.mrb[40].mxu0 %v7231_v40  ;;  %v5641_v6 = vpack.c.bf16 %v3690_v51, %v3689_v1  ;;  %v3745_v1 = vld [vmem:[%s8456_s3 + $0x680] sm:$0xff]  ;;  %v3746_v51 = vld [vmem:[%s8456_s3 + $0x688] sm:$0xff] }
 0x1b3   :  { %5494 = vmatpush3.bf16.msra.mxu1 %v5491_v19  ;;  %v906_v20 = vpop.f32.mrb[20].mxu0  ;;  %4722 = vmatprep.mubr.f32.mxu1 %v1136_v34 }
 0x1b4   :  { %v7443_v40 = vadd.f32 %v7170_v59, %v906_v20  ;;  %1802 = vmatprep.mubr.f32.mxu0 %v7257_v49  ;;  %5626 = vmatpush3.bf16.msra.mxu0 %v5625_v30  ;;  %v908_v3 = vpop.f32.mrb[21].mxu0  ;;  %v5635_v30 = vpack.c.bf16 %v3704_v18, %v3703_v38  ;;  %v5539_v20 = vpack.c.bf16 %v1206_v44, %v1205_v27  ;;  %v3692_v38 = vld [vmem:[%s8456_s3 + $0x4d8] sm:$0xff]  ;;  %v1209_v18 = vld [vmem:[%s8456_s3 + $0x150] sm:$0xff]  ;;  %v1211_v27 = vld [vmem:[%s8456_s3 + $0x160] sm:$0xff] }
 0x1b5   :  { %v7457_v10 = vadd.f32 %v7172_v60, %v908_v3  ;;  %5528 = vmatprep.subr.bf16.mxu1 %v5527_v29  ;;  %5628 = vmatprep.subr.bf16.mxu0 %v5627_v41  ;;  %v7510_v41 = vmax.f32 %v1115_v24, 0.0  ;;  %v1207_v3 = vld [vmem:[%s8456_s3 + $0x140] sm:$0xff]  ;;  %v3710_v24 = vld [vmem:[%s8456_s3 + $0x568] sm:$0xff] }
 0x1b6   :  { %4723 = vmatmul.mubr.f32.vlgmr.msra.gmra.mrb[28].mxu1 %v7438_v63  ;;  %1803 = vmatmul.mubr.f32.gmra.mrb[42].mxu0 %v7259_v2  ;;  %v5543_v15 = vpack.c.bf16 %v1208_v32, %v1207_v3  ;;  %v1212_v44 = vld [vmem:[%s8456_s3 + $0x168] sm:$0xff] }
 0x1b7   :  { %5530 = vmatpush3.bf16.msra.mxu1 %v5527_v29  ;;  %v912_v19 = vpop.f32.mrb[22].mxu0  ;;  %4725 = vmatprep.mubr.f32.mxu1 %v7452_v7  ;;  %v3706_v29 = vld [vmem:[%s8456_s3 + $0x548] sm:$0xff]  ;;  %v5551_v54 = vpack.c.bf16 %v1212_v44, %v1211_v27  ;;  %v3669_v27 = vld [vmem:[%s8456_s3 + $0x420] sm:$0xff] }
 0x1b8   :  { %v7479_v25 = vadd.f32 %v7170_v59, %v912_v19  ;;  %1807 = vmatprep.mubr.f32.mxu0 %v7285_v8  ;;  %5630 = vmatpush3.bf16.msra.mxu0 %v5629_v62  ;;  %v914_v31 = vpop.f32.mrb[23].mxu0  ;;  %v5639_v62 = vpack.c.bf16 %v3706_v29, %v3705_v36  ;;  %v1210_v19 = vld [vmem:[%s8456_s3 + $0x158] sm:$0xff]  ;;  %v1122_v36 = vadd.f32 %v7170_v59, %v7403_v47  ;;  %v1213_v59 = vld [vmem:[%s8456_s3 + $0x170] sm:$0xff] }
 0x1b9   :  { %v7487_v52 = vadd.f32 %v7172_v60, %v914_v31  ;;  %5532 = vmatprep.subr.bf16.mxu1 %v5531_v4  ;;  %5632 = vmatprep.subr.bf16.mxu0 %v5631_v14  ;;  %v1133_v14 = vmax.f32 %v1097_v35, 0.0  ;;  %v5645_v31 = vpack.c.bf16 %v3692_v38, %v3691_v39  ;;  %v5649_v29 = vpack.c.bf16 %v3694_v58, %v3693_v37  ;;  %v1214_v47 = vld [vmem:[%s8456_s3 + $0x178] sm:$0xff]  ;;  %v3730_v39 = vld [vmem:[%s8456_s3 + $0x608] sm:$0xff]  ;;  %v3749_v37 = vld [vmem:[%s8456_s3 + $0x6a0] sm:$0xff] }
 0x1ba   :  { %4726 = vmatmul.mubr.f32.gmra.mrb[30].mxu1 %v7474_v23  ;;  %1808 = vmatmul.mubr.f32.gmra.mrb[44].mxu0 %v7287_v12  ;;  %v7610_v3 = vmax.f32 %v1122_v36, 0.0  ;;  %v3748_v38 = vld [vmem:[%s8456_s3 + $0x698] sm:$0xff]  ;;  %v3751_v36 = vld [vmem:[%s8456_s3 + $0x6b0] sm:$0xff] }
 0x1bb   :  { %5534 = vmatpush3.bf16.msra.mxu1 %v5531_v4  ;;  %4728 = vmatprep.mubr.f32.mxu1 %v7482_v28  ;;  %v3708_v4 = vld [vmem:[%s8456_s3 + $0x558] sm:$0xff] }
 0x1bc   :  { %1812 = vmatprep.mubr.f32.mxu0 %v7313_v50  ;;  %5634 = vmatpush3.bf16.msra.mxu0 %v5633_v22  ;;  %v5643_v17 = vpack.c.bf16 %v3708_v4, %v3707_v46  ;;  %v3709_v22 = vld [vmem:[%s8456_s3 + $0x560] sm:$0xff]  ;;  %v5555_v46 = vpack.c.bf16 %v1214_v47, %v1213_v59  ;;  %v5687_v4 = vpack.c.bf16 %v3746_v51, %v3745_v1  ;;  %v3736_v59 = vld [vmem:[%s8456_s3 + $0x638] sm:$0xff]  ;;  %v3754_v1 = vld [vmem:[%s8456_s3 + $0x6c8] sm:$0xff] }
 0x1bd   :  { %5536 = vmatprep.subr.bf16.mxu1 %v5535_v26  ;;  %5636 = vmatprep.subr.bf16.mxu0 %v5635_v30  ;;  %v1123_v30 = vadd.f32 %v7172_v60, %v7410_v57  ;;  %v5647_v45 = vpack.c.bf16 %v3710_v24, %v3709_v22  ;;  %v3711_v60 = vld [vmem:[%s8456_s3 + $0x570] sm:$0xff]  ;;  %v3712_v57 = vld [vmem:[%s8456_s3 + $0x578] sm:$0xff]  ;;  %v3753_v47 = vld [vmem:[%s8456_s3 + $0x6c0] sm:$0xff] }
 0x1be   :  { %4729 = vmatmul.mubr.f32.gmra.mrb[32].mxu1 %v7510_v41  ;;  %1813 = vmatmul.mubr.f32.gmra.mrb[46].mxu0 %v7315_v33  ;;  %v3667_v24 = vld [vmem:[%s8456_s3 + $0x410] sm:$0xff] }
 0x1bf   :  { %5538 = vmatpush3.bf16.msra.mxu1 %v5535_v26  ;;  %4731 = vmatprep.mubr.f32.mxu1 %v7517_v13  ;;  %v5547_v26 = vpack.c.bf16 %v1210_v19, %v1209_v18  ;;  %v7591_v35 = vmax.f32 %v1123_v30, 0.0  ;;  %v3750_v30 = vld [vmem:[%s8456_s3 + $0x6a8] sm:$0xff] }
 0x1c0   :  { %1817 = vmatprep.mubr.f32.mxu0 %v7341_v42  ;;  %5638 = vmatpush3.bf16.msra.mxu0 %v5637_v61  ;;  %v3695_v61 = vld [vmem:[%s8456_s3 + $0x4f0] sm:$0xff]  ;;  %v5695_v44 = vpack.c.bf16 %v3750_v30, %v3749_v37  ;;  %v3758_v37 = vld [vmem:[%s8456_s3 + $0x6e8] sm:$0xff] }
 0x1c1   :  { %5540 = vmatprep.subr.bf16.mxu1 %v5539_v20  ;;  %5640 = vmatprep.subr.bf16.mxu0 %v5639_v62  ;;  %v3696_v62 = vld [vmem:[%s8456_s3 + $0x4f8] sm:$0xff] }
 0x1c2   :  { %4732 = vmatmul.mubr.f32.gmra.mrb[34].mxu1 %v7540_v5  ;;  %1818 = vmatmul.mubr.f32.gmra.mrb[48].mxu0 %v7343_v9  ;;  %v5653_v32 = vpack.c.bf16 %v3696_v62, %v3695_v61  ;;  %v3672_v61 = vld [vmem:[%s8456_s3 + $0x438] sm:$0xff]  ;;  %v3735_v62 = vld [vmem:[%s8456_s3 + $0x630] sm:$0xff] }
 0x1c3   :  { %5542 = vmatpush3.bf16.msra.mxu1 %v5539_v20  ;;  %4766 = vmatprep.mubr.f32.mxu1 %v1133_v14  ;;  %v5651_v20 = vpack.c.bf16 %v3712_v57, %v3711_v60  ;;  %v3665_v14 = vld [vmem:[%s8456_s3 + $0x400] sm:$0xff]  ;;  %v3734_v57 = vld [vmem:[%s8456_s3 + $0x628] sm:$0xff] }
 0x1c4   :  { %1822 = vmatprep.mubr.f32.mxu0 %v7369_v11  ;;  %5642 = vmatpush3.bf16.msra.mxu0 %v5641_v6  ;;  %v3729_v6 = vld [vmem:[%s8456_s3 + $0x600] sm:$0xff] }
 0x1c5   :  { %5544 = vmatprep.subr.bf16.mxu1 %v5543_v15  ;;  %5644 = vmatprep.subr.bf16.mxu0 %v5643_v17  ;;  %v3747_v17 = vld [vmem:[%s8456_s3 + $0x690] sm:$0xff]  ;;  %v5689_v18 = vpack.c.bf16 %v3730_v39, %v3729_v6  ;;  %v3733_v60 = vld [vmem:[%s8456_s3 + $0x620] sm:$0xff]  ;;  %v5703_v6 = vpack.c.bf16 %v3754_v1, %v3753_v47 }
 0x1c6   :  { %1823 = vmatmul.mubr.f32.gmra.mrb[50].mxu0 %v7371_v16  ;;  %v5691_v22 = vpack.c.bf16 %v3748_v38, %v3747_v17  ;;  %v3737_v39 = vld [vmem:[%s8456_s3 + $0x640] sm:$0xff]  ;;  %v3756_v17 = vld [vmem:[%s8456_s3 + $0x6d8] sm:$0xff] }
 0x1c7   :  { %5546 = vmatpush3.bf16.msra.mxu1 %v5543_v15  ;;  %1827 = vmatprep.mubr.f32.mxu0 %v7401_v43  ;;  %v3666_v15 = vld [vmem:[%s8456_s3 + $0x408] sm:$0xff]  ;;  %v3713_v1 = vld [vmem:[%s8456_s3 + $0x580] sm:$0xff] }
 0x1c8   :  { %5646 = vmatpush3.bf16.msra.mxu0 %v5645_v31  ;;  %5548 = vmatprep.subr.bf16.mxu1 %v5547_v26  ;;  %v5591_v19 = vpack.c.bf16 %v3666_v15, %v3665_v14  ;;  %v3668_v31 = vld [vmem:[%s8456_s3 + $0x418] sm:$0xff]  ;;  %v3738_v14 = vld [vmem:[%s8456_s3 + $0x648] sm:$0xff]  ;;  %v3755_v15 = vld [vmem:[%s8456_s3 + $0x6d0] sm:$0xff] }
 0x1c9   :  { %5648 = vmatprep.subr.bf16.mxu0 %v5647_v45  ;;  %v5595_v45 = vpack.c.bf16 %v3668_v31, %v3667_v24  ;;  %v5707_v24 = vpack.c.bf16 %v3756_v17, %v3755_v15  ;;  %v3739_v31 = vld [vmem:[%s8456_s3 + $0x650] sm:$0xff]  ;;  %v3722_v15 = vld [vmem:[%s8456_s3 + $0x5c8] sm:$0xff]  ;;  %v7822_v17 = vmax.f32 %v7160_v48, 0.0 }
 0x1ca   :  { %1828 = vmatmul.mubr.f32.gmra.mrb[52].mxu0 %v7407_v55 }
 0x1cb   :  { %5550 = vmatpush3.bf16.msra.mxu1 %v5547_v26  ;;  %1832 = vmatprep.mubr.f32.mxu0 %v7591_v35  ;;  %v3731_v26 = vld [vmem:[%s8456_s3 + $0x610] sm:$0xff] }
 0x1cc   :  { %5650 = vmatpush3.bf16.msra.mxu0 %v5649_v29  ;;  %5552 = vmatprep.subr.bf16.mxu1 %v5551_v54  ;;  %v5697_v29 = vpack.c.bf16 %v3734_v57, %v3733_v60  ;;  %v3759_v60 = vld [vmem:[%s8456_s3 + $0x6f0] sm:$0xff]  ;;  %v3760_v57 = vld [vmem:[%s8456_s3 + $0x6f8] sm:$0xff] }
 0x1cd   :  { %5652 = vmatprep.subr.bf16.mxu0 %v5651_v20  ;;  %v5699_v20 = vpack.c.bf16 %v3752_v21, %v3751_v36 }
 0x1ce   :  { %1833 = vmatmul.mubr.f32.gmra.mrb[54].mxu0 %v7610_v3 }
 0x1cf   :  { %5554 = vmatpush3.bf16.msra.mxu1 %v5551_v54  ;;  %2064 = vmatprep.mubr.f32.mxu0 %v7257_v49  ;;  %v3732_v49 = vld [vmem:[%s8456_s3 + $0x618] sm:$0xff]  ;;  %v3671_v54 = vld [vmem:[%s8456_s3 + $0x430] sm:$0xff] }
 0x1d0   :  { %5654 = vmatpush3.bf16.msra.mxu0 %v5653_v32  ;;  %5556 = vmatprep.subr.bf16.mxu1 %v5555_v46  ;;  %v5693_v58 = vpack.c.bf16 %v3732_v49, %v3731_v26  ;;  %v5603_v51 = vpack.c.bf16 %v3672_v61, %v3671_v54  ;;  %v5701_v32 = vpack.c.bf16 %v3736_v59, %v3735_v62  ;;  %v3740_v26 = vld [vmem:[%s8456_s3 + $0x658] sm:$0xff]  ;;  %v3757_v49 = vld [vmem:[%s8456_s3 + $0x6e0] sm:$0xff]  ;;  %v3743_v61 = vld [vmem:[%s8456_s3 + $0x670] sm:$0xff]  ;;  %v1162_v62 = vmax.f32 %v7457_v10, 0.0 }
 0x1d1   :  { %5688 = vmatprep.subr.bf16.mxu0 %v5687_v4  ;;  %v3674_v4 = vld [vmem:[%s8456_s3 + $0x448] sm:$0xff]  ;;  %v5715_v54 = vpack.c.bf16 %v3760_v57, %v3759_v60  ;;  %v3761_v10 = vld [vmem:[%s8456_s3 + $0x700] sm:$0xff]  ;;  %v3771_v60 = vld [vmem:[%s8456_s3 + $0x750] sm:$0xff] }
 0x1d2   :  { %v3772_v57 = vld [vmem:[%s8456_s3 + $0x758] sm:$0xff] }
 0x1d3   :  { %5558 = vmatpush3.bf16.msra.mxu1 %v5555_v46  ;;  %2065 = vmatmul.mubr.f32.vlgmr.msra.gmra.mrb[56].mxu0 %v7259_v2  ;;  %v3670_v2 = vld [vmem:[%s8456_s3 + $0x428] sm:$0xff]  ;;  %v3673_v46 = vld [vmem:[%s8456_s3 + $0x440] sm:$0xff] }
 0x1d4   :  { %2069 = vmatprep.mubr.f32.mxu0 %v7285_v8  ;;  %5690 = vmatpush3.bf16.msra.mxu0 %v5689_v18  ;;  %v5607_v38 = vpack.c.bf16 %v3674_v4, %v3673_v46  ;;  %v5705_v18 = vpack.c.bf16 %v3738_v14, %v3737_v39  ;;  %v3715_v4 = vld [vmem:[%s8456_s3 + $0x590] sm:$0xff]  ;;  %v3717_v39 = vld [vmem:[%s8456_s3 + $0x5a0] sm:$0xff]  ;;  %v3720_v14 = vld [vmem:[%s8456_s3 + $0x5b8] sm:$0xff] }
 0x1d5   :  { %5592 = vmatprep.subr.bf16.mxu1 %v5591_v19  ;;  %5692 = vmatprep.subr.bf16.mxu0 %v5691_v22  ;;  %v3676_v22 = vld [vmem:[%s8456_s3 + $0x458] sm:$0xff] }
 0x1d6   :  { %4767 = vmatmul.mubr.f32.vlgmr.msra.gmra.mrb[28].mxu1 %v1136_v34  ;;  %v5599_v34 = vpack.c.bf16 %v3670_v2, %v3669_v27  ;;  %v5711_v27 = vpack.c.bf16 %v3758_v37, %v3757_v49  ;;  %v3741_v2 = vld [vmem:[%s8456_s3 + $0x660] sm:$0xff] }
 0x1d7   :  { %4769 = vmatprep.mubr.f32.mxu1 %v7438_v63  ;;  %5594 = vmatpush3.bf16.msra.mxu1 %v5591_v19  ;;  %v3675_v19 = vld [vmem:[%s8456_s3 + $0x450] sm:$0xff]  ;;  %v3765_v49 = vld [vmem:[%s8456_s3 + $0x720] sm:$0xff] }
 0x1d8   :  { %2070 = vmatmul.mubr.f32.gmra.mrb[58].mxu0 %v7287_v12  ;;  %5596 = vmatprep.subr.bf16.mxu1 %v5595_v45  ;;  %v5611_v30 = vpack.c.bf16 %v3676_v22, %v3675_v19  ;;  %v1164_v22 = vmax.f32 %v7479_v25, 0.0  ;;  %v3766_v25 = vld [vmem:[%s8456_s3 + $0x728] sm:$0xff] }
 0x1d9   :  { %2074 = vmatprep.mubr.f32.mxu0 %v7313_v50  ;;  %5694 = vmatpush3.bf16.msra.mxu0 %v5693_v58  ;;  %v3678_v58 = vld [vmem:[%s8456_s3 + $0x468] sm:$0xff]  ;;  %v5727_v37 = vpack.c.bf16 %v3766_v25, %v3765_v49  ;;  %v3786_v25 = vld [vmem:[%s8458_s5 + $0xc0] sm:$0xff] }
 0x1da   :  { %4770 = vmatmul.mubr.f32.gmra.mrb[30].mxu1 %v7452_v7  ;;  %5696 = vmatprep.subr.bf16.mxu0 %v5695_v44  ;;  %v3742_v44 = vld [vmem:[%s8456_s3 + $0x668] sm:$0xff] }
 0x1db   :  { %4772 = vmatprep.mubr.f32.mxu1 %v7474_v23  ;;  %5598 = vmatpush3.bf16.msra.mxu1 %v5595_v45  ;;  %v5709_v45 = vpack.c.bf16 %v3740_v26, %v3739_v31  ;;  %v5713_v21 = vpack.c.bf16 %v3742_v44, %v3741_v2  ;;  %v3764_v31 = vld [vmem:[%s8456_s3 + $0x718] sm:$0xff]  ;;  %v1163_v2 = vmax.f32 %v7168_v56, 0.0  ;;  %v3773_v56 = vld [vmem:[%s8456_s3 + $0x760] sm:$0xff] }
 0x1dc   :  { %2075 = vmatmul.mubr.f32.gmra.mrb[60].mxu0 %v7315_v33  ;;  %5600 = vmatprep.subr.bf16.mxu1 %v5599_v34 }
 0x1dd   :  { %2079 = vmatprep.mubr.f32.mxu0 %v7341_v42  ;;  %5698 = vmatpush3.bf16.msra.mxu0 %v5697_v29  ;;  %v3680_v29 = vld [vmem:[%s8456_s3 + $0x478] sm:$0xff] }
 0x1de   :  { %4773 = vmatmul.mubr.f32.gmra.mrb[32].mxu1 %v7482_v28  ;;  %5700 = vmatprep.subr.bf16.mxu0 %v5699_v20  ;;  %v3744_v20 = vld [vmem:[%s8456_s3 + $0x678] sm:$0xff] }
 0x1df   :  { %4775 = vmatprep.mubr.f32.mxu1 %v7510_v41  ;;  %5602 = vmatpush3.bf16.msra.mxu1 %v5599_v34  ;;  %v3679_v34 = vld [vmem:[%s8456_s3 + $0x470] sm:$0xff]  ;;  %v5717_v47 = vpack.c.bf16 %v3744_v20, %v3743_v61  ;;  %v1166_v61 = vmax.f32 %v7165_v53, 0.0  ;;  %v2509_v53 = vld [vmem:[%s8458_s5 + $0x8] sm:$0xff] }
 0x1e0   :  { %2080 = vmatmul.mubr.f32.gmra.mrb[62].mxu0 %v7343_v9  ;;  %5604 = vmatprep.subr.bf16.mxu1 %v5603_v51  ;;  %v5619_v59 = vpack.c.bf16 %v3680_v29, %v3679_v34  ;;  %v3775_v29 = vld [vmem:[%s8456_s3 + $0x770] sm:$0xff] }
 0x1e1   :  { %2084 = vmatprep.mubr.f32.mxu0 %v7369_v11  ;;  %5702 = vmatpush3.bf16.msra.mxu0 %v5701_v32  ;;  %v1161_v32 = vmax.f32 %v7443_v40, 0.0 }
 0x1e2   :  { %4776 = vmatmul.mubr.f32.gmra.mrb[34].mxu1 %v7517_v13  ;;  %5704 = vmatprep.subr.bf16.mxu0 %v5703_v6  ;;  %v3716_v6 = vld [vmem:[%s8456_s3 + $0x598] sm:$0xff] }
 0x1e3   :  { %5606 = vmatpush3.bf16.msra.mxu1 %v5603_v51  ;;  %4810 = vmatprep.mubr.f32.mxu1 %v7438_v63  ;;  %v3677_v63 = vld [vmem:[%s8456_s3 + $0x460] sm:$0xff]  ;;  %v3714_v51 = vld [vmem:[%s8456_s3 + $0x588] sm:$0xff]  ;;  %v5659_v40 = vpack.c.bf16 %v3716_v6, %v3715_v4  ;;  %v2511_v4 = vld [vmem:[%s8458_s5 + $0x18] sm:$0xff] }
 0x1e4   :  { %2085 = vmatmul.mubr.f32.gmra.mrb[64].mxu0 %v7371_v16  ;;  %5608 = vmatprep.subr.bf16.mxu1 %v5607_v38  ;;  %v5615_v36 = vpack.c.bf16 %v3678_v58, %v3677_v63  ;;  %v5655_v46 = vpack.c.bf16 %v3714_v51, %v3713_v1  ;;  %v3769_v58 = vld [vmem:[%s8456_s3 + $0x740] sm:$0xff]  ;;  %v3781_v1 = vld [vmem:[%s8458_s5 + $0x98] sm:$0xff] }
 0x1e5   :  { %2089 = vmatprep.mubr.f32.mxu0 %v7401_v43  ;;  %5706 = vmatpush3.bf16.msra.mxu0 %v5705_v18 }
 0x1e6   :  { %5708 = vmatprep.subr.bf16.mxu0 %v5707_v24 }
 0x1e7   :  { %5610 = vmatpush3.bf16.msra.mxu1 %v5607_v38  ;;  %v3724_v38 = vld [vmem:[%s8456_s3 + $0x5d8] sm:$0xff] }
 0x1e8   :  { %2090 = vmatmul.mubr.f32.gmra.mrb[66].mxu0 %v7407_v55  ;;  %5612 = vmatprep.subr.bf16.mxu1 %v5611_v30 }
 0x1e9   :  { %2094 = vmatprep.mubr.f32.mxu0 %v7591_v35  ;;  %5710 = vmatpush3.bf16.msra.mxu0 %v5709_v45  ;;  %v3768_v45 = vld [vmem:[%s8456_s3 + $0x738] sm:$0xff] }
 0x1ea   :  { %5712 = vmatprep.subr.bf16.mxu0 %v5711_v27  ;;  %v3770_v27 = vld [vmem:[%s8456_s3 + $0x748] sm:$0xff] }
 0x1eb   :  { %5614 = vmatpush3.bf16.msra.mxu1 %v5611_v30  ;;  %v3767_v30 = vld [vmem:[%s8456_s3 + $0x730] sm:$0xff]  ;;  %v5735_v44 = vpack.c.bf16 %v3770_v27, %v3769_v58  ;;  %v2517_v58 = vld [vmem:[%s8458_s5 + $0x48] sm:$0xff] }
 0x1ec   :  { %2095 = vmatmul.mubr.f32.gmra.mrb[68].mxu0 %v7610_v3  ;;  %5616 = vmatprep.subr.bf16.mxu1 %v5615_v36  ;;  %v5731_v63 = vpack.c.bf16 %v3768_v45, %v3767_v30 }
 0x1ed   :  { %2099 = vmatprep.mubr.f32.mxu0 %v1162_v62  ;;  %5714 = vmatpush3.bf16.msra.mxu0 %v5713_v21  ;;  %v3774_v21 = vld [vmem:[%s8456_s3 + $0x768] sm:$0xff] }
 0x1ee   :  { %5716 = vmatprep.subr.bf16.mxu0 %v5715_v54  ;;  %v5743_v34 = vpack.c.bf16 %v3774_v21, %v3773_v56  ;;  %v3788_v21 = vld [vmem:[%s8458_s5 + $0xd0] sm:$0xff] }
 0x1ef   :  { %5618 = vmatpush3.bf16.msra.mxu1 %v5615_v36  ;;  %v5739_v36 = vpack.c.bf16 %v3772_v57, %v3771_v60 }
 0x1f0   :  { %2100 = vmatmul.mubr.f32.gmra.mrb[70].mxu0 %v1161_v32  ;;  %5620 = vmatprep.subr.bf16.mxu1 %v5619_v59 }
 0x1f1   :  { %5718 = vmatpush3.bf16.msra.mxu0 %v5717_v47  ;;  %2331 = vmatprep.mubr.f32.mxu0 %v7285_v8  ;;  %v3718_v8 = vld [vmem:[%s8456_s3 + $0x5a8] sm:$0xff]  ;;  %v3780_v47 = vld [vmem:[%s8458_s5 + $0x90] sm:$0xff] }
 0x1f2   :  { %v5755_v6 = vpack.c.bf16 %v3781_v1, %v3780_v47  ;;  %v3790_v47 = vld [vmem:[%s8458_s5 + $0xe0] sm:$0xff]  ;;  %v3791_v1 = vld [vmem:[%s8458_s5 + $0xe8] sm:$0xff] }
 0x1f3   :  { %5622 = vmatpush3.bf16.msra.mxu1 %v5619_v59 }
 0x1f4   :  { %2332 = vmatmul.mubr.f32.vlgmr.msra.gmra.mrb[72].mxu0 %v7287_v12  ;;  %5656 = vmatprep.subr.bf16.mxu1 %v5655_v46  ;;  %v5663_v12 = vpack.c.bf16 %v3718_v8, %v3717_v39 }
 0x1f5   :  { %2336 = vmatprep.mubr.f32.mxu0 %v7313_v50  ;;  %v3719_v50 = vld [vmem:[%s8456_s3 + $0x5b0] sm:$0xff] }
 0x1f6   :  { %4811 = vmatmul.mubr.f32.vlgmr.msra.gmra.mrb[28].mxu1 %v7452_v7 }
 0x1f7   :  { %4813 = vmatprep.mubr.f32.mxu1 %v7474_v23  ;;  %5658 = vmatpush3.bf16.msra.mxu1 %v5655_v46  ;;  %v2510_v46 = vld [vmem:[%s8458_s5 + $0x10] sm:$0xff] }
 0x1f8   :  { %2337 = vmatmul.mubr.f32.gmra.mrb[74].mxu0 %v7315_v33  ;;  %5660 = vmatprep.subr.bf16.mxu1 %v5659_v40  ;;  %v5667_v33 = vpack.c.bf16 %v3720_v14, %v3719_v50  ;;  %v5779_v8 = vpack.c.bf16 %v2511_v4, %v2510_v46  ;;  %v3783_v50 = vld [vmem:[%s8458_s5 + $0xa8] sm:$0xff] }
 0x1f9   :  { %2341 = vmatprep.mubr.f32.mxu0 %v7341_v42  ;;  %v3721_v42 = vld [vmem:[%s8456_s3 + $0x5c0] sm:$0xff] }
 0x1fa   :  { %4814 = vmatmul.mubr.f32.gmra.mrb[30].mxu1 %v7482_v28 }
 0x1fb   :  { %4816 = vmatprep.mubr.f32.mxu1 %v7510_v41  ;;  %5662 = vmatpush3.bf16.msra.mxu1 %v5659_v40 }
 0x1fc   :  { %2342 = vmatmul.mubr.f32.gmra.mrb[76].mxu0 %v7343_v9  ;;  %5664 = vmatprep.subr.bf16.mxu1 %v5663_v12  ;;  %v5671_v9 = vpack.c.bf16 %v3722_v15, %v3721_v42  ;;  %v2512_v42 = vld [vmem:[%s8458_s5 + $0x20] sm:$0xff]  ;;  %v2513_v15 = vld [vmem:[%s8458_s5 + $0x28] sm:$0xff] }
 0x1fd   :  { %2346 = vmatprep.mubr.f32.mxu0 %v7369_v11  ;;  %v3723_v11 = vld [vmem:[%s8456_s3 + $0x5d0] sm:$0xff] }
 0x1fe   :  { %4817 = vmatmul.mubr.f32.gmra.mrb[32].mxu1 %v7517_v13  ;;  %v5675_v48 = vpack.c.bf16 %v3724_v38, %v3723_v11 }
 0x1ff   :  { %4819 = vmatprep.mubr.f32.mxu1 %v7540_v5  ;;  %5666 = vmatpush3.bf16.msra.mxu1 %v5663_v12  ;;  %v3782_v12 = vld [vmem:[%s8458_s5 + $0xa0] sm:$0xff] }
 0x200   :  { %2347 = vmatmul.mubr.f32.gmra.mrb[78].mxu0 %v7371_v16  ;;  %5668 = vmatprep.subr.bf16.mxu1 %v5667_v33  ;;  %v3725_v16 = vld [vmem:[%s8456_s3 + $0x5e0] sm:$0xff]  ;;  %v5758_v11 = vpack.c.bf16 %v3783_v50, %v3782_v12 }
 0x201   :  { %2351 = vmatprep.mubr.f32.mxu0 %v7401_v43  ;;  %v3726_v43 = vld [vmem:[%s8456_s3 + $0x5e8] sm:$0xff] }
 0x202   :  { %4820 = vmatmul.mubr.f32.gmra.mrb[34].mxu1 %v7822_v17  ;;  %v5679_v18 = vpack.c.bf16 %v3726_v43, %v3725_v16  ;;  %v5782_v43 = vpack.c.bf16 %v2513_v15, %v2512_v42 }
 0x203   :  { %5670 = vmatpush3.bf16.msra.mxu1 %v5667_v33  ;;  %4854 = vmatprep.mubr.f32.mxu1 %v7452_v7  ;;  %v3728_v7 = vld [vmem:[%s8456_s3 + $0x5f8] sm:$0xff] }
 0x204   :  { %2352 = vmatmul.mubr.f32.gmra.mrb[80].mxu0 %v7407_v55  ;;  %5672 = vmatprep.subr.bf16.mxu1 %v5671_v9  ;;  %v3727_v55 = vld [vmem:[%s8456_s3 + $0x5f0] sm:$0xff] }
 0x205   :  { %2356 = vmatprep.mubr.f32.mxu0 %v7591_v35  ;;  %v1165_v35 = vmax.f32 %v7487_v52, 0.0  ;;  %v5683_v19 = vpack.c.bf16 %v3728_v7, %v3727_v55  ;;  %v3763_v52 = vld [vmem:[%s8456_s3 + $0x710] sm:$0xff]  ;;  %v3785_v55 = vld [vmem:[%s8458_s5 + $0xb8] sm:$0xff] }
 0x206   :  { %v5723_v26 = vpack.c.bf16 %v3764_v31, %v3763_v52 }
 0x207   :  { %5674 = vmatpush3.bf16.msra.mxu1 %v5671_v9 }
 0x208   :  { %2357 = vmatmul.mubr.f32.gmra.mrb[82].mxu0 %v7610_v3  ;;  %5676 = vmatprep.subr.bf16.mxu1 %v5675_v48  ;;  %v3762_v3 = vld [vmem:[%s8456_s3 + $0x708] sm:$0xff] }
 0x209   :  { %2361 = vmatprep.mubr.f32.mxu0 %v1162_v62  ;;  %v5719_v24 = vpack.c.bf16 %v3762_v3, %v3761_v10  ;;  %v3778_v62 = vld [vmem:[%s8458_s5 + $0x80] sm:$0xff]  ;;  %v2515_v10 = vld [vmem:[%s8458_s5 + $0x38] sm:$0xff] }
 0x20b   :  { %5678 = vmatpush3.bf16.msra.mxu1 %v5675_v48 }
 0x20c   :  { %2362 = vmatmul.mubr.f32.gmra.mrb[84].mxu0 %v1161_v32  ;;  %5680 = vmatprep.subr.bf16.mxu1 %v5679_v18 }
 0x20d   :  { %2366 = vmatprep.mubr.f32.mxu0 %v1165_v35 }
 0x20f   :  { %5682 = vmatpush3.bf16.msra.mxu1 %v5679_v18  ;;  %v3784_v18 = vld [vmem:[%s8458_s5 + $0xb0] sm:$0xff] }
 0x210   :  { %2367 = vmatmul.mubr.f32.gmra.mrb[86].mxu0 %v1164_v22  ;;  %5684 = vmatprep.subr.bf16.mxu1 %v5683_v19 }
 0x211   :  { %4942 = vmatprep.mubr.msk.f32.mxu0 %vm6202_vm0, %v6200_v0 }
 0x213   :  { %5686 = vmatpush3.bf16.msra.mxu1 %v5683_v19  ;;  %v2514_v19 = vld [vmem:[%s8458_s5 + $0x30] sm:$0xff] }
 0x214   :  { %5720 = vmatprep.subr.bf16.mxu1 %v5719_v24  ;;  %v5785_v49 = vpack.c.bf16 %v2515_v10, %v2514_v19 }
 0x216   :  { %4855 = vmatmul.mubr.f32.vlgmr.msra.gmra.mrb[28].mxu1 %v7474_v23 }
 0x217   :  { %4857 = vmatprep.mubr.f32.mxu1 %v7482_v28  ;;  %5722 = vmatpush3.bf16.msra.mxu1 %v5719_v24  ;;  %v5761_v24 = vpack.c.bf16 %v3785_v55, %v3784_v18 }
 0x218   :  { %5724 = vmatprep.subr.bf16.mxu1 %v5723_v26 }
 0x21a   :  { %4858 = vmatmul.mubr.f32.gmra.mrb[30].mxu1 %v7510_v41 }
 0x21b   :  { %4860 = vmatprep.mubr.f32.mxu1 %v7517_v13  ;;  %5726 = vmatpush3.bf16.msra.mxu1 %v5723_v26 }
 0x21c   :  { %5728 = vmatprep.subr.bf16.mxu1 %v5727_v37 }
 0x21e   :  { %4861 = vmatmul.mubr.f32.gmra.mrb[32].mxu1 %v7540_v5 }
 0x21f   :  { %4863 = vmatprep.mubr.f32.mxu1 %v7822_v17  ;;  %5730 = vmatpush3.bf16.msra.mxu1 %v5727_v37  ;;  %v3787_v37 = vld [vmem:[%s8458_s5 + $0xc8] sm:$0xff] }
 0x220   :  { %5732 = vmatprep.subr.bf16.mxu1 %v5731_v63 }
 0x222   :  { %4864 = vmatmul.mubr.f32.gmra.mrb[34].mxu1 %v1163_v2 }
 0x223   :  { %5734 = vmatpush3.bf16.msra.mxu1 %v5731_v63  ;;  %4898 = vmatprep.mubr.f32.mxu1 %v7474_v23  ;;  %v3776_v23 = vld [vmem:[%s8456_s3 + $0x778] sm:$0xff]  ;;  %v2516_v63 = vld [vmem:[%s8458_s5 + $0x40] sm:$0xff] }
 0x224   :  { %5736 = vmatprep.subr.bf16.mxu1 %v5735_v44  ;;  %v5747_v54 = vpack.c.bf16 %v3776_v23, %v3775_v29  ;;  %v5788_v56 = vpack.c.bf16 %v2517_v58, %v2516_v63  ;;  %v2522_v58 = vld [vmem:[%s8458_s5 + $0x70] sm:$0xff] }
 0x227   :  { %5738 = vmatpush3.bf16.msra.mxu1 %v5735_v44  ;;  %v5764_v44 = vpack.c.bf16 %v3787_v37, %v3786_v25  ;;  %v3792_v37 = vld [vmem:[%s8458_s5 + $0xf0] sm:$0xff] }
 0x228   :  { %5740 = vmatprep.subr.bf16.mxu1 %v5739_v36 }
 0x22b   :  { %5742 = vmatpush3.bf16.msra.mxu1 %v5739_v36 }
 0x22c   :  { %5744 = vmatprep.subr.bf16.mxu1 %v5743_v34 }
 0x22f   :  { %5746 = vmatpush3.bf16.msra.mxu1 %v5743_v34  ;;  %v3789_v34 = vld [vmem:[%s8458_s5 + $0xd8] sm:$0xff] }
 0x230   :  { %5748 = vmatprep.subr.bf16.mxu1 %v5747_v54 }
 0x233   :  { %5750 = vmatpush3.bf16.msra.mxu1 %v5747_v54  ;;  %v2518_v54 = vld [vmem:[%s8458_s5 + $0x50] sm:$0xff] }
 0x236   :  { %4899 = vmatmul.mubr.f32.vlgmr.msra.gmra.mrb[28].mxu1 %v7482_v28  ;;  %v3779_v28 = vld [vmem:[%s8458_s5 + $0x88] sm:$0xff] }
 0x237   :  { %4901 = vmatprep.mubr.f32.mxu1 %v7510_v41  ;;  %v2508_v41 = vld [vmem:[%s8458_s5] sm:$0xff]  ;;  %v5752_v59 = vpack.c.bf16 %v3779_v28, %v3778_v62  ;;  %v5767_v28 = vpack.c.bf16 %v3789_v34, %v3788_v21 }
 0x238   :  { %v5776_v32 = vpack.c.bf16 %v2509_v53, %v2508_v41 }
 0x23a   :  { %4902 = vmatmul.mubr.f32.gmra.mrb[30].mxu1 %v7517_v13 }
 0x23b   :  { %4904 = vmatprep.mubr.f32.mxu1 %v7540_v5  ;;  %v6201_v5 = vmov 0.0|0.0  }
 0x23c   :  { %5751 = vmatprep.subr.bf16.mxu0 %v6201_v5  ;;  %5775 = vmatprep.subr.bf16.mxu1 %v6201_v5 }
 0x23d   :  { %5753 = vmatpush3.bf16.msra.mxu0 %v5752_v59  ;;  %5777 = vmatpush3.bf16.msra.mxu1 %v5776_v32 }
 0x23e   :  { %4905 = vmatmul.mubr.f32.gmra.mrb[32].mxu1 %v7822_v17  ;;  %5754 = vmatprep.subr.bf16.mxu0 %v6201_v5 }
 0x23f   :  { %4907 = vmatprep.mubr.f32.mxu1 %v1163_v2  ;;  %5778 = vmatprep.subr.bf16.mxu1 %v6201_v5 }
 0x241   :  { %5756 = vmatpush3.bf16.msra.mxu0 %v5755_v6  ;;  %5780 = vmatpush3.bf16.msra.mxu1 %v5779_v8  ;;  %v5770_v6 = vpack.c.bf16 %v3791_v1, %v3790_v47 }
 0x242   :  { %4908 = vmatmul.mubr.f32.gmra.mrb[34].mxu1 %v1166_v61  ;;  %5757 = vmatprep.subr.bf16.mxu0 %v6201_v5  ;;  %v2519_v61 = vld [vmem:[%s8458_s5 + $0x58] sm:$0xff] }
 0x243   :  { %5781 = vmatprep.subr.bf16.mxu1 %v6201_v5  ;;  %v5791_v53 = vpack.c.bf16 %v2519_v61, %v2518_v54  ;;  %4977 = vmatprep.mubr.msk.f32.mxu1 %vm6202_vm0, %v6200_v0 }
 0x245   :  { %5759 = vmatpush3.bf16.msra.mxu0 %v5758_v11  ;;  %5783 = vmatpush3.bf16.msra.mxu1 %v5782_v43 }
 0x246   :  { %5760 = vmatprep.subr.bf16.mxu0 %v6201_v5  ;;  %5784 = vmatprep.subr.bf16.mxu1 %v6201_v5 }
 0x249   :  { %5762 = vmatpush3.bf16.msra.mxu0 %v5761_v24  ;;  %5786 = vmatpush3.bf16.msra.mxu1 %v5785_v49 }
 0x24a   :  { %5763 = vmatprep.subr.bf16.mxu0 %v6201_v5  ;;  %5787 = vmatprep.subr.bf16.mxu1 %v6201_v5 }
 0x24d   :  { %5765 = vmatpush3.bf16.msra.mxu0 %v5764_v44  ;;  %5789 = vmatpush3.bf16.msra.mxu1 %v5788_v56 }
 0x24e   :  { %5766 = vmatprep.subr.bf16.mxu0 %v6201_v5  ;;  %5790 = vmatprep.subr.bf16.mxu1 %v6201_v5 }
 0x251   :  { %5768 = vmatpush3.bf16.msra.mxu0 %v5767_v28  ;;  %5792 = vmatpush3.bf16.msra.mxu1 %v5791_v53 }
 0x252   :  { %5769 = vmatprep.subr.bf16.mxu0 %v6201_v5  ;;  %5793 = vmatprep.subr.bf16.mxu1 %v6201_v5 }
 0x255   :  { %5771 = vmatpush3.bf16.msra.mxu0 %v5770_v6 }
 0x256   :  { %5772 = vmatprep.subr.bf16.mxu0 %v6201_v5 }
 0x265   :  { %v4093_v20 = vpop.f32.mrb[24].mxu0 }
 0x266   :  { %v4094_v13 = vpop.f32.mrb[25].mxu0 }
 0x267   :  { %v4095_v51 = vadd.f32 %v4094_v13, %v4093_v20 }
 0x269   :  { %v4013_v40 = vpop.f32.mrb[12].mxu1  ;;  %v4096_v39 = vpop.f32.mrb[26].mxu0 }
 0x26a   :  { %v4014_v14 = vpop.f32.mrb[13].mxu1  ;;  %v4097_v33 = vpop.f32.mrb[27].mxu0 }
 0x26b   :  { %v4015_v17 = vadd.f32 %v4014_v14, %v4013_v40  ;;  %v4098_v9 = vadd.f32 %v4097_v33, %v4096_v39 }
 0x26d   :  { %v7955_v38 = vadd.f32 %v4095_v51, %v4015_v17  ;;  %v4016_v48 = vpop.f32.mrb[14].mxu1  ;;  %v4099_v16 = vpop.f32.mrb[28].mxu0 }
 0x26e   :  { %v4017_v7 = vpop.f32.mrb[15].mxu1  ;;  %v4100_v35 = vpop.f32.mrb[29].mxu0 }
 0x26f   :  { %v4018_v3 = vadd.f32 %v4017_v7, %v4016_v48  ;;  %v4101_v22 = vadd.f32 %v4100_v35, %v4099_v16 }
 0x271   :  { %v7971_v52 = vadd.f32 %v4098_v9, %v4018_v3  ;;  %v4019_v31 = vpop.f32.mrb[16].mxu1  ;;  %v4102_v26 = vpop.f32.mrb[30].mxu0  ;;  %v2520_v3 = vld [vmem:[%s8458_s5 + $0x60] sm:$0xff] }
 0x272   :  { %v4020_v30 = vpop.f32.mrb[17].mxu1  ;;  %v4103_v45 = vpop.f32.mrb[31].mxu0 }
 0x273   :  { %v4021_v27 = vadd.f32 %v4020_v30, %v4019_v31  ;;  %v4104_v2 = vadd.f32 %v4103_v45, %v4102_v26  ;;  %v3793_v30 = vld [vmem:[%s8458_s5 + $0xf8] sm:$0xff] }
 0x274   :  { %v5773_v63 = vpack.c.bf16 %v3793_v30, %v3792_v37 }
 0x275   :  { %v7987_v60 = vadd.f32 %v4101_v22, %v4021_v27  ;;  %v4022_v57 = vpop.f32.mrb[18].mxu1  ;;  %v4105_v36 = vpop.f32.mrb[32].mxu0  ;;  %v2521_v22 = vld [vmem:[%s8458_s5 + $0x68] sm:$0xff] }
 0x276   :  { %v4023_v29 = vpop.f32.mrb[19].mxu1  ;;  %v4106_v23 = vpop.f32.mrb[33].mxu0  ;;  %v5794_v24 = vpack.c.bf16 %v2521_v22, %v2520_v3  ;;  %5774 = vmatpush3.bf16.msra.mxu0 %v5773_v63 }
 0x277   :  { %v4024_v20 = vadd.f32 %v4023_v29, %v4022_v57  ;;  %v4107_v62 = vadd.f32 %v4106_v23, %v4105_v36  ;;  %5799 = vmatprep.subr.bf16.mxu0 %v6201_v5 }
 0x278   :  { %5795 = vmatpush3.bf16.msra.mxu1 %v5794_v24 }
 0x279   :  { %v8003_v41 = vadd.f32 %v4104_v2, %v4024_v20  ;;  %v4025_v13 = vpop.f32.mrb[20].mxu1  ;;  %v4108_v59 = vpop.f32.mrb[34].mxu0  ;;  %5796 = vmatprep.subr.bf16.mxu1 %v6201_v5 }
 0x27a   :  { %v4026_v51 = vpop.f32.mrb[21].mxu1  ;;  %v4109_v32 = vpop.f32.mrb[35].mxu0 }
 0x27b   :  { %v4027_v46 = vadd.f32 %v4026_v51, %v4025_v13  ;;  %v4110_v4 = vadd.f32 %v4109_v32, %v4108_v59 }
 0x27d   :  { %v5998_v40 = vadd.f32 %v4107_v62, %v4027_v46  ;;  %v4028_v39 = vpop.f32.mrb[22].mxu1  ;;  %v4111_v8 = vpop.f32.mrb[36].mxu0 }
 0x27e   :  { %v4029_v12 = vpop.f32.mrb[23].mxu1  ;;  %v4112_v50 = vpop.f32.mrb[37].mxu0 }
 0x27f   :  { %v4030_v14 = vadd.f32 %v4029_v12, %v4028_v39  ;;  %v4113_v33 = vadd.f32 %v4112_v50, %v4111_v8 }
 0x281   :  { %v5993_v42 = vadd.f32 %v4110_v4, %v4030_v14  ;;  %v4031_v15 = vpop.f32.mrb[24].mxu1  ;;  %v4114_v17 = vpop.f32.mrb[38].mxu0 }
 0x282   :  { %v4032_v9 = vpop.f32.mrb[25].mxu1  ;;  %v4115_v11 = vpop.f32.mrb[39].mxu0 }
 0x283   :  { %v4033_v48 = vadd.f32 %v4032_v9, %v4031_v15  ;;  %v4116_v16 = vadd.f32 %v4115_v11, %v4114_v17 }
 0x285   :  { %v6008_v43 = vadd.f32 %v4113_v33, %v4033_v48  ;;  %v4034_v18 = vpop.f32.mrb[26].mxu1  ;;  %v4173_v55 = vpop.f32.mrb[40].mxu0 }
 0x286   :  { %v4035_v7 = vpop.f32.mrb[27].mxu1  ;;  %v4174_v35 = vpop.f32.mrb[41].mxu0 }
 0x287   :  { %v4036_v19 = vadd.f32 %v4035_v7, %v4034_v18  ;;  %v4175_v10 = vadd.f32 %v4174_v35, %v4173_v55 }
 0x289   :  { %v6003_v31 = vadd.f32 %v4116_v16, %v4036_v19  ;;  %v5979_v26 = vadd.f32 %v7955_v38, %v4175_v10  ;;  %v4176_v49 = vpop.f32.mrb[42].mxu0  ;;  %v2523_v38 = vld [vmem:[%s8458_s5 + $0x78] sm:$0xff] }
 0x28a   :  { %v4177_v25 = vpop.f32.mrb[43].mxu0  ;;  %v5797_v27 = vpack.c.bf16 %v2523_v38, %v2522_v58 }
 0x28b   :  { %v4178_v45 = vadd.f32 %v4177_v25, %v4176_v49 }
 0x28c   :  { %5798 = vmatpush3.bf16.msra.mxu1 %v5797_v27 }
 0x28d   :  { %v5974_v2 = vadd.f32 %v7971_v52, %v4178_v45  ;;  %v4179_v44 = vpop.f32.mrb[44].mxu0  ;;  %5823 = vmatprep.subr.bf16.mxu1 %v6201_v5 }
 0x28e   :  { %v4180_v57 = vpop.f32.mrb[45].mxu0 }
 0x28f   :  { %v4181_v36 = vadd.f32 %v4180_v57, %v4179_v44 }
 0x291   :  { %v5989_v56 = vadd.f32 %v7987_v60, %v4181_v36  ;;  %v4182_v21 = vpop.f32.mrb[46].mxu0 }
 0x292   :  { %v4183_v52 = vpop.f32.mrb[47].mxu0 }
 0x293   :  { %v4184_v34 = vadd.f32 %v4183_v52, %v4182_v21 }
 0x295   :  { %v5984_v29 = vadd.f32 %v8003_v41, %v4184_v34  ;;  %v4185_v23 = vpop.f32.mrb[48].mxu0 }
 0x296   :  { %v4186_v54 = vpop.f32.mrb[49].mxu0 }
 0x297   :  { %v4187_v61 = vadd.f32 %v4186_v54, %v4185_v23 }
 0x299   :  { %v5999_v20 = vadd.f32 %v5998_v40, %v4187_v61  ;;  %v4188_v62 = vpop.f32.mrb[50].mxu0 }
 0x29a   :  { %v4189_v28 = vpop.f32.mrb[51].mxu0 }
 0x29b   :  { %v4190_v13 = vadd.f32 %v4189_v28, %v4188_v62 }
 0x29d   :  { %v5994_v59 = vadd.f32 %v5993_v42, %v4190_v13  ;;  %v4191_v53 = vpop.f32.mrb[52].mxu0 }
 0x29e   :  { %v4192_v47 = vpop.f32.mrb[53].mxu0 }
 0x29f   :  { %v4193_v1 = vadd.f32 %v4192_v47, %v4191_v53 }
 0x2a1   :  { %v6009_v51 = vadd.f32 %v6008_v43, %v4193_v1  ;;  %v4194_v32 = vpop.f32.mrb[54].mxu0 }
 0x2a2   :  { %v4195_v46 = vpop.f32.mrb[55].mxu0 }
 0x2a3   :  { %v4196_v60 = vadd.f32 %v4195_v46, %v4194_v32 }
 0x2a5   :  { %v6004_v4 = vadd.f32 %v6003_v31, %v4196_v60 }
 0x2a6   :  { %v4253_v6 = vpop.f32.mrb[56].mxu0 }
 0x2a7   :  { %v4254_v39 = vpop.f32.mrb[57].mxu0 }
 0x2a8   :  { %v4255_v8 = vadd.f32 %v4254_v39, %v4253_v6 }
 0x2aa   :  { %v5980_v41 = vadd.f32 %v5979_v26, %v4255_v8 }
 0x2ab   :  { %v4256_v12 = vpop.f32.mrb[58].mxu0 }
 0x2ac   :  { %v4257_v50 = vpop.f32.mrb[59].mxu0 }
 0x2ad   :  { %v4258_v14 = vadd.f32 %v4257_v50, %v4256_v12 }
 0x2af   :  { %v5975_v40 = vadd.f32 %v5974_v2, %v4258_v14  ;;  %v4259_v33 = vpop.f32.mrb[60].mxu0  ;;  %v3794_v14 = vld [vmem:[%s8458_s5 + $0x100] sm:$0xff] }
 0x2b0   :  { %v4260_v15 = vpop.f32.mrb[61].mxu0 }
 0x2b1   :  { %v4261_v17 = vadd.f32 %v4260_v15, %v4259_v33  ;;  %v3810_v15 = vld [vmem:[%s8458_s5 + $0x180] sm:$0xff] }
 0x2b3   :  { %v5990_v42 = vadd.f32 %v5989_v56, %v4261_v17  ;;  %v4262_v9 = vpop.f32.mrb[62].mxu0  ;;  %v3811_v17 = vld [vmem:[%s8458_s5 + $0x188] sm:$0xff] }
 0x2b4   :  { %v4263_v11 = vpop.f32.mrb[63].mxu0 }
 0x2b5   :  { %v4264_v48 = vadd.f32 %v4263_v11, %v4262_v9 }
 0x2b7   :  { %v5985_v16 = vadd.f32 %v5984_v29, %v4264_v48  ;;  %v4265_v43 = vpop.f32.mrb[64].mxu0 }
 0x2b8   :  { %v4266_v18 = vpop.f32.mrb[65].mxu0 }
 0x2b9   :  { %v4267_v55 = vadd.f32 %v4266_v18, %v4265_v43 }
 0x2bb   :  { %v6000_v7 = vadd.f32 %v5999_v20, %v4267_v55  ;;  %v4268_v35 = vpop.f32.mrb[66].mxu0  ;;  %v5824_v55 = vpack.c.bf16 %v3811_v17, %v3810_v15  ;;  %v3809_v15 = vld [vmem:[%s8458_s5 + $0x178] sm:$0xff]  ;;  %v3824_v17 = vld [vmem:[%s8458_s5 + $0x1f0] sm:$0xff] }
 0x2bc   :  { %v4269_v19 = vpop.f32.mrb[67].mxu0 }
 0x2bd   :  { %v4270_v10 = vadd.f32 %v4269_v19, %v4268_v35  ;;  %v3797_v35 = vld [vmem:[%s8458_s5 + $0x118] sm:$0xff] }
 0x2bf   :  { %v5995_v3 = vadd.f32 %v5994_v59, %v4270_v10  ;;  %v4271_v22 = vpop.f32.mrb[68].mxu0 }
 0x2c0   :  { %v4272_v24 = vpop.f32.mrb[69].mxu0 }
 0x2c1   :  { %v4273_v31 = vadd.f32 %v4272_v24, %v4271_v22  ;;  %v3813_v22 = vld [vmem:[%s8458_s5 + $0x198] sm:$0xff] }
 0x2c3   :  { %v6010_v26 = vadd.f32 %v6009_v51, %v4273_v31  ;;  %v4274_v49 = vpop.f32.mrb[70].mxu0 }
 0x2c4   :  { %v4275_v25 = vpop.f32.mrb[71].mxu0 }
 0x2c5   :  { %v4276_v37 = vadd.f32 %v4275_v25, %v4274_v49 }
 0x2c7   :  { %v6005_v30 = vadd.f32 %v6004_v4, %v4276_v37  ;;  %v4333_v45 = vpop.f32.mrb[72].mxu0  ;;  %v3798_v37 = vld [vmem:[%s8458_s5 + $0x120] sm:$0xff] }
 0x2c8   :  { %v4334_v63 = vpop.f32.mrb[73].mxu0 }
 0x2c9   :  { %v4335_v58 = vadd.f32 %v4334_v63, %v4333_v45  ;;  %v3814_v63 = vld [vmem:[%s8458_s5 + $0x1a0] sm:$0xff] }
 0x2cb   :  { %v4336_v38 = vpop.f32.mrb[74].mxu0  ;;  %v5981_v27 = vadd.f32 %v5980_v41, %v4335_v58  ;;  %v8048_v41 = vld [vmem:[%s8457_s4] ss:$0 sm:$0xff]  ;;  %v3815_v58 = vld [vmem:[%s8458_s5 + $0x1a8] sm:$0xff] }
 0x2cc   :  { %v4337_v2 = vpop.f32.mrb[75].mxu0 }
 0x2cd   :  { %v4338_v44 = vadd.f32 %v4337_v2, %v4336_v38 }
 0x2cf   :  { %v4339_v57 = vpop.f32.mrb[76].mxu0  ;;  %v5976_v36 = vadd.f32 %v5975_v40, %v4338_v44  ;;  %v3795_v40 = vld [vmem:[%s8458_s5 + $0x108] sm:$0xff] }
 0x2d0   :  { %v4340_v56 = vpop.f32.mrb[77].mxu0  ;;  %v5800_v48 = vpack.c.bf16 %v3795_v40, %v3794_v14 }
 0x2d1   :  { %v4341_v21 = vadd.f32 %v4340_v56, %v4339_v57  ;;  %v5830_v56 = vpack.c.bf16 %v3815_v58, %v3814_v63 }
 0x2d3   :  { %v4342_v52 = vpop.f32.mrb[78].mxu0  ;;  %v5991_v34 = vadd.f32 %v5990_v42, %v4341_v21  ;;  %v3800_v21 = vld [vmem:[%s8458_s5 + $0x130] sm:$0xff] }
 0x2d4   :  { %v4343_v29 = vpop.f32.mrb[79].mxu0 }
 0x2d5   :  { %v4344_v23 = vadd.f32 %v4343_v29, %v4342_v52  ;;  %v3801_v52 = vld [vmem:[%s8458_s5 + $0x138] sm:$0xff]  ;;  %v3816_v29 = vld [vmem:[%s8458_s5 + $0x1b0] sm:$0xff] }
 0x2d7   :  { %v4345_v54 = vpop.f32.mrb[80].mxu0  ;;  %v5986_v61 = vadd.f32 %v5985_v16, %v4344_v23  ;;  %v3817_v23 = vld [vmem:[%s8458_s5 + $0x1b8] sm:$0xff] }
 0x2d8   :  { %v4346_v20 = vpop.f32.mrb[81].mxu0 }
 0x2d9   :  { %v4347_v62 = vadd.f32 %v4346_v20, %v4345_v54  ;;  %v5809_v20 = vpack.c.bf16 %v3801_v52, %v3800_v21  ;;  %v3834_v52 = vld [vmem:[%s8458_s5 + $0x240] sm:$0xff] }
 0x2db   :  { %v4348_v28 = vpop.f32.mrb[82].mxu0  ;;  %v6001_v13 = vadd.f32 %v6000_v7, %v4347_v62  ;;  %v3796_v7 = vld [vmem:[%s8458_s5 + $0x110] sm:$0xff]  ;;  %v5833_v62 = vpack.c.bf16 %v3817_v23, %v3816_v29  ;;  %v3850_v29 = vld [vmem:[%s8458_s5 + $0x2c0] sm:$0xff]  ;;  %v3851_v23 = vld [vmem:[%s8458_s5 + $0x2c8] sm:$0xff] }
 0x2dc   :  { %v4349_v59 = vpop.f32.mrb[83].mxu0  ;;  %v5803_v31 = vpack.c.bf16 %v3797_v35, %v3796_v7  ;;  %v3842_v7 = vld [vmem:[%s8458_s5 + $0x280] sm:$0xff]  ;;  %v3843_v35 = vld [vmem:[%s8458_s5 + $0x288] sm:$0xff] }
 0x2dd   :  { %v4350_v53 = vadd.f32 %v4349_v59, %v4348_v28  ;;  %v3802_v28 = vld [vmem:[%s8458_s5 + $0x140] sm:$0xff] }
 0x2de   :  { %v3818_v59 = vld [vmem:[%s8458_s5 + $0x1c0] sm:$0xff] }
 0x2df   :  { %v4351_v47 = vpop.f32.mrb[84].mxu0  ;;  %v5996_v1 = vadd.f32 %v5995_v3, %v4350_v53  ;;  %v3812_v3 = vld [vmem:[%s8458_s5 + $0x190] sm:$0xff]  ;;  %v3819_v53 = vld [vmem:[%s8458_s5 + $0x1c8] sm:$0xff] }
 0x2e0   :  { %v4352_v51 = vpop.f32.mrb[85].mxu0  ;;  %v5827_v25 = vpack.c.bf16 %v3813_v22, %v3812_v3  ;;  %v5872_v3 = vpack.c.bf16 %v3843_v35, %v3842_v7  ;;  %v3877_v7 = vld [vmem:[%s8458_s5 + $0x398] sm:$0xff] }
 0x2e1   :  { %v4353_v32 = vadd.f32 %v4352_v51, %v4351_v47  ;;  %v3804_v51 = vld [vmem:[%s8458_s5 + $0x150] sm:$0xff] }
 0x2e3   :  { %v4354_v46 = vpop.f32.mrb[86].mxu0  ;;  %v6011_v60 = vadd.f32 %v6010_v26, %v4353_v32  ;;  %v3805_v32 = vld [vmem:[%s8458_s5 + $0x158] sm:$0xff] }
 0x2e4   :  { %v4355_v4 = vpop.f32.mrb[87].mxu0 }
 0x2e5   :  { %v4356_v6 = vadd.f32 %v4355_v4, %v4354_v46  ;;  %v3820_v46 = vld [vmem:[%s8458_s5 + $0x1d0] sm:$0xff]  ;;  %v5815_v4 = vpack.c.bf16 %v3805_v32, %v3804_v51  ;;  %v3838_v51 = vld [vmem:[%s8458_s5 + $0x260] sm:$0xff]  ;;  %v3839_v32 = vld [vmem:[%s8458_s5 + $0x268] sm:$0xff] }
 0x2e7   :  { %v6006_v39 = vadd.f32 %v6005_v30, %v4356_v6  ;;  %v3799_v30 = vld [vmem:[%s8458_s5 + $0x128] sm:$0xff] }
 0x2e8   :  { %v5806_v44 = vpack.c.bf16 %v3799_v30, %v3798_v37  ;;  %v3831_v37 = vld [vmem:[%s8458_s5 + $0x228] sm:$0xff]  ;;  %v3846_v30 = vld [vmem:[%s8458_s5 + $0x2a0] sm:$0xff] }
 0x309   :  { %v4900_v8 = vpop.f32.mrb[28].mxu1 }
 0x30a   :  { %v5977_v12 = vadd.f32 %v5976_v36, %v4900_v8  ;;  %v2438_v50 = vpop.f32.mrb[29].mxu1  ;;  %v3807_v8 = vld [vmem:[%s8458_s5 + $0x168] sm:$0xff] }
 0x30b   :  { %v5982_v33 = vadd.f32 %v5981_v27, %v2438_v50  ;;  %v3823_v50 = vld [vmem:[%s8458_s5 + $0x1e8] sm:$0xff] }
 0x30c   :  { %v2493_v42 = vadd.f32 %v5977_v12, %v8048_v41  ;;  %v3822_v12 = vld [vmem:[%s8458_s5 + $0x1e0] sm:$0xff] }
 0x30d   :  { %v2492_v9 = vadd.f32 %v5982_v33, %v8048_v41  ;;  %v4903_v11 = vpop.f32.mrb[30].mxu1  ;;  %v5842_v40 = vpack.c.bf16 %v3823_v50, %v3822_v12  ;;  %v3808_v33 = vld [vmem:[%s8458_s5 + $0x170] sm:$0xff]  ;;  %v3857_v50 = vld [vmem:[%s8458_s5 + $0x2f8] sm:$0xff] }
 0x30e   :  { %v2501_v16 = vmax.f32 %v2493_v42, 0.0  ;;  %v8064_v43 = vadd.f32 %v5986_v61, %v4903_v11  ;;  %v2448_v18 = vpop.f32.mrb[31].mxu1  ;;  %v3825_v42 = vld [vmem:[%s8458_s5 + $0x1f8] sm:$0xff]  ;;  %v3856_v12 = vld [vmem:[%s8458_s5 + $0x2f0] sm:$0xff] }
 0x30f   :  { %v2500_v19 = vmax.f32 %v2492_v9, 0.0  ;;  %v8072_v10 = vadd.f32 %v5991_v34, %v2448_v18  ;;  %v5821_v9 = vpack.c.bf16 %v3809_v15, %v3808_v33  ;;  %v3827_v18 = vld [vmem:[%s8458_s5 + $0x208] sm:$0xff]  ;;  %v3858_v33 = vld [vmem:[%s8458_s5 + $0x300] sm:$0xff] }
 0x310   :  { %4943 = vmatmul.mubr.f32.vlgmr.msra.gmra.mrb[88].mxu0 %v2501_v16  ;;  %v3826_v16 = vld [vmem:[%s8458_s5 + $0x200] sm:$0xff]  ;;  %v3859_v15 = vld [vmem:[%s8458_s5 + $0x308] sm:$0xff] }
 0x311   :  { %5801 = vmatpush3.bf16.msra.mxu0 %v5800_v48  ;;  %v4906_v24 = vpop.f32.mrb[32].mxu1  ;;  %4978 = vmatmul.mubr.f32.vlgmr.msra.gmra.mrb[36].mxu1 %v2500_v19  ;;  %v2494_v11 = vadd.f32 %v8072_v10, %v8048_v41  ;;  %v5845_v48 = vpack.c.bf16 %v3825_v42, %v3824_v17  ;;  %v5848_v19 = vpack.c.bf16 %v3827_v18, %v3826_v16  ;;  %v3874_v17 = vld [vmem:[%s8458_s5 + $0x380] sm:$0xff]  ;;  %v3875_v42 = vld [vmem:[%s8458_s5 + $0x388] sm:$0xff]  ;;  %v3860_v16 = vld [vmem:[%s8458_s5 + $0x310] sm:$0xff] }
 0x312   :  { %v5997_v26 = vadd.f32 %v5996_v1, %v4906_v24  ;;  %5825 = vmatpush3.bf16.msra.mxu1 %v5824_v55  ;;  %v2458_v49 = vpop.f32.mrb[33].mxu1  ;;  %5802 = vmatprep.subr.bf16.mxu0 %v6201_v5  ;;  %v5836_v1 = vpack.c.bf16 %v3819_v53, %v3818_v59  ;;  %v2495_v55 = vadd.f32 %v8064_v43, %v8048_v41  ;;  %v3829_v43 = vld [vmem:[%s8458_s5 + $0x218] sm:$0xff]  ;;  %v3844_v24 = vld [vmem:[%s8458_s5 + $0x290] sm:$0xff] }
 0x313   :  { %v6002_v45 = vadd.f32 %v6001_v13, %v2458_v49  ;;  %5826 = vmatprep.subr.bf16.mxu1 %v6201_v5  ;;  %5012 = vmatprep.mubr.msk.f32.mxu0 %vm6202_vm0, %v6200_v0  ;;  %v3803_v13 = vld [vmem:[%s8458_s5 + $0x148] sm:$0xff]  ;;  %v2502_v10 = vmax.f32 %v2494_v11, 0.0  ;;  %v3852_v59 = vld [vmem:[%s8458_s5 + $0x2d0] sm:$0xff]  ;;  %v3853_v53 = vld [vmem:[%s8458_s5 + $0x2d8] sm:$0xff] }
 0x314   :  { %v8097_v38 = vadd.f32 %v5997_v26, %v8048_v41  ;;  %5047 = vmatprep.mubr.msk.f32.mxu1 %vm6202_vm0, %v6200_v0  ;;  %v5812_v47 = vpack.c.bf16 %v3803_v13, %v3802_v28  ;;  %v2503_v22 = vmax.f32 %v2495_v55, 0.0  ;;  %v3836_v28 = vld [vmem:[%s8458_s5 + $0x250] sm:$0xff]  ;;  %v3837_v13 = vld [vmem:[%s8458_s5 + $0x258] sm:$0xff] }
 0x315   :  { %v8102_v27 = vadd.f32 %v6002_v45, %v8048_v41  ;;  %5804 = vmatpush3.bf16.msra.mxu0 %v5803_v31  ;;  %v4909_v2 = vpop.f32.mrb[34].mxu1  ;;  %v3845_v31 = vld [vmem:[%s8458_s5 + $0x298] sm:$0xff]  ;;  %v3847_v45 = vld [vmem:[%s8458_s5 + $0x2a8] sm:$0xff] }
 0x316   :  { %v6007_v57 = vadd.f32 %v6006_v39, %v4909_v2  ;;  %5828 = vmatpush3.bf16.msra.mxu1 %v5827_v25  ;;  %v2468_v36 = vpop.f32.mrb[35].mxu1  ;;  %5805 = vmatprep.subr.bf16.mxu0 %v6201_v5  ;;  %v3806_v39 = vld [vmem:[%s8458_s5 + $0x160] sm:$0xff]  ;;  %v5875_v49 = vpack.c.bf16 %v3845_v31, %v3844_v24  ;;  %v5878_v58 = vpack.c.bf16 %v3847_v45, %v3846_v30  ;;  %v3832_v2 = vld [vmem:[%s8458_s5 + $0x230] sm:$0xff]  ;;  %v3861_v18 = vld [vmem:[%s8458_s5 + $0x318] sm:$0xff]  ;;  %v2505_v55 = vmax.f32 %v8097_v38, 0.0 }
 0x317   :  { %v6012_v34 = vadd.f32 %v6011_v60, %v2468_v36  ;;  %5829 = vmatprep.subr.bf16.mxu1 %v6201_v5  ;;  %v3821_v60 = vld [vmem:[%s8458_s5 + $0x1d8] sm:$0xff]  ;;  %v5818_v14 = vpack.c.bf16 %v3807_v8, %v3806_v39  ;;  %v3830_v25 = vld [vmem:[%s8458_s5 + $0x220] sm:$0xff]  ;;  %v3840_v39 = vld [vmem:[%s8458_s5 + $0x270] sm:$0xff]  ;;  %v2504_v11 = vmax.f32 %v8102_v27, 0.0  ;;  %v5899_v35 = vpack.c.bf16 %v3861_v18, %v3860_v16 }
 0x318   :  { %v8119_v54 = vadd.f32 %v6007_v57, %v8048_v41  ;;  %v5839_v6 = vpack.c.bf16 %v3821_v60, %v3820_v46  ;;  %v5854_v63 = vpack.c.bf16 %v3831_v37, %v3830_v25  ;;  %v3848_v57 = vld [vmem:[%s8458_s5 + $0x2b0] sm:$0xff]  ;;  %v3849_v36 = vld [vmem:[%s8458_s5 + $0x2b8] sm:$0xff]  ;;  %v3854_v46 = vld [vmem:[%s8458_s5 + $0x2e0] sm:$0xff] }
 0x319   :  { %v8122_v61 = vadd.f32 %v6012_v34, %v8048_v41  ;;  %5807 = vmatpush3.bf16.msra.mxu0 %v5806_v44  ;;  %v3828_v41 = vld [vmem:[%s8458_s5 + $0x210] sm:$0xff]  ;;  %v3833_v44 = vld [vmem:[%s8458_s5 + $0x238] sm:$0xff]  ;;  %v5881_v21 = vpack.c.bf16 %v3849_v36, %v3848_v57  ;;  %v3835_v34 = vld [vmem:[%s8458_s5 + $0x248] sm:$0xff] }
 0x31a   :  { %5831 = vmatpush3.bf16.msra.mxu1 %v5830_v56  ;;  %5808 = vmatprep.subr.bf16.mxu0 %v6201_v5  ;;  %v5851_v26 = vpack.c.bf16 %v3829_v43, %v3828_v41  ;;  %v5857_v56 = vpack.c.bf16 %v3833_v44, %v3832_v2  ;;  %v3855_v60 = vld [vmem:[%s8458_s5 + $0x2e8] sm:$0xff]  ;;  %v3841_v8 = vld [vmem:[%s8458_s5 + $0x278] sm:$0xff]  ;;  %v3876_v27 = vld [vmem:[%s8458_s5 + $0x390] sm:$0xff] }
 0x31b   :  { %5832 = vmatprep.subr.bf16.mxu1 %v6201_v5  ;;  %v3862_v38 = vld [vmem:[%s8458_s5 + $0x320] sm:$0xff]  ;;  %v3879_v41 = vld [vmem:[%s8458_s5 + $0x3a8] sm:$0xff]  ;;  %v3864_v24 = vld [vmem:[%s8458_s5 + $0x330] sm:$0xff] }
 0x31c   :  { %v3865_v31 = vld [vmem:[%s8458_s5 + $0x338] sm:$0xff]  ;;  %v3866_v30 = vld [vmem:[%s8458_s5 + $0x340] sm:$0xff]  ;;  %v3867_v45 = vld [vmem:[%s8458_s5 + $0x348] sm:$0xff] }
 0x31d   :  { %5810 = vmatpush3.bf16.msra.mxu0 %v5809_v20  ;;  %v5860_v20 = vpack.c.bf16 %v3835_v34, %v3834_v52  ;;  %v5905_v25 = vpack.c.bf16 %v3865_v31, %v3864_v24  ;;  %v5908_v2 = vpack.c.bf16 %v3867_v45, %v3866_v30  ;;  %v3868_v57 = vld [vmem:[%s8458_s5 + $0x350] sm:$0xff]  ;;  %v3869_v36 = vld [vmem:[%s8458_s5 + $0x358] sm:$0xff]  ;;  %v3304_v24 = vld [vmem:[#allocation4] sm:$0xff] }
 0x31e   :  { %5834 = vmatpush3.bf16.msra.mxu1 %v5833_v62  ;;  %5811 = vmatprep.subr.bf16.mxu0 %v6201_v5  ;;  %v5884_v62 = vpack.c.bf16 %v3851_v23, %v3850_v29  ;;  %v5911_v52 = vpack.c.bf16 %v3869_v36, %v3868_v57  ;;  %v3870_v29 = vld [vmem:[%s8458_s5 + $0x360] sm:$0xff]  ;;  %v3871_v23 = vld [vmem:[%s8458_s5 + $0x368] sm:$0xff]  ;;  %v3307_v30 = vld [vmem:[#allocation4 + $0x18] sm:$0xff] }
 0x31f   :  { %5835 = vmatprep.subr.bf16.mxu1 %v6201_v5  ;;  %v3305_v31 = vld [vmem:[#allocation4 + $0x8] sm:$0xff]  ;;  %v3311_v57 = vld [vmem:[#allocation4 + $0x38] sm:$0xff] }
 0x321   :  { %5813 = vmatpush3.bf16.msra.mxu0 %v5812_v47  ;;  %v5863_v47 = vpack.c.bf16 %v3837_v13, %v3836_v28  ;;  %v5914_v28 = vpack.c.bf16 %v3871_v23, %v3870_v29  ;;  %v3398_v23 = vld [vmem:[#allocation6 + $0x20] sm:$0xff] }
 0x322   :  { %5837 = vmatpush3.bf16.msra.mxu1 %v5836_v1  ;;  %5814 = vmatprep.subr.bf16.mxu0 %v6201_v5  ;;  %v5887_v1 = vpack.c.bf16 %v3853_v53, %v3852_v59  ;;  %v3872_v59 = vld [vmem:[%s8458_s5 + $0x370] sm:$0xff]  ;;  %v3873_v53 = vld [vmem:[%s8458_s5 + $0x378] sm:$0xff] }
 0x323   :  { %5838 = vmatprep.subr.bf16.mxu1 %v6201_v5 }
 0x325   :  { %5816 = vmatpush3.bf16.msra.mxu0 %v5815_v4  ;;  %v5866_v4 = vpack.c.bf16 %v3839_v32, %v3838_v51  ;;  %v5917_v51 = vpack.c.bf16 %v3873_v53, %v3872_v59 }
 0x326   :  { %5840 = vmatpush3.bf16.msra.mxu1 %v5839_v6  ;;  %5817 = vmatprep.subr.bf16.mxu0 %v6201_v5  ;;  %v5890_v6 = vpack.c.bf16 %v3855_v60, %v3854_v46  ;;  %v2506_v46 = vmax.f32 %v8122_v61, 0.0  ;;  %v2507_v60 = vmax.f32 %v8119_v54, 0.0  ;;  %v3220_v61 = vld [vmem:[#allocation2 + $0x10] sm:$0xff] }
 0x327   :  { %5841 = vmatprep.subr.bf16.mxu1 %v6201_v5 }
 0x329   :  { %5819 = vmatpush3.bf16.msra.mxu0 %v5818_v14  ;;  %v5869_v14 = vpack.c.bf16 %v3841_v8, %v3840_v39  ;;  %v3221_v8 = vld [vmem:[#allocation2 + $0x18] sm:$0xff] }
 0x32a   :  { %5843 = vmatpush3.bf16.msra.mxu1 %v5842_v40  ;;  %5820 = vmatprep.subr.bf16.mxu0 %v6201_v5  ;;  %v5893_v40 = vpack.c.bf16 %v3857_v50, %v3856_v12  ;;  %v5947_v12 = vpack.c.bf16 %v3221_v8, %v3220_v61 }
 0x32b   :  { %5844 = vmatprep.subr.bf16.mxu1 %v6201_v5 }
 0x32d   :  { %5822 = vmatpush3.bf16.msra.mxu0 %v5821_v9  ;;  %v5896_v9 = vpack.c.bf16 %v3859_v15, %v3858_v33 }
 0x32e   :  { %5846 = vmatpush3.bf16.msra.mxu1 %v5845_v48  ;;  %5847 = vmatprep.subr.bf16.mxu0 %v6201_v5  ;;  %v5920_v48 = vpack.c.bf16 %v3875_v42, %v3874_v17 }
 0x32f   :  { %5871 = vmatprep.subr.bf16.mxu1 %v6201_v5 }
 0x330   :  { %5013 = vmatmul.mubr.f32.vlgmr.msra.gmra.mrb[90].mxu0 %v2502_v10  ;;  %v3863_v10 = vld [vmem:[%s8458_s5 + $0x328] sm:$0xff] }
 0x331   :  { %5048 = vmatmul.mubr.f32.vlgmr.msra.gmra.mrb[38].mxu1 %v2503_v22  ;;  %5849 = vmatpush3.bf16.msra.mxu0 %v5848_v19  ;;  %v5923_v19 = vpack.c.bf16 %v3877_v7, %v3876_v27  ;;  %v5902_v43 = vpack.c.bf16 %v3863_v10, %v3862_v38 }
 0x332   :  { %5873 = vmatpush3.bf16.msra.mxu1 %v5872_v3  ;;  %5850 = vmatprep.subr.bf16.mxu0 %v6201_v5  ;;  %v3878_v3 = vld [vmem:[%s8458_s5 + $0x3a0] sm:$0xff] }
 0x333   :  { %5874 = vmatprep.subr.bf16.mxu1 %v6201_v5  ;;  %5082 = vmatprep.mubr.msk.f32.mxu0 %vm6202_vm0, %v6200_v0  ;;  %v5926_v22 = vpack.c.bf16 %v3879_v41, %v3878_v3  ;;  %v3890_v41 = vld [vmem:[%s8459_s6] ss:$0 sm:$0xff] }
 0x334   :  { %5117 = vmatprep.mubr.msk.f32.mxu1 %vm6202_vm0, %v6200_v0 }
 0x335   :  { %5852 = vmatpush3.bf16.msra.mxu0 %v5851_v26  ;;  %v3880_v26 = vld [vmem:[%s8458_s5 + $0x3b0] sm:$0xff] }
 0x336   :  { %5876 = vmatpush3.bf16.msra.mxu1 %v5875_v49  ;;  %5853 = vmatprep.subr.bf16.mxu0 %v6201_v5  ;;  %v3881_v49 = vld [vmem:[%s8458_s5 + $0x3b8] sm:$0xff] }
 0x337   :  { %5877 = vmatprep.subr.bf16.mxu1 %v6201_v5  ;;  %v5929_v37 = vpack.c.bf16 %v3881_v49, %v3880_v26  ;;  %v5950_v49 = vpack.c.bf16 %v3305_v31, %v3304_v24 }
 0x339   :  { %5855 = vmatpush3.bf16.msra.mxu0 %v5854_v63  ;;  %v3882_v63 = vld [vmem:[%s8458_s5 + $0x3c0] sm:$0xff] }
 0x33a   :  { %5879 = vmatpush3.bf16.msra.mxu1 %v5878_v58  ;;  %5856 = vmatprep.subr.bf16.mxu0 %v6201_v5  ;;  %v3883_v58 = vld [vmem:[%s8458_s5 + $0x3c8] sm:$0xff] }
 0x33b   :  { %5880 = vmatprep.subr.bf16.mxu1 %v6201_v5  ;;  %v5932_v44 = vpack.c.bf16 %v3883_v58, %v3882_v63  ;;  %v3308_v63 = vld [vmem:[#allocation4 + $0x20] sm:$0xff]  ;;  %v3309_v58 = vld [vmem:[#allocation4 + $0x28] sm:$0xff] }
 0x33d   :  { %5858 = vmatpush3.bf16.msra.mxu0 %v5857_v56  ;;  %v3884_v56 = vld [vmem:[%s8458_s5 + $0x3d0] sm:$0xff] }
 0x33e   :  { %5882 = vmatpush3.bf16.msra.mxu1 %v5881_v21  ;;  %5859 = vmatprep.subr.bf16.mxu0 %v6201_v5  ;;  %v3885_v21 = vld [vmem:[%s8458_s5 + $0x3d8] sm:$0xff] }
 0x33f   :  { %5883 = vmatprep.subr.bf16.mxu1 %v6201_v5  ;;  %v5935_v34 = vpack.c.bf16 %v3885_v21, %v3884_v56  ;;  %v3394_v56 = vld [vmem:[#allocation6] sm:$0xff]  ;;  %v3395_v21 = vld [vmem:[#allocation6 + $0x8] sm:$0xff] }
 0x341   :  { %5861 = vmatpush3.bf16.msra.mxu0 %v5860_v20  ;;  %v3886_v20 = vld [vmem:[%s8458_s5 + $0x3e0] sm:$0xff] }
 0x342   :  { %5885 = vmatpush3.bf16.msra.mxu1 %v5884_v62  ;;  %5862 = vmatprep.subr.bf16.mxu0 %v6201_v5  ;;  %v3887_v62 = vld [vmem:[%s8458_s5 + $0x3e8] sm:$0xff] }
 0x343   :  { %5886 = vmatprep.subr.bf16.mxu1 %v6201_v5  ;;  %v5938_v13 = vpack.c.bf16 %v3887_v62, %v3886_v20  ;;  %v3399_v20 = vld [vmem:[#allocation6 + $0x28] sm:$0xff] }
 0x344   :  { %v5968_v62 = vpack.c.bf16 %v3399_v20, %v3398_v23 }
 0x345   :  { %5864 = vmatpush3.bf16.msra.mxu0 %v5863_v47  ;;  %v3888_v47 = vld [vmem:[%s8458_s5 + $0x3f0] sm:$0xff] }
 0x346   :  { %5888 = vmatpush3.bf16.msra.mxu1 %v5887_v1  ;;  %5865 = vmatprep.subr.bf16.mxu0 %v6201_v5  ;;  %v3889_v1 = vld [vmem:[%s8458_s5 + $0x3f8] sm:$0xff] }
 0x347   :  { %5889 = vmatprep.subr.bf16.mxu1 %v6201_v5  ;;  %v5941_v32 = vpack.c.bf16 %v3889_v1, %v3888_v47  ;;  %v3400_v1 = vld [vmem:[#allocation6 + $0x30] sm:$0xff] }
 0x349   :  { %5867 = vmatpush3.bf16.msra.mxu0 %v5866_v4  ;;  %v3218_v4 = vld [vmem:[#allocation2] sm:$0xff] }
 0x34a   :  { %5891 = vmatpush3.bf16.msra.mxu1 %v5890_v6  ;;  %5868 = vmatprep.subr.bf16.mxu0 %v6201_v5  ;;  %v3219_v6 = vld [vmem:[#allocation2 + $0x8] sm:$0xff] }
 0x34b   :  { %5892 = vmatprep.subr.bf16.mxu1 %v6201_v5  ;;  %v5944_v39 = vpack.c.bf16 %v3219_v6, %v3218_v4 }
 0x34d   :  { %5870 = vmatpush3.bf16.msra.mxu0 %v5869_v14 }
 0x34e   :  { %5894 = vmatpush3.bf16.msra.mxu1 %v5893_v40  ;;  %5895 = vmatprep.subr.bf16.mxu0 %v6201_v5 }
 0x34f   :  { %5919 = vmatprep.subr.bf16.mxu1 %v6201_v5 }
 0x350   :  { %5083 = vmatmul.mubr.f32.vlgmr.msra.gmra.mrb[92].mxu0 %v2504_v11 }
 0x351   :  { %5118 = vmatmul.mubr.f32.vlgmr.msra.gmra.mrb[40].mxu1 %v2505_v55  ;;  %5897 = vmatpush3.bf16.msra.mxu0 %v5896_v9 }
 0x352   :  { %5921 = vmatpush3.bf16.msra.mxu1 %v5920_v48  ;;  %5898 = vmatprep.subr.bf16.mxu0 %v6201_v5 }
 0x353   :  { %5922 = vmatprep.subr.bf16.mxu1 %v6201_v5  ;;  %5152 = vmatprep.mubr.msk.f32.mxu0 %vm6202_vm0, %v6200_v0 }
 0x354   :  { %5187 = vmatprep.mubr.msk.f32.mxu1 %vm6202_vm0, %v6200_v0 }
 0x355   :  { %5900 = vmatpush3.bf16.msra.mxu0 %v5899_v35 }
 0x356   :  { %5924 = vmatpush3.bf16.msra.mxu1 %v5923_v19  ;;  %5901 = vmatprep.subr.bf16.mxu0 %v6201_v5 }
 0x357   :  { %5925 = vmatprep.subr.bf16.mxu1 %v6201_v5 }
 0x359   :  { %5903 = vmatpush3.bf16.msra.mxu0 %v5902_v43 }
 0x35a   :  { %5927 = vmatpush3.bf16.msra.mxu1 %v5926_v22  ;;  %5904 = vmatprep.subr.bf16.mxu0 %v6201_v5 }
 0x35b   :  { %5928 = vmatprep.subr.bf16.mxu1 %v6201_v5 }
 0x35d   :  { %5906 = vmatpush3.bf16.msra.mxu0 %v5905_v25 }
 0x35e   :  { %5930 = vmatpush3.bf16.msra.mxu1 %v5929_v37  ;;  %5907 = vmatprep.subr.bf16.mxu0 %v6201_v5  ;;  %v3306_v37 = vld [vmem:[#allocation4 + $0x10] sm:$0xff] }
 0x35f   :  { %5931 = vmatprep.subr.bf16.mxu1 %v6201_v5  ;;  %v5953_v45 = vpack.c.bf16 %v3307_v30, %v3306_v37 }
 0x361   :  { %5909 = vmatpush3.bf16.msra.mxu0 %v5908_v2  ;;  %v5956_v2 = vpack.c.bf16 %v3309_v58, %v3308_v63 }
 0x362   :  { %5933 = vmatpush3.bf16.msra.mxu1 %v5932_v44  ;;  %5910 = vmatprep.subr.bf16.mxu0 %v6201_v5  ;;  %v3310_v44 = vld [vmem:[#allocation4 + $0x30] sm:$0xff] }
 0x363   :  { %5934 = vmatprep.subr.bf16.mxu1 %v6201_v5  ;;  %v5959_v36 = vpack.c.bf16 %v3311_v57, %v3310_v44 }
 0x365   :  { %5912 = vmatpush3.bf16.msra.mxu0 %v5911_v52  ;;  %v3396_v52 = vld [vmem:[#allocation6 + $0x10] sm:$0xff] }
 0x366   :  { %5936 = vmatpush3.bf16.msra.mxu1 %v5935_v34  ;;  %5913 = vmatprep.subr.bf16.mxu0 %v6201_v5  ;;  %v5962_v34 = vpack.c.bf16 %v3395_v21, %v3394_v56 }
 0x367   :  { %5937 = vmatprep.subr.bf16.mxu1 %v6201_v5 }
 0x369   :  { %5915 = vmatpush3.bf16.msra.mxu0 %v5914_v28  ;;  %v3891_v28 = vld [vmem:[%s8461_s8] ss:$0 sm:$0xff] }
 0x36a   :  { %5939 = vmatpush3.bf16.msra.mxu1 %v5938_v13  ;;  %5916 = vmatprep.subr.bf16.mxu0 %v6201_v5 }
 0x36b   :  { %5940 = vmatprep.subr.bf16.mxu1 %v6201_v5 }
 0x36d   :  { %5918 = vmatpush3.bf16.msra.mxu0 %v5917_v51  ;;  %v3401_v51 = vld [vmem:[#allocation6 + $0x38] sm:$0xff] }
 0x36e   :  { %5942 = vmatpush3.bf16.msra.mxu1 %v5941_v32  ;;  %5943 = vmatprep.subr.bf16.mxu0 %v6201_v5  ;;  %v5971_v32 = vpack.c.bf16 %v3401_v51, %v3400_v1 }
 0x36f   :  { %5961 = vmatprep.subr.bf16.mxu1 %v6201_v5 }
 0x370   :  { %5153 = vmatmul.mubr.f32.vlgmr.msra.gmra.mrb[94].mxu0 %v2506_v46  ;;  %v3893_v46 = vld [vmem:[%s8463_s10] ss:$0 sm:$0xff] }
 0x371   :  { %5188 = vmatmul.mubr.f32.vlgmr.msra.gmra.mrb[42].mxu1 %v2507_v60  ;;  %5198 = vmatprep.mubr.msk.f32.mxu0 %vm6202_vm0, %v6200_v0 }
 0x372   :  { %5236 = vmatprep.mubr.msk.f32.mxu1 %vm6202_vm0, %v6200_v0  ;;  %5945 = vmatpush3.bf16.msra.mxu0 %v5944_v39  ;;  %v3895_v39 = vld [vmem:[%s8465_s12] ss:$0 sm:$0xff] }
 0x373   :  { %5946 = vmatprep.subr.bf16.mxu0 %v6201_v5  ;;  %5963 = vmatpush3.bf16.msra.mxu1 %v5962_v34 }
 0x374   :  { %5964 = vmatprep.subr.bf16.mxu1 %v6201_v5 }
 0x376   :  { %5948 = vmatpush3.bf16.msra.mxu0 %v5947_v12 }
 0x377   :  { %5949 = vmatprep.subr.bf16.mxu0 %v6201_v5 }
 0x3e3   :  { %v2607_v54 = vpop.f32.mrb[88].mxu0 }
 0x3e4   :  { %v4944_v50 = vpop.f32.mrb[89].mxu0  ;;  %v2677_v14 = vpop.f32.mrb[36].mxu1 }
 0x3e5   :  { %v2678_v40 = vadd.f32 %v2677_v14, %v2607_v54  ;;  %v4979_v33 = vpop.f32.mrb[37].mxu1 }
 0x403   :  { %v2764_v15 = vpop.f32.mrb[90].mxu0 }
 0x404   :  { %v2768_v17 = vadd.f32 %v2764_v15, %v2678_v40  ;;  %v5014_v42 = vpop.f32.mrb[91].mxu0  ;;  %v2852_v9 = vpop.f32.mrb[38].mxu1 }
 0x405   :  { %v5049_v11 = vpop.f32.mrb[39].mxu1 }
 0x406   :  { %v2856_v48 = vadd.f32 %v2852_v9, %v2768_v17 }
 0x423   :  { %v2940_v16 = vpop.f32.mrb[92].mxu0 }
 0x424   :  { %v2944_v18 = vadd.f32 %v2940_v16, %v2856_v48  ;;  %v5084_v55 = vpop.f32.mrb[93].mxu0  ;;  %v3028_v27 = vpop.f32.mrb[40].mxu1 }
 0x425   :  { %v5119_v7 = vpop.f32.mrb[41].mxu1 }
 0x426   :  { %v3032_v35 = vadd.f32 %v3028_v27, %v2944_v18 }
 0x443   :  { %v3116_v19 = vpop.f32.mrb[94].mxu0 }
 0x444   :  { %v3120_v38 = vadd.f32 %v3116_v19, %v3032_v35  ;;  %v5154_v10 = vpop.f32.mrb[95].mxu0  ;;  %v3204_v3 = vpop.f32.mrb[42].mxu1 }
 0x445   :  { %v5189_v43 = vpop.f32.mrb[43].mxu1 }
 0x446   :  { %v3208_v22 = vadd.f32 %v3204_v3, %v3120_v38 }
 0x448   :  { %v3216_v26 = vadd.f32 %v3890_v41, %v3208_v22 }
 0x44a   :  { %v3217_v25 = vmax.f32 %v3216_v26, 0.0 }
 0x44c   :  { %5199 = vmatmul.mubr.msk.f32.vlgmr.msra.gmra.mrb[96].mxu0 %vm3229_vm1, %v3217_v25 }
 0x44d   :  { %5951 = vmatpush3.bf16.msra.mxu0 %v5950_v49  ;;  %5217 = vmatprep.mubr.msk.f32.mxu0 %vm6202_vm0, %v6200_v0  ;;  %v3397_v0 = vld [vmem:[#allocation6 + $0x18] sm:$0xff] }
 0x44e   :  { %5952 = vmatprep.subr.bf16.mxu0 %v6201_v5  ;;  %v5965_v29 = vpack.c.bf16 %v3397_v0, %v3396_v52 }
 0x450   :  { %5966 = vmatpush3.bf16.msra.mxu1 %v5965_v29 }
 0x451   :  { %5954 = vmatpush3.bf16.msra.mxu0 %v5953_v45  ;;  %5967 = vmatprep.subr.bf16.mxu1 %v6201_v5 }
 0x452   :  { %5955 = vmatprep.subr.bf16.mxu0 %v6201_v5 }
 0x454   :  { %5969 = vmatpush3.bf16.msra.mxu1 %v5968_v62 }
 0x455   :  { %5957 = vmatpush3.bf16.msra.mxu0 %v5956_v2  ;;  %5970 = vmatprep.subr.bf16.mxu1 %v6201_v5 }
 0x456   :  { %5958 = vmatprep.subr.bf16.mxu0 %v6201_v5 }
 0x458   :  { %5972 = vmatpush3.bf16.msra.mxu1 %v5971_v32 }
 0x459   :  { %5960 = vmatpush3.bf16.msra.mxu0 %v5959_v36 }
 0x51f   :  { %v3299_v13 = vpop.f32.mrb[96].mxu0 }
 0x520   :  { %v3300_v59 = vadd.f32 %v3891_v28, %v3299_v13  ;;  %v5200_v53 = vpop.f32.mrb[97].mxu0 }
 0x522   :  { %v3303_v47 = vmax.f32 %v3300_v59, 0.0 }
 0x524   :  { %5218 = vmatmul.mubr.msk.f32.vlgmr.msra.gmra.mrb[98].mxu0 %vm3319_vm2, %v3303_v47 }
 0x5f7   :  { %v3389_v60 = vpop.f32.mrb[98].mxu0 }
 0x5f8   :  { %v3390_v5 = vadd.f32 %v3893_v46, %v3389_v60  ;;  %v5219_v4 = vpop.f32.mrb[99].mxu0 }
 0x5fa   :  { %v3393_v6 = vmax.f32 %v3390_v5, 0.0 }
 0x5fc   :  { %5237 = vmatmul.mubr.msk.f32.vlgmr.msra.gmra.mrb[44].mxu1 %vm3319_vm2, %v3393_v6 }
 0x6cf   :  { %v3478_v61 = vpop.f32.mrb[44].mxu1 }
 0x6d0   :  { %v3479_v8 = vadd.f32 %v3895_v39, %v3478_v61  ;;  %v5238_v12 = vpop.f32.mrb[45].mxu1 }
 0x6d2   :  { %3482 = vst [vmem:[%s8466_s13] sm:$0xff] %v3479_v8 }
 0x6d3   :  { %3487 = vsyncpa [#allocation3], 1 }
 0x6d4   :  { %3488 = vsyncpa [#allocation5], 1 }

</bundles_post_ra>
